<compile_context>
chip_gen: v7x
topology: tpu7x:2x2x1
jax: 0.10.0
libtpu: 0.0.40
codegen_flags: <defaults>
</compile_context>

<pallas_src>
import functools

import jax
import jax.numpy as jnp
from jax.experimental import pallas as pl
from jax.experimental.pallas import tpu as pltpu

INV_TAU = 0.5  # 1 / tau, tau = 2.0 (precomputed: keep the LIF charge on the VALU, no div)


# ----------------------------------------------------------------------------- helpers
def _pick_tm(m, cap=256):
    """Largest row-tile <= cap that divides m, capped at m//2 so the 'parallel' row axis
    has >= 2 steps (keeps both v7x TensorCores busy; harmless on single-TC v5e/v6e)."""
    if m >= 16:
        cap = min(cap, max(8, m // 2))
    for cand in (256, 128, 64, 32, 16, 8):
        if cand <= cap and m % cand == 0:
            return cand
    return m


def _vmem_limit(block_bytes, weight_bytes, scratch_bytes):
    """Explicit scoped-VMEM limit: double-buffered pipelined operands + scratch + margin.
    Matters on v5e (16 MiB scoped default); clamped so it stays sane on v7x (64 MiB)."""
    need = 2 * (block_bytes + weight_bytes) + scratch_bytes + (8 << 20)
    return int(min(max(need, 32 << 20), 64 << 20))


def _fold_bn(conv_bias, gamma, beta, mean, var, eps=1e-5):
    s = gamma / jnp.sqrt(var + eps)
    b = (conv_bias - mean) * s + beta
    return s, b


# --------------------------------------------------------- kernel A: LIF + QKV conv + LIF
def _qkv_fused_kernel(x_ref, w_ref, sc_ref, bi_ref, qkv_o, m_in_ref, m_qkv_ref,
                      *, inv_tau, vth):
    t = pl.program_id(1)

    @pl.when(t == 0)
    def _():
        m_in_ref[...] = jnp.zeros_like(m_in_ref)
        m_qkv_ref[...] = jnp.zeros_like(m_qkv_ref)

    x = x_ref[0]                                                      # (tm, C) f32
    # shortcut_lif (v_th = 1.0)
    v = m_in_ref[...] + (x - m_in_ref[...]) * inv_tau
    spk = (v >= vth).astype(jnp.float32)
    m_in_ref[...] = v * (1.0 - spk)
    # fused q/k/v 1x1 conv (concatenated (C, 3C) weight) + folded BN
    y = jnp.dot(spk.astype(jnp.bfloat16), w_ref[...],
                preferred_element_type=jnp.float32)                   # (tm, 3C)
    y = y * sc_ref[...] + bi_ref[...]
    # q/k/v LIFs: one concatenated membrane == three independent membranes
    v2 = m_qkv_ref[...] + (y - m_qkv_ref[...]) * inv_tau
    spk2 = (v2 >= vth).astype(jnp.float32)
    m_qkv_ref[...] = v2 * (1.0 - spk2)
    # single lane-dense 3C-wide spike store (1 byte/elem when int8)
    qkv_o[0] = spk2.astype(qkv_o.dtype)


def qkv_stage(x_cl, w_qkv, scale, bias, *, tm, spike_dtype):
    T, M, C = x_cl.shape
    C3 = w_qkv.shape[1]
    sc = scale.reshape(1, C3).astype(jnp.float32)
    bi = bias.reshape(1, C3).astype(jnp.float32)
    in_spec = pl.BlockSpec((1, tm, C), lambda i, t: (t, i, 0))
    out_spec = pl.BlockSpec((1, tm, C3), lambda i, t: (t, i, 0))
    block_bytes = tm * C * 4 + tm * C3 * jnp.dtype(spike_dtype).itemsize
    weight_bytes = C * C3 * 2 + 2 * C3 * 4
    scratch_bytes = tm * C * 4 + tm * C3 * 4
    return pl.pallas_call(
        functools.partial(_qkv_fused_kernel, inv_tau=INV_TAU, vth=1.0),
        out_shape=jax.ShapeDtypeStruct((T, M, C3), spike_dtype),
        grid=(M // tm, T),
        in_specs=[in_spec,
                  pl.BlockSpec((C, C3), lambda i, t: (0, 0)),
                  pl.BlockSpec((1, C3), lambda i, t: (0, 0)),
                  pl.BlockSpec((1, C3), lambda i, t: (0, 0))],
        out_specs=out_spec,
        scratch_shapes=[pltpu.VMEM((tm, C), jnp.float32),     # shortcut_lif membrane
                        pltpu.VMEM((tm, C3), jnp.float32)],   # q/k/v LIF membranes
        compiler_params=pltpu.CompilerParams(
            dimension_semantics=("parallel", "arbitrary"),
            vmem_limit_bytes=_vmem_limit(block_bytes, weight_bytes, scratch_bytes)),
    )(x_cl, w_qkv.astype(jnp.bfloat16), sc, bi)


# ----------------------------------- kernel B: STAtten + attn_lif + proj conv/BN + residual
def _statten_proj_kernel(qkv_ref, ident_ref, mask_ref, pw_ref, psc_ref, pbi_ref,
                         o_ref, m_ref, *, inv_tau, vth, cs, C, N):
    nc = pl.program_id(1)

    @pl.when(nc == 0)
    def _():
        m_ref[...] = jnp.zeros_like(m_ref)

    # One lane-dense (cs, N, 3C) load of the concatenated spike slab; slice q/k/v
    # in-register (lane-aligned, hence free, when C % 128 == 0).
    qkv = qkv_ref[...].astype(jnp.bfloat16).reshape(cs * N, 3 * C)
    q = qkv[:, :C]
    k = qkv[:, C:2 * C]
    v = qkv[:, 2 * C:]

    # kv = k^T v over the whole chunk as ONE MXU contraction (K = cs*N) -- contracting
    # dim 0 of both operands, so no XLU transpose is materialized.
    dn = (((0,), (0,)), ((), ()))
    kv = jax.lax.dot_general(k, v, dimension_numbers=dn,
                             preferred_element_type=jnp.float32)      # (C, C)
    # head-block-diagonal mask with the 1/H STAtten scale folded in.  kv entries are
    # integer spike counts <= cs*N, exactly representable in bf16 for cs*N <= 256.
    # TODO(synk): keep attn in f32 for configurations with cs*N > 256.
    attn = (kv * mask_ref[...]).astype(jnp.bfloat16)

    # q @ attn for the whole chunk as ONE matmul (M = cs*N); only the sequential
    # attn_lif + proj path stays per time step below.
    out_all = jnp.dot(q, attn, preferred_element_type=jnp.float32)    # (cs*N, C)

    # hoisted invariants (JAX does not CSE broadcasts inside the unrolled loop)
    pw = pw_ref[...]
    psc = psc_ref[...]
    pbi = pbi_ref[...]

    # TODO(synk): switch to lax.fori_loop(unroll=2) if chunk_size grows beyond ~4.
    for ti in range(cs):                                              # in-order over time
        out = out_all[ti * N:(ti + 1) * N, :]
        # attn_lif (v_threshold = 0.5), membrane carried across chunks (grid axis 1)
        m = m_ref[...]
        vm = m + (out - m) * inv_tau
        spk = (vm >= vth).astype(jnp.float32)
        m_ref[...] = vm * (1.0 - spk)
        # proj 1x1 conv + folded BN + residual (original block input)
        y = jnp.dot(spk.astype(jnp.bfloat16), pw, preferred_element_type=jnp.float32)
        y = y * psc + pbi + ident_ref[ti]
        o_ref[ti] = y.astype(o_ref.dtype)


def attention_stage(qkv_s, x_ident, scaled_mask, proj_w, proj_scale, proj_bias,
                    *, chunk_size, B, N, C):
    T, M, C3 = qkv_s.shape
    num_chunks = T // chunk_size
    blk_qkv = pl.BlockSpec((chunk_size, N, C3), lambda b, nc: (nc, b, 0))
    blk_c = pl.BlockSpec((chunk_size, N, C), lambda b, nc: (nc, b, 0))
    sc = proj_scale.reshape(1, C).astype(jnp.float32)
    bi = proj_bias.reshape(1, C).astype(jnp.float32)
    block_bytes = (chunk_size * N * C3 * qkv_s.dtype.itemsize
                   + 2 * chunk_size * N * C * 4)
    weight_bytes = C * C * 4 + C * C * 2 + 2 * C * 4
    scratch_bytes = N * C * 4
    return pl.pallas_call(
        functools.partial(_statten_proj_kernel, inv_tau=INV_TAU, vth=0.5,
                          cs=chunk_size, C=C, N=N),
        out_shape=jax.ShapeDtypeStruct((T, M, C), jnp.float32),
        grid=(B, num_chunks),
        in_specs=[blk_qkv, blk_c,
                  pl.BlockSpec((C, C), lambda b, nc: (0, 0)),
                  pl.BlockSpec((C, C), lambda b, nc: (0, 0)),
                  pl.BlockSpec((1, C), lambda b, nc: (0, 0)),
                  pl.BlockSpec((1, C), lambda b, nc: (0, 0))],
        out_specs=blk_c,
        scratch_shapes=[pltpu.VMEM((N, C), jnp.float32)],   # attn_lif membrane
        compiler_params=pltpu.CompilerParams(
            dimension_semantics=("parallel", "arbitrary"),
            vmem_limit_bytes=_vmem_limit(block_bytes, weight_bytes, scratch_bytes)),
    )(qkv_s, x_ident, scaled_mask, proj_w.astype(jnp.bfloat16), sc, bi)


# ----------------------------------------------------- kernel C: whole MS_MLP_Conv fused
def _mlp_fused_kernel(x_ref, w1_ref, sc1_ref, bi1_ref, w2_ref, sc2_ref, bi2_ref,
                      o_ref, m1_ref, m2_ref, *, inv_tau, vth, res):
    t = pl.program_id(1)

    @pl.when(t == 0)
    def _():
        m1_ref[...] = jnp.zeros_like(m1_ref)
        m2_ref[...] = jnp.zeros_like(m2_ref)

    x = x_ref[0]                                                      # (tm, C) f32
    # fc1_lif
    v1 = m1_ref[...] + (x - m1_ref[...]) * inv_tau
    spk1 = (v1 >= vth).astype(jnp.float32)
    m1_ref[...] = v1 * (1.0 - spk1)
    # fc1 conv + BN
    h = jnp.dot(spk1.astype(jnp.bfloat16), w1_ref[...],
                preferred_element_type=jnp.float32)                   # (tm, Ch)
    h = h * sc1_ref[...] + bi1_ref[...]
    if res:                     # in_features == hidden_features path of the reference
        h = h + x
        identity = h
    else:
        identity = x
    # fc2_lif
    v2 = m2_ref[...] + (h - m2_ref[...]) * inv_tau
    spk2 = (v2 >= vth).astype(jnp.float32)
    m2_ref[...] = v2 * (1.0 - spk2)
    # fc2 conv + BN + residual
    y = jnp.dot(spk2.astype(jnp.bfloat16), w2_ref[...],
                preferred_element_type=jnp.float32)
    y = y * sc2_ref[...] + bi2_ref[...] + identity
    o_ref[0] = y.astype(o_ref.dtype)


def mlp_stage(x_cl, w1, sc1, bi1, w2, sc2, bi2, *, tm):
    T, M, C = x_cl.shape
    Ch = w1.shape[1]
    res = (C == Ch)
    spec_io = pl.BlockSpec((1, tm, C), lambda i, t: (t, i, 0))
    block_bytes = 2 * tm * C * 4
    weight_bytes = C * Ch * 2 + Ch * C * 2 + (2 * Ch + 2 * C) * 4
    scratch_bytes = tm * C * 4 + tm * Ch * 4
    return pl.pallas_call(
        functools.partial(_mlp_fused_kernel, inv_tau=INV_TAU, vth=1.0, res=res),
        out_shape=jax.ShapeDtypeStruct((T, M, C), jnp.float32),
        grid=(M // tm, T),
        in_specs=[spec_io,
                  pl.BlockSpec((C, Ch), lambda i, t: (0, 0)),
                  pl.BlockSpec((1, Ch), lambda i, t: (0, 0)),
                  pl.BlockSpec((1, Ch), lambda i, t: (0, 0)),
                  pl.BlockSpec((Ch, C), lambda i, t: (0, 0)),
                  pl.BlockSpec((1, C), lambda i, t: (0, 0)),
                  pl.BlockSpec((1, C), lambda i, t: (0, 0))],
        out_specs=spec_io,
        scratch_shapes=[pltpu.VMEM((tm, C), jnp.float32),    # fc1_lif membrane
                        pltpu.VMEM((tm, Ch), jnp.float32)],  # fc2_lif membrane
        compiler_params=pltpu.CompilerParams(
            dimension_semantics=("parallel", "arbitrary"),
            vmem_limit_bytes=_vmem_limit(block_bytes, weight_bytes, scratch_bytes)),
    )(x_cl, w1.astype(jnp.bfloat16),
      sc1.reshape(1, Ch).astype(jnp.float32), bi1.reshape(1, Ch).astype(jnp.float32),
      w2.astype(jnp.bfloat16),
      sc2.reshape(1, C).astype(jnp.float32), bi2.reshape(1, C).astype(jnp.float32))


# ---------------------------------------------------------------------- parameters
def init_params(key, dim, num_heads, mlp_ratio=4.0):
    hidden = int(dim * mlp_ratio)
    state = [key]

    def nxt():
        state[0], sub = jax.random.split(state[0])
        return sub

    def wmat(cin, cout, s=0.08):
        return jax.random.normal(nxt(), (cin, cout), jnp.float32) * s

    def bn(c):
        gamma = 1.0 + 0.1 * jax.random.normal(nxt(), (c,), jnp.float32)
        beta = 0.1 * jax.random.normal(nxt(), (c,), jnp.float32)
        mean = 0.1 * jax.random.normal(nxt(), (c,), jnp.float32)
        var = 0.5 + jax.random.uniform(nxt(), (c,), jnp.float32)
        return gamma, beta, mean, var

    p = {}
    # q/k/v convs (bias=False) folded with their BNs, concatenated to (dim, 3*dim)
    ws, ss, bs = [], [], []
    for _ in range(3):
        ws.append(wmat(dim, dim))
        s, b = _fold_bn(jnp.zeros((dim,), jnp.float32), *bn(dim))
        ss.append(s)
        bs.append(b)
    p["qkv_w"] = jnp.concatenate(ws, axis=1)
    p["qkv_scale"] = jnp.concatenate(ss)
    p["qkv_bias"] = jnp.concatenate(bs)
    # proj conv (bias=True) + BN
    p["proj_w"] = wmat(dim, dim)
    s, b = _fold_bn(0.05 * jax.random.normal(nxt(), (dim,), jnp.float32), *bn(dim))
    p["proj_scale"], p["proj_bias"] = s, b
    # mlp fc1 / fc2 (bias=True) + BN
    p["fc1_w"] = wmat(dim, hidden)
    s, b = _fold_bn(0.05 * jax.random.normal(nxt(), (hidden,), jnp.float32), *bn(hidden))
    p["fc1_scale"], p["fc1_bias"] = s, b
    p["fc2_w"] = wmat(hidden, dim)
    s, b = _fold_bn(0.05 * jax.random.normal(nxt(), (dim,), jnp.float32), *bn(dim))
    p["fc2_scale"], p["fc2_bias"] = s, b
    return p


# --------------------------------------------------------------------- full forward
def ms_block_conv_forward(x_nchw, params, *, num_heads, chunk_size, tm_cap=256):
    T, B, C, H, W = x_nchw.shape
    N = H * W
    M = B * N
    hd = C // num_heads
    assert C % num_heads == 0 and T % chunk_size == 0
    tm = _pick_tm(M, tm_cap)
    # 1-byte spikes where sub-32-bit tiling allows it; spikes are {0,1} so int8 is exact.
    spike_dtype = jnp.int8 if (tm % 32 == 0 and N % 32 == 0) else jnp.bfloat16

    # NCHW -> channels-last (T, M, C); channel c = head*hd + d (same ordering as torch)
    x = jnp.transpose(x_nchw, (0, 1, 3, 4, 2)).reshape(T, M, C).astype(jnp.float32)

    # -------------------- MS_SSA_Conv (STAtten, dvs=False) --------------------
    qkv_s = qkv_stage(x, params["qkv_w"], params["qkv_scale"], params["qkv_bias"],
                      tm=tm, spike_dtype=spike_dtype)

    # head-block-diagonal mask with the STAtten scale (1/H, dvs=False branch) folded in.
    head_id = jnp.arange(C) // hd
    scaled_mask = (head_id[:, None] == head_id[None, :]).astype(jnp.float32) * (1.0 / H)

    x_attn = attention_stage(qkv_s, x, scaled_mask,
                             params["proj_w"], params["proj_scale"], params["proj_bias"],
                             chunk_size=chunk_size, B=B, N=N, C=C)

    # ------------------------------- MS_MLP_Conv -------------------------------
    y = mlp_stage(x_attn, params["fc1_w"], params["fc1_scale"], params["fc1_bias"],
                  params["fc2_w"], params["fc2_scale"], params["fc2_bias"], tm=tm)

    # channels-last -> NCHW
    y_nchw = y.reshape(T, B, H, W, C).transpose(0, 1, 4, 2, 3)
    # torch returns the per-head v spikes: (T, B, heads, N, hd)
    v_ret = (qkv_s[:, :, 2 * C:].astype(jnp.float32)
             .reshape(T, B, N, num_heads, hd).transpose(0, 1, 3, 2, 4))
    return y_nchw, v_ret


# ------------------------------------------------------------------------------ main
if __name__ == "__main__":
    T, B, dim, H, W = 4, 2, 128, 8, 8
    num_heads, chunk_size, mlp_ratio = 8, 2, 4.0

    key = jax.random.PRNGKey(0)
    k_x, k_p = jax.random.split(key)
    x = jax.random.normal(k_x, (T, B, dim, H, W), jnp.float32) + 0.5
    params = init_params(k_p, dim, num_heads, mlp_ratio)

    fwd = jax.jit(functools.partial(ms_block_conv_forward,
                                    num_heads=num_heads, chunk_size=chunk_size))
    y, attn_v = fwd(x, params)
    y = jax.block_until_ready(y)
    attn_v = jax.block_until_ready(attn_v)

    assert y.shape == (T, B, dim, H, W)
    assert attn_v.shape == (T, B, num_heads, H * W, dim // num_heads)
    assert bool(jnp.all(jnp.isfinite(y)))
    print("KERNEL_OK")
</pallas_src>

<mosaic_0001>
module attributes {stable_mosaic.version = 11 : i64} {
  func.func @_qkv_fused_kernel(%arg0: i32, %arg1: i32, %arg2: memref<1x64x128xf32, #tpu.memory_space<vmem>>, %arg3: memref<128x384xbf16, #tpu.memory_space<vmem>>, %arg4: memref<1x384xf32, #tpu.memory_space<vmem>>, %arg5: memref<1x384xf32, #tpu.memory_space<vmem>>, %arg6: memref<1x64x384xi8, #tpu.memory_space<vmem>>, %arg7: memref<64x128xf32, #tpu.memory_space<vmem>>, %arg8: memref<64x384xf32, #tpu.memory_space<vmem>>) attributes {dimension_semantics = [#tpu.dimension_semantics<parallel>, #tpu.dimension_semantics<arbitrary>], iteration_bounds = array<i64: 2, 4>, scalar_prefetch = 0 : i64, scratch_operands = 2 : i64, tpu.core_type = #tpu.core_type<tc>, window_params = [{transform_indices = @transform_0, window_bounds = array<i64: 1, 64, 128>}, {pipeline_mode = #tpu.pipeline_mode<synchronous>, transform_indices = @transform_1, window_bounds = array<i64: 128, 384>}, {pipeline_mode = #tpu.pipeline_mode<synchronous>, transform_indices = @transform_2, window_bounds = array<i64: 1, 384>}, {pipeline_mode = #tpu.pipeline_mode<synchronous>, transform_indices = @transform_3, window_bounds = array<i64: 1, 384>}, {transform_indices = @transform_4, window_bounds = array<i64: 1, 64, 384>}]} {
    %c0_i32 = arith.constant 0 : i32
    %0 = arith.cmpi eq, %arg1, %c0_i32 : i32
    %1 = arith.extui %0 : i1 to i32
    %c0_i32_0 = arith.constant 0 : i32
    %2 = arith.cmpi ne, %1, %c0_i32_0 : i32
    scf.if %2 {
      %cst_30 = arith.constant 0.000000e+00 : f32
      %46 = vector.broadcast %cst_30 : f32 to vector<64x128xf32>
      %c0_31 = arith.constant 0 : index
      %c0_32 = arith.constant 0 : index
      %47 = vector.load %arg7[%c0_31, %c0_32] : memref<64x128xf32, #tpu.memory_space<vmem>>, vector<64x128xf32>
      tpu.vector_store %arg7[%c0_31, %c0_32], %46 {strides = array<i32>} : memref<64x128xf32, #tpu.memory_space<vmem>>, vector<64x128xf32>,
      %cst_33 = arith.constant 0.000000e+00 : f32
      %48 = vector.broadcast %cst_33 : f32 to vector<64x384xf32>
      %c0_34 = arith.constant 0 : index
      %c0_35 = arith.constant 0 : index
      %49 = vector.load %arg8[%c0_34, %c0_35] : memref<64x384xf32, #tpu.memory_space<vmem>>, vector<64x384xf32>
      tpu.vector_store %arg8[%c0_34, %c0_35], %48 {strides = array<i32>} : memref<64x384xf32, #tpu.memory_space<vmem>>, vector<64x384xf32>,
    } else {
    }
    %c0 = arith.constant 0 : index
    %c0_1 = arith.constant 0 : index
    %c0_2 = arith.constant 0 : index
    %3 = vector.load %arg2[%c0, %c0_1, %c0_2] : memref<1x64x128xf32, #tpu.memory_space<vmem>>, vector<1x64x128xf32>
    %4 = vector.shape_cast %3 : vector<1x64x128xf32> to vector<64x128xf32>
    %c0_3 = arith.constant 0 : index
    %c0_4 = arith.constant 0 : index
    %5 = vector.load %arg7[%c0_3, %c0_4] : memref<64x128xf32, #tpu.memory_space<vmem>>, vector<64x128xf32>
    %c0_5 = arith.constant 0 : index
    %c0_6 = arith.constant 0 : index
    %6 = vector.load %arg7[%c0_5, %c0_6] : memref<64x128xf32, #tpu.memory_space<vmem>>, vector<64x128xf32>
    %7 = arith.subf %4, %6 : vector<64x128xf32>
    %cst = arith.constant 5.000000e-01 : f32
    %8 = vector.broadcast %cst : f32 to vector<64x128xf32>
    %9 = arith.mulf %7, %8 : vector<64x128xf32>
    %10 = arith.addf %5, %9 : vector<64x128xf32>
    %cst_7 = arith.constant 1.000000e+00 : f32
    %11 = vector.broadcast %cst_7 : f32 to vector<64x128xf32>
    %12 = arith.cmpf oge, %10, %11 : vector<64x128xf32>
    %13 = arith.extui %12 : vector<64x128xi1> to vector<64x128xi32>
    %14 = arith.sitofp %13 : vector<64x128xi32> to vector<64x128xf32>
    %cst_8 = arith.constant 1.000000e+00 : f32
    %15 = vector.broadcast %cst_8 : f32 to vector<64x128xf32>
    %16 = arith.subf %15, %14 : vector<64x128xf32>
    %17 = arith.mulf %10, %16 : vector<64x128xf32>
    %c0_9 = arith.constant 0 : index
    %c0_10 = arith.constant 0 : index
    %18 = vector.load %arg7[%c0_9, %c0_10] : memref<64x128xf32, #tpu.memory_space<vmem>>, vector<64x128xf32>
    tpu.vector_store %arg7[%c0_9, %c0_10], %17 {strides = array<i32>} : memref<64x128xf32, #tpu.memory_space<vmem>>, vector<64x128xf32>,
    %19 = arith.truncf %14 : vector<64x128xf32> to vector<64x128xbf16>
    %c0_11 = arith.constant 0 : index
    %c0_12 = arith.constant 0 : index
    %20 = vector.load %arg3[%c0_11, %c0_12] : memref<128x384xbf16, #tpu.memory_space<vmem>>, vector<128x384xbf16>
    %cst_13 = arith.constant dense<0.000000e+00> : vector<64x384xf32>
    %21 = tpu.matmul %19, %20, %cst_13 {dimension_numbers = #tpu.dot_dimension_numbers<[1], [0], [0], [1], [0, 0, 1, 1], [], []>} : vector<64x128xbf16>, vector<128x384xbf16>, vector<64x384xf32> -> vector<64x384xf32>
    %c0_14 = arith.constant 0 : index
    %c0_15 = arith.constant 0 : index
    %22 = vector.load %arg4[%c0_14, %c0_15] : memref<1x384xf32, #tpu.memory_space<vmem>>, vector<1x384xf32>
    %23 = vector.broadcast %22 : vector<1x384xf32> to vector<64x384xf32>
    %24 = arith.mulf %21, %23 : vector<64x384xf32>
    %c0_16 = arith.constant 0 : index
    %c0_17 = arith.constant 0 : index
    %25 = vector.load %arg5[%c0_16, %c0_17] : memref<1x384xf32, #tpu.memory_space<vmem>>, vector<1x384xf32>
    %26 = vector.broadcast %25 : vector<1x384xf32> to vector<64x384xf32>
    %27 = arith.addf %24, %26 : vector<64x384xf32>
    %c0_18 = arith.constant 0 : index
    %c0_19 = arith.constant 0 : index
    %28 = vector.load %arg8[%c0_18, %c0_19] : memref<64x384xf32, #tpu.memory_space<vmem>>, vector<64x384xf32>
    %c0_20 = arith.constant 0 : index
    %c0_21 = arith.constant 0 : index
    %29 = vector.load %arg8[%c0_20, %c0_21] : memref<64x384xf32, #tpu.memory_space<vmem>>, vector<64x384xf32>
    %30 = arith.subf %27, %29 : vector<64x384xf32>
    %cst_22 = arith.constant 5.000000e-01 : f32
    %31 = vector.broadcast %cst_22 : f32 to vector<64x384xf32>
    %32 = arith.mulf %30, %31 : vector<64x384xf32>
    %33 = arith.addf %28, %32 : vector<64x384xf32>
    %cst_23 = arith.constant 1.000000e+00 : f32
    %34 = vector.broadcast %cst_23 : f32 to vector<64x384xf32>
    %35 = arith.cmpf oge, %33, %34 : vector<64x384xf32>
    %36 = arith.extui %35 : vector<64x384xi1> to vector<64x384xi32>
    %37 = arith.sitofp %36 : vector<64x384xi32> to vector<64x384xf32>
    %cst_24 = arith.constant 1.000000e+00 : f32
    %38 = vector.broadcast %cst_24 : f32 to vector<64x384xf32>
    %39 = arith.subf %38, %37 : vector<64x384xf32>
    %40 = arith.mulf %33, %39 : vector<64x384xf32>
    %c0_25 = arith.constant 0 : index
    %c0_26 = arith.constant 0 : index
    %41 = vector.load %arg8[%c0_25, %c0_26] : memref<64x384xf32, #tpu.memory_space<vmem>>, vector<64x384xf32>
    tpu.vector_store %arg8[%c0_25, %c0_26], %40 {strides = array<i32>} : memref<64x384xf32, #tpu.memory_space<vmem>>, vector<64x384xf32>,
    %42 = arith.fptosi %37 : vector<64x384xf32> to vector<64x384xi8>
    %c0_27 = arith.constant 0 : index
    %c0_28 = arith.constant 0 : index
    %c0_29 = arith.constant 0 : index
    %43 = vector.load %arg6[%c0_27, %c0_28, %c0_29] : memref<1x64x384xi8, #tpu.memory_space<vmem>>, vector<1x64x384xi8>
    %44 = vector.shape_cast %43 : vector<1x64x384xi8> to vector<64x384xi8>
    %45 = vector.shape_cast %42 : vector<64x384xi8> to vector<1x64x384xi8>
    tpu.vector_store %arg6[%c0_27, %c0_28, %c0_29], %45 {strides = array<i32>} : memref<1x64x384xi8, #tpu.memory_space<vmem>>, vector<1x64x384xi8>,
    return
  }
  func.func @transform_0(%arg0: i32, %arg1: i32) -> (i32, i32, i32) {
    %c0_i32 = arith.constant 0 : i32
    %c0_i32_0 = arith.constant 0 : i32
    return %arg1, %arg0, %c0_i32 : i32, i32, i32
  }
  func.func @transform_1(%arg0: i32, %arg1: i32) -> (i32, i32) {
    %c0_i32 = arith.constant 0 : i32
    %c0_i32_0 = arith.constant 0 : i32
    %c0_i32_1 = arith.constant 0 : i32
    return %c0_i32, %c0_i32_0 : i32, i32
  }
  func.func @transform_2(%arg0: i32, %arg1: i32) -> (i32, i32) {
    %c0_i32 = arith.constant 0 : i32
    %c0_i32_0 = arith.constant 0 : i32
    %c0_i32_1 = arith.constant 0 : i32
    return %c0_i32, %c0_i32_0 : i32, i32
  }
  func.func @transform_3(%arg0: i32, %arg1: i32) -> (i32, i32) {
    %c0_i32 = arith.constant 0 : i32
    %c0_i32_0 = arith.constant 0 : i32
    %c0_i32_1 = arith.constant 0 : i32
    return %c0_i32, %c0_i32_0 : i32, i32
  }
  func.func @transform_4(%arg0: i32, %arg1: i32) -> (i32, i32, i32) {
    %c0_i32 = arith.constant 0 : i32
    %c0_i32_0 = arith.constant 0 : i32
    return %arg1, %arg0, %c0_i32 : i32, i32, i32
  }
}

module attributes {stable_mosaic.version = 11 : i64} {
  func.func @_statten_proj_kernel(%arg0: i32, %arg1: i32, %arg2: memref<2x64x384xi8, #tpu.memory_space<vmem>>, %arg3: memref<2x64x128xf32, #tpu.memory_space<vmem>>, %arg4: memref<128x128xf32, #tpu.memory_space<vmem>>, %arg5: memref<128x128xbf16, #tpu.memory_space<vmem>>, %arg6: memref<1x128xf32, #tpu.memory_space<vmem>>, %arg7: memref<1x128xf32, #tpu.memory_space<vmem>>, %arg8: memref<2x64x128xf32, #tpu.memory_space<vmem>>, %arg9: memref<64x128xf32, #tpu.memory_space<vmem>>) attributes {dimension_semantics = [#tpu.dimension_semantics<parallel>, #tpu.dimension_semantics<arbitrary>], iteration_bounds = array<i64: 2, 2>, scalar_prefetch = 0 : i64, scratch_operands = 1 : i64, tpu.core_type = #tpu.core_type<tc>, window_params = [{transform_indices = @transform_0, window_bounds = array<i64: 2, 64, 384>}, {transform_indices = @transform_1, window_bounds = array<i64: 2, 64, 128>}, {pipeline_mode = #tpu.pipeline_mode<synchronous>, transform_indices = @transform_2, window_bounds = array<i64: 128, 128>}, {pipeline_mode = #tpu.pipeline_mode<synchronous>, transform_indices = @transform_3, window_bounds = array<i64: 128, 128>}, {pipeline_mode = #tpu.pipeline_mode<synchronous>, transform_indices = @transform_4, window_bounds = array<i64: 1, 128>}, {pipeline_mode = #tpu.pipeline_mode<synchronous>, transform_indices = @transform_5, window_bounds = array<i64: 1, 128>}, {transform_indices = @transform_6, window_bounds = array<i64: 2, 64, 128>}]} {
    %c0_i32 = arith.constant 0 : i32
    %0 = arith.cmpi eq, %arg1, %c0_i32 : i32
    %1 = arith.extui %0 : i1 to i32
    %c0_i32_0 = arith.constant 0 : i32
    %2 = arith.cmpi ne, %1, %c0_i32_0 : i32
    scf.if %2 {
      %cst_39 = arith.constant 0.000000e+00 : f32
      %69 = vector.broadcast %cst_39 : f32 to vector<64x128xf32>
      %c0_40 = arith.constant 0 : index
      %c0_41 = arith.constant 0 : index
      %70 = vector.load %arg9[%c0_40, %c0_41] : memref<64x128xf32, #tpu.memory_space<vmem>>, vector<64x128xf32>
      tpu.vector_store %arg9[%c0_40, %c0_41], %69 {strides = array<i32>} : memref<64x128xf32, #tpu.memory_space<vmem>>, vector<64x128xf32>,
    } else {
    }
    %c0 = arith.constant 0 : index
    %c0_1 = arith.constant 0 : index
    %c0_2 = arith.constant 0 : index
    %3 = vector.load %arg2[%c0, %c0_1, %c0_2] : memref<2x64x384xi8, #tpu.memory_space<vmem>>, vector<2x64x384xi8>
    %4 = arith.sitofp %3 : vector<2x64x384xi8> to vector<2x64x384xbf16>
    %5 = vector.shape_cast %4 : vector<2x64x384xbf16> to vector<128x384xbf16>
    %6 = vector.extract_strided_slice %5 {offsets = [0, 0], sizes = [128, 128], strides = [1, 1]} : vector<128x384xbf16> to vector<128x128xbf16>
    %7 = vector.extract_strided_slice %5 {offsets = [0, 128], sizes = [128, 128], strides = [1, 1]} : vector<128x384xbf16> to vector<128x128xbf16>
    %8 = vector.extract_strided_slice %5 {offsets = [0, 256], sizes = [128, 128], strides = [1, 1]} : vector<128x384xbf16> to vector<128x128xbf16>
    %cst = arith.constant dense<0.000000e+00> : vector<128x128xf32>
    %9 = tpu.matmul %7, %8, %cst {dimension_numbers = #tpu.dot_dimension_numbers<[0], [0], [1], [1], [0, 1, 1, 1], [], []>} : vector<128x128xbf16>, vector<128x128xbf16>, vector<128x128xf32> -> vector<128x128xf32>
    %c0_3 = arith.constant 0 : index
    %c0_4 = arith.constant 0 : index
    %10 = vector.load %arg4[%c0_3, %c0_4] : memref<128x128xf32, #tpu.memory_space<vmem>>, vector<128x128xf32>
    %11 = arith.mulf %9, %10 : vector<128x128xf32>
    %12 = arith.truncf %11 : vector<128x128xf32> to vector<128x128xbf16>
    %cst_5 = arith.constant dense<0.000000e+00> : vector<128x128xf32>
    %13 = tpu.matmul %6, %12, %cst_5 {dimension_numbers = #tpu.dot_dimension_numbers<[1], [0], [0], [1], [0, 0, 1, 1], [], []>} : vector<128x128xbf16>, vector<128x128xbf16>, vector<128x128xf32> -> vector<128x128xf32>
    %c0_6 = arith.constant 0 : index
    %c0_7 = arith.constant 0 : index
    %14 = vector.load %arg5[%c0_6, %c0_7] : memref<128x128xbf16, #tpu.memory_space<vmem>>, vector<128x128xbf16>
    %c0_8 = arith.constant 0 : index
    %c0_9 = arith.constant 0 : index
    %15 = vector.load %arg6[%c0_8, %c0_9] : memref<1x128xf32, #tpu.memory_space<vmem>>, vector<1x128xf32>
    %c0_10 = arith.constant 0 : index
    %c0_11 = arith.constant 0 : index
    %16 = vector.load %arg7[%c0_10, %c0_11] : memref<1x128xf32, #tpu.memory_space<vmem>>, vector<1x128xf32>
    %17 = vector.extract_strided_slice %13 {offsets = [0, 0], sizes = [64, 128], strides = [1, 1]} : vector<128x128xf32> to vector<64x128xf32>
    %c0_12 = arith.constant 0 : index
    %c0_13 = arith.constant 0 : index
    %18 = vector.load %arg9[%c0_12, %c0_13] : memref<64x128xf32, #tpu.memory_space<vmem>>, vector<64x128xf32>
    %19 = arith.subf %17, %18 : vector<64x128xf32>
    %cst_14 = arith.constant 5.000000e-01 : f32
    %20 = vector.broadcast %cst_14 : f32 to vector<64x128xf32>
    %21 = arith.mulf %19, %20 : vector<64x128xf32>
    %22 = arith.addf %18, %21 : vector<64x128xf32>
    %cst_15 = arith.constant 5.000000e-01 : f32
    %23 = vector.broadcast %cst_15 : f32 to vector<64x128xf32>
    %24 = arith.cmpf oge, %22, %23 : vector<64x128xf32>
    %25 = arith.extui %24 : vector<64x128xi1> to vector<64x128xi32>
    %26 = arith.sitofp %25 : vector<64x128xi32> to vector<64x128xf32>
    %cst_16 = arith.constant 1.000000e+00 : f32
    %27 = vector.broadcast %cst_16 : f32 to vector<64x128xf32>
    %28 = arith.subf %27, %26 : vector<64x128xf32>
    %29 = arith.mulf %22, %28 : vector<64x128xf32>
    %c0_17 = arith.constant 0 : index
    %c0_18 = arith.constant 0 : index
    %30 = vector.load %arg9[%c0_17, %c0_18] : memref<64x128xf32, #tpu.memory_space<vmem>>, vector<64x128xf32>
    tpu.vector_store %arg9[%c0_17, %c0_18], %29 {strides = array<i32>} : memref<64x128xf32, #tpu.memory_space<vmem>>, vector<64x128xf32>,
    %31 = arith.truncf %26 : vector<64x128xf32> to vector<64x128xbf16>
    %cst_19 = arith.constant dense<0.000000e+00> : vector<64x128xf32>
    %32 = tpu.matmul %31, %14, %cst_19 {dimension_numbers = #tpu.dot_dimension_numbers<[1], [0], [0], [1], [0, 0, 1, 1], [], []>} : vector<64x128xbf16>, vector<128x128xbf16>, vector<64x128xf32> -> vector<64x128xf32>
    %33 = vector.broadcast %15 : vector<1x128xf32> to vector<64x128xf32>
    %34 = arith.mulf %32, %33 : vector<64x128xf32>
    %35 = vector.broadcast %16 : vector<1x128xf32> to vector<64x128xf32>
    %36 = arith.addf %34, %35 : vector<64x128xf32>
    %c0_20 = arith.constant 0 : index
    %c0_21 = arith.constant 0 : index
    %c0_22 = arith.constant 0 : index
    %37 = vector.load %arg3[%c0_20, %c0_21, %c0_22] : memref<2x64x128xf32, #tpu.memory_space<vmem>>, vector<1x64x128xf32>
    %38 = vector.shape_cast %37 : vector<1x64x128xf32> to vector<64x128xf32>
    %39 = arith.addf %36, %38 : vector<64x128xf32>
    %c0_23 = arith.constant 0 : index
    %c0_24 = arith.constant 0 : index
    %c0_25 = arith.constant 0 : index
    %40 = vector.load %arg8[%c0_23, %c0_24, %c0_25] : memref<2x64x128xf32, #tpu.memory_space<vmem>>, vector<1x64x128xf32>
    %41 = vector.shape_cast %40 : vector<1x64x128xf32> to vector<64x128xf32>
    %42 = vector.shape_cast %39 : vector<64x128xf32> to vector<1x64x128xf32>
    tpu.vector_store %arg8[%c0_23, %c0_24, %c0_25], %42 {strides = array<i32>} : memref<2x64x128xf32, #tpu.memory_space<vmem>>, vector<1x64x128xf32>,
    %43 = vector.extract_strided_slice %13 {offsets = [64, 0], sizes = [64, 128], strides = [1, 1]} : vector<128x128xf32> to vector<64x128xf32>
    %c0_26 = arith.constant 0 : index
    %c0_27 = arith.constant 0 : index
    %44 = vector.load %arg9[%c0_26, %c0_27] : memref<64x128xf32, #tpu.memory_space<vmem>>, vector<64x128xf32>
    %45 = arith.subf %43, %44 : vector<64x128xf32>
    %cst_28 = arith.constant 5.000000e-01 : f32
    %46 = vector.broadcast %cst_28 : f32 to vector<64x128xf32>
    %47 = arith.mulf %45, %46 : vector<64x128xf32>
    %48 = arith.addf %44, %47 : vector<64x128xf32>
    %cst_29 = arith.constant 5.000000e-01 : f32
    %49 = vector.broadcast %cst_29 : f32 to vector<64x128xf32>
    %50 = arith.cmpf oge, %48, %49 : vector<64x128xf32>
    %51 = arith.extui %50 : vector<64x128xi1> to vector<64x128xi32>
    %52 = arith.sitofp %51 : vector<64x128xi32> to vector<64x128xf32>
    %cst_30 = arith.constant 1.000000e+00 : f32
    %53 = vector.broadcast %cst_30 : f32 to vector<64x128xf32>
    %54 = arith.subf %53, %52 : vector<64x128xf32>
    %55 = arith.mulf %48, %54 : vector<64x128xf32>
    %c0_31 = arith.constant 0 : index
    %c0_32 = arith.constant 0 : index
    %56 = vector.load %arg9[%c0_31, %c0_32] : memref<64x128xf32, #tpu.memory_space<vmem>>, vector<64x128xf32>
    tpu.vector_store %arg9[%c0_31, %c0_32], %55 {strides = array<i32>} : memref<64x128xf32, #tpu.memory_space<vmem>>, vector<64x128xf32>,
    %57 = arith.truncf %52 : vector<64x128xf32> to vector<64x128xbf16>
    %cst_33 = arith.constant dense<0.000000e+00> : vector<64x128xf32>
    %58 = tpu.matmul %57, %14, %cst_33 {dimension_numbers = #tpu.dot_dimension_numbers<[1], [0], [0], [1], [0, 0, 1, 1], [], []>} : vector<64x128xbf16>, vector<128x128xbf16>, vector<64x128xf32> -> vector<64x128xf32>
    %59 = vector.broadcast %15 : vector<1x128xf32> to vector<64x128xf32>
    %60 = arith.mulf %58, %59 : vector<64x128xf32>
    %61 = vector.broadcast %16 : vector<1x128xf32> to vector<64x128xf32>
    %62 = arith.addf %60, %61 : vector<64x128xf32>
    %c1 = arith.constant 1 : index
    %c0_34 = arith.constant 0 : index
    %c0_35 = arith.constant 0 : index
    %63 = vector.load %arg3[%c1, %c0_34, %c0_35] : memref<2x64x128xf32, #tpu.memory_space<vmem>>, vector<1x64x128xf32>
    %64 = vector.shape_cast %63 : vector<1x64x128xf32> to vector<64x128xf32>
    %65 = arith.addf %62, %64 : vector<64x128xf32>
    %c1_36 = arith.constant 1 : index
    %c0_37 = arith.constant 0 : index
    %c0_38 = arith.constant 0 : index
    %66 = vector.load %arg8[%c1_36, %c0_37, %c0_38] : memref<2x64x128xf32, #tpu.memory_space<vmem>>, vector<1x64x128xf32>
    %67 = vector.shape_cast %66 : vector<1x64x128xf32> to vector<64x128xf32>
    %68 = vector.shape_cast %65 : vector<64x128xf32> to vector<1x64x128xf32>
    tpu.vector_store %arg8[%c1_36, %c0_37, %c0_38], %68 {strides = array<i32>} : memref<2x64x128xf32, #tpu.memory_space<vmem>>, vector<1x64x128xf32>,
    return
  }
  func.func @transform_0(%arg0: i32, %arg1: i32) -> (i32, i32, i32) {
    %c0_i32 = arith.constant 0 : i32
    %c0_i32_0 = arith.constant 0 : i32
    return %arg1, %arg0, %c0_i32 : i32, i32, i32
  }
  func.func @transform_1(%arg0: i32, %arg1: i32) -> (i32, i32, i32) {
    %c0_i32 = arith.constant 0 : i32
    %c0_i32_0 = arith.constant 0 : i32
    return %arg1, %arg0, %c0_i32 : i32, i32, i32
  }
  func.func @transform_2(%arg0: i32, %arg1: i32) -> (i32, i32) {
    %c0_i32 = arith.constant 0 : i32
    %c0_i32_0 = arith.constant 0 : i32
    %c0_i32_1 = arith.constant 0 : i32
    return %c0_i32, %c0_i32_0 : i32, i32
  }
  func.func @transform_3(%arg0: i32, %arg1: i32) -> (i32, i32) {
    %c0_i32 = arith.constant 0 : i32
    %c0_i32_0 = arith.constant 0 : i32
    %c0_i32_1 = arith.constant 0 : i32
    return %c0_i32, %c0_i32_0 : i32, i32
  }
  func.func @transform_4(%arg0: i32, %arg1: i32) -> (i32, i32) {
    %c0_i32 = arith.constant 0 : i32
    %c0_i32_0 = arith.constant 0 : i32
    %c0_i32_1 = arith.constant 0 : i32
    return %c0_i32, %c0_i32_0 : i32, i32
  }
  func.func @transform_5(%arg0: i32, %arg1: i32) -> (i32, i32) {
    %c0_i32 = arith.constant 0 : i32
    %c0_i32_0 = arith.constant 0 : i32
    %c0_i32_1 = arith.constant 0 : i32
    return %c0_i32, %c0_i32_0 : i32, i32
  }
  func.func @transform_6(%arg0: i32, %arg1: i32) -> (i32, i32, i32) {
    %c0_i32 = arith.constant 0 : i32
    %c0_i32_0 = arith.constant 0 : i32
    return %arg1, %arg0, %c0_i32 : i32, i32, i32
  }
}

module attributes {stable_mosaic.version = 11 : i64} {
  func.func @_mlp_fused_kernel(%arg0: i32, %arg1: i32, %arg2: memref<1x64x128xf32, #tpu.memory_space<vmem>>, %arg3: memref<128x512xbf16, #tpu.memory_space<vmem>>, %arg4: memref<1x512xf32, #tpu.memory_space<vmem>>, %arg5: memref<1x512xf32, #tpu.memory_space<vmem>>, %arg6: memref<512x128xbf16, #tpu.memory_space<vmem>>, %arg7: memref<1x128xf32, #tpu.memory_space<vmem>>, %arg8: memref<1x128xf32, #tpu.memory_space<vmem>>, %arg9: memref<1x64x128xf32, #tpu.memory_space<vmem>>, %arg10: memref<64x128xf32, #tpu.memory_space<vmem>>, %arg11: memref<64x512xf32, #tpu.memory_space<vmem>>) attributes {dimension_semantics = [#tpu.dimension_semantics<parallel>, #tpu.dimension_semantics<arbitrary>], iteration_bounds = array<i64: 2, 4>, scalar_prefetch = 0 : i64, scratch_operands = 2 : i64, tpu.core_type = #tpu.core_type<tc>, window_params = [{transform_indices = @transform_0, window_bounds = array<i64: 1, 64, 128>}, {pipeline_mode = #tpu.pipeline_mode<synchronous>, transform_indices = @transform_1, window_bounds = array<i64: 128, 512>}, {pipeline_mode = #tpu.pipeline_mode<synchronous>, transform_indices = @transform_2, window_bounds = array<i64: 1, 512>}, {pipeline_mode = #tpu.pipeline_mode<synchronous>, transform_indices = @transform_3, window_bounds = array<i64: 1, 512>}, {pipeline_mode = #tpu.pipeline_mode<synchronous>, transform_indices = @transform_4, window_bounds = array<i64: 512, 128>}, {pipeline_mode = #tpu.pipeline_mode<synchronous>, transform_indices = @transform_5, window_bounds = array<i64: 1, 128>}, {pipeline_mode = #tpu.pipeline_mode<synchronous>, transform_indices = @transform_6, window_bounds = array<i64: 1, 128>}, {transform_indices = @transform_7, window_bounds = array<i64: 1, 64, 128>}]} {
    %c0_i32 = arith.constant 0 : i32
    %0 = arith.cmpi eq, %arg1, %c0_i32 : i32
    %1 = arith.extui %0 : i1 to i32
    %c0_i32_0 = arith.constant 0 : i32
    %2 = arith.cmpi ne, %1, %c0_i32_0 : i32
    scf.if %2 {
      %cst_37 = arith.constant 0.000000e+00 : f32
      %55 = vector.broadcast %cst_37 : f32 to vector<64x128xf32>
      %c0_38 = arith.constant 0 : index
      %c0_39 = arith.constant 0 : index
      %56 = vector.load %arg10[%c0_38, %c0_39] : memref<64x128xf32, #tpu.memory_space<vmem>>, vector<64x128xf32>
      tpu.vector_store %arg10[%c0_38, %c0_39], %55 {strides = array<i32>} : memref<64x128xf32, #tpu.memory_space<vmem>>, vector<64x128xf32>,
      %cst_40 = arith.constant 0.000000e+00 : f32
      %57 = vector.broadcast %cst_40 : f32 to vector<64x512xf32>
      %c0_41 = arith.constant 0 : index
      %c0_42 = arith.constant 0 : index
      %58 = vector.load %arg11[%c0_41, %c0_42] : memref<64x512xf32, #tpu.memory_space<vmem>>, vector<64x512xf32>
      tpu.vector_store %arg11[%c0_41, %c0_42], %57 {strides = array<i32>} : memref<64x512xf32, #tpu.memory_space<vmem>>, vector<64x512xf32>,
    } else {
    }
    %c0 = arith.constant 0 : index
    %c0_1 = arith.constant 0 : index
    %c0_2 = arith.constant 0 : index
    %3 = vector.load %arg2[%c0, %c0_1, %c0_2] : memref<1x64x128xf32, #tpu.memory_space<vmem>>, vector<1x64x128xf32>
    %4 = vector.shape_cast %3 : vector<1x64x128xf32> to vector<64x128xf32>
    %c0_3 = arith.constant 0 : index
    %c0_4 = arith.constant 0 : index
    %5 = vector.load %arg10[%c0_3, %c0_4] : memref<64x128xf32, #tpu.memory_space<vmem>>, vector<64x128xf32>
    %c0_5 = arith.constant 0 : index
    %c0_6 = arith.constant 0 : index
    %6 = vector.load %arg10[%c0_5, %c0_6] : memref<64x128xf32, #tpu.memory_space<vmem>>, vector<64x128xf32>
    %7 = arith.subf %4, %6 : vector<64x128xf32>
    %cst = arith.constant 5.000000e-01 : f32
    %8 = vector.broadcast %cst : f32 to vector<64x128xf32>
    %9 = arith.mulf %7, %8 : vector<64x128xf32>
    %10 = arith.addf %5, %9 : vector<64x128xf32>
    %cst_7 = arith.constant 1.000000e+00 : f32
    %11 = vector.broadcast %cst_7 : f32 to vector<64x128xf32>
    %12 = arith.cmpf oge, %10, %11 : vector<64x128xf32>
    %13 = arith.extui %12 : vector<64x128xi1> to vector<64x128xi32>
    %14 = arith.sitofp %13 : vector<64x128xi32> to vector<64x128xf32>
    %cst_8 = arith.constant 1.000000e+00 : f32
    %15 = vector.broadcast %cst_8 : f32 to vector<64x128xf32>
    %16 = arith.subf %15, %14 : vector<64x128xf32>
    %17 = arith.mulf %10, %16 : vector<64x128xf32>
    %c0_9 = arith.constant 0 : index
    %c0_10 = arith.constant 0 : index
    %18 = vector.load %arg10[%c0_9, %c0_10] : memref<64x128xf32, #tpu.memory_space<vmem>>, vector<64x128xf32>
    tpu.vector_store %arg10[%c0_9, %c0_10], %17 {strides = array<i32>} : memref<64x128xf32, #tpu.memory_space<vmem>>, vector<64x128xf32>,
    %19 = arith.truncf %14 : vector<64x128xf32> to vector<64x128xbf16>
    %c0_11 = arith.constant 0 : index
    %c0_12 = arith.constant 0 : index
    %20 = vector.load %arg3[%c0_11, %c0_12] : memref<128x512xbf16, #tpu.memory_space<vmem>>, vector<128x512xbf16>
    %cst_13 = arith.constant dense<0.000000e+00> : vector<64x512xf32>
    %21 = tpu.matmul %19, %20, %cst_13 {dimension_numbers = #tpu.dot_dimension_numbers<[1], [0], [0], [1], [0, 0, 1, 1], [], []>} : vector<64x128xbf16>, vector<128x512xbf16>, vector<64x512xf32> -> vector<64x512xf32>
    %c0_14 = arith.constant 0 : index
    %c0_15 = arith.constant 0 : index
    %22 = vector.load %arg4[%c0_14, %c0_15] : memref<1x512xf32, #tpu.memory_space<vmem>>, vector<1x512xf32>
    %23 = vector.broadcast %22 : vector<1x512xf32> to vector<64x512xf32>
    %24 = arith.mulf %21, %23 : vector<64x512xf32>
    %c0_16 = arith.constant 0 : index
    %c0_17 = arith.constant 0 : index
    %25 = vector.load %arg5[%c0_16, %c0_17] : memref<1x512xf32, #tpu.memory_space<vmem>>, vector<1x512xf32>
    %26 = vector.broadcast %25 : vector<1x512xf32> to vector<64x512xf32>
    %27 = arith.addf %24, %26 : vector<64x512xf32>
    %c0_18 = arith.constant 0 : index
    %c0_19 = arith.constant 0 : index
    %28 = vector.load %arg11[%c0_18, %c0_19] : memref<64x512xf32, #tpu.memory_space<vmem>>, vector<64x512xf32>
    %c0_20 = arith.constant 0 : index
    %c0_21 = arith.constant 0 : index
    %29 = vector.load %arg11[%c0_20, %c0_21] : memref<64x512xf32, #tpu.memory_space<vmem>>, vector<64x512xf32>
    %30 = arith.subf %27, %29 : vector<64x512xf32>
    %cst_22 = arith.constant 5.000000e-01 : f32
    %31 = vector.broadcast %cst_22 : f32 to vector<64x512xf32>
    %32 = arith.mulf %30, %31 : vector<64x512xf32>
    %33 = arith.addf %28, %32 : vector<64x512xf32>
    %cst_23 = arith.constant 1.000000e+00 : f32
    %34 = vector.broadcast %cst_23 : f32 to vector<64x512xf32>
    %35 = arith.cmpf oge, %33, %34 : vector<64x512xf32>
    %36 = arith.extui %35 : vector<64x512xi1> to vector<64x512xi32>
    %37 = arith.sitofp %36 : vector<64x512xi32> to vector<64x512xf32>
    %cst_24 = arith.constant 1.000000e+00 : f32
    %38 = vector.broadcast %cst_24 : f32 to vector<64x512xf32>
    %39 = arith.subf %38, %37 : vector<64x512xf32>
    %40 = arith.mulf %33, %39 : vector<64x512xf32>
    %c0_25 = arith.constant 0 : index
    %c0_26 = arith.constant 0 : index
    %41 = vector.load %arg11[%c0_25, %c0_26] : memref<64x512xf32, #tpu.memory_space<vmem>>, vector<64x512xf32>
    tpu.vector_store %arg11[%c0_25, %c0_26], %40 {strides = array<i32>} : memref<64x512xf32, #tpu.memory_space<vmem>>, vector<64x512xf32>,
    %42 = arith.truncf %37 : vector<64x512xf32> to vector<64x512xbf16>
    %c0_27 = arith.constant 0 : index
    %c0_28 = arith.constant 0 : index
    %43 = vector.load %arg6[%c0_27, %c0_28] : memref<512x128xbf16, #tpu.memory_space<vmem>>, vector<512x128xbf16>
    %cst_29 = arith.constant dense<0.000000e+00> : vector<64x128xf32>
    %44 = tpu.matmul %42, %43, %cst_29 {dimension_numbers = #tpu.dot_dimension_numbers<[1], [0], [0], [1], [0, 0, 1, 1], [], []>} : vector<64x512xbf16>, vector<512x128xbf16>, vector<64x128xf32> -> vector<64x128xf32>
    %c0_30 = arith.constant 0 : index
    %c0_31 = arith.constant 0 : index
    %45 = vector.load %arg7[%c0_30, %c0_31] : memref<1x128xf32, #tpu.memory_space<vmem>>, vector<1x128xf32>
    %46 = vector.broadcast %45 : vector<1x128xf32> to vector<64x128xf32>
    %47 = arith.mulf %44, %46 : vector<64x128xf32>
    %c0_32 = arith.constant 0 : index
    %c0_33 = arith.constant 0 : index
    %48 = vector.load %arg8[%c0_32, %c0_33] : memref<1x128xf32, #tpu.memory_space<vmem>>, vector<1x128xf32>
    %49 = vector.broadcast %48 : vector<1x128xf32> to vector<64x128xf32>
    %50 = arith.addf %47, %49 : vector<64x128xf32>
    %51 = arith.addf %50, %4 : vector<64x128xf32>
    %c0_34 = arith.constant 0 : index
    %c0_35 = arith.constant 0 : index
    %c0_36 = arith.constant 0 : index
    %52 = vector.load %arg9[%c0_34, %c0_35, %c0_36] : memref<1x64x128xf32, #tpu.memory_space<vmem>>, vector<1x64x128xf32>
    %53 = vector.shape_cast %52 : vector<1x64x128xf32> to vector<64x128xf32>
    %54 = vector.shape_cast %51 : vector<64x128xf32> to vector<1x64x128xf32>
    tpu.vector_store %arg9[%c0_34, %c0_35, %c0_36], %54 {strides = array<i32>} : memref<1x64x128xf32, #tpu.memory_space<vmem>>, vector<1x64x128xf32>,
    return
  }
  func.func @transform_0(%arg0: i32, %arg1: i32) -> (i32, i32, i32) {
    %c0_i32 = arith.constant 0 : i32
    %c0_i32_0 = arith.constant 0 : i32
    return %arg1, %arg0, %c0_i32 : i32, i32, i32
  }
  func.func @transform_1(%arg0: i32, %arg1: i32) -> (i32, i32) {
    %c0_i32 = arith.constant 0 : i32
    %c0_i32_0 = arith.constant 0 : i32
    %c0_i32_1 = arith.constant 0 : i32
    return %c0_i32, %c0_i32_0 : i32, i32
  }
  func.func @transform_2(%arg0: i32, %arg1: i32) -> (i32, i32) {
    %c0_i32 = arith.constant 0 : i32
    %c0_i32_0 = arith.constant 0 : i32
    %c0_i32_1 = arith.constant 0 : i32
    return %c0_i32, %c0_i32_0 : i32, i32
  }
  func.func @transform_3(%arg0: i32, %arg1: i32) -> (i32, i32) {
    %c0_i32 = arith.constant 0 : i32
    %c0_i32_0 = arith.constant 0 : i32
    %c0_i32_1 = arith.constant 0 : i32
    return %c0_i32, %c0_i32_0 : i32, i32
  }
  func.func @transform_4(%arg0: i32, %arg1: i32) -> (i32, i32) {
    %c0_i32 = arith.constant 0 : i32
    %c0_i32_0 = arith.constant 0 : i32
    %c0_i32_1 = arith.constant 0 : i32
    return %c0_i32, %c0_i32_0 : i32, i32
  }
  func.func @transform_5(%arg0: i32, %arg1: i32) -> (i32, i32) {
    %c0_i32 = arith.constant 0 : i32
    %c0_i32_0 = arith.constant 0 : i32
    %c0_i32_1 = arith.constant 0 : i32
    return %c0_i32, %c0_i32_0 : i32, i32
  }
  func.func @transform_6(%arg0: i32, %arg1: i32) -> (i32, i32) {
    %c0_i32 = arith.constant 0 : i32
    %c0_i32_0 = arith.constant 0 : i32
    %c0_i32_1 = arith.constant 0 : i32
    return %c0_i32, %c0_i32_0 : i32, i32
  }
  func.func @transform_7(%arg0: i32, %arg1: i32) -> (i32, i32, i32) {
    %c0_i32 = arith.constant 0 : i32
    %c0_i32_0 = arith.constant 0 : i32
    return %arg1, %arg0, %c0_i32 : i32, i32, i32
  }
}

</mosaic_0001>

<bundles_post_ra>
// kernel: ms_block_conv_forward.3
= control target key start
LH: loop header
LB: loop body
LE: loop exit
PB: predicated region body
PF: predicated region fallthrough
CT: control target
= control target key end

     0   :  { %s1442_s15 = smov 0   ;;  %s1444_s16 = smov 0   ;;  %s1788_s0 = inlined_call_operand.vmem [shape: f32[4,128,128], index: 0, kind: input, shape index: {}]   ;;  %s1789_s1 = inlined_call_operand.vmem [shape: bf16[128,384], index: 1, kind: input, shape index: {}]   ;;  %s1790_s2 = inlined_call_operand.vmem [shape: f32[1,384], index: 2, kind: input, shape index: {}]   ;;  %s1791_s3 = inlined_call_operand.vmem [shape: f32[1,384], index: 3, kind: input, shape index: {}]   ;;  %s1792_s4 = inlined_call_operand.vmem [shape: s8[4,128,384], index: 4, kind: output, shape index: {}]  }
   0x1   :  { %s1446_s17 = smov 0   ;;  %s1448_s18 = smov 0  }
   0x2   :  { %s1450_s19 = smov 0  }
   0x3 LB: > { %s23_s20 = sadd.s32 1, %s1403_s17  ;;  %s26_s21 = sadd.s32 1, %s1407_s18  ;;  %s1411_s19 = sphi %s1450_s19, %s14_s19   ;;  %s1407_s18 = sphi %s1448_s18, %s1798_s18   ;;  %s1403_s17 = sphi %s1446_s17, %s1797_s17   ;;  %s1399_s16 = sphi %s1444_s16, %s1796_s16   ;;  %s1395_s15 = sphi %s1442_s15, %s1795_s15  }
   0x4   : > { %p24_p0 = scmp.ge.s32.totalorder %s23_s20, 4  ;;  %p1178_p1 = scmp.ge.s32.totalorder %s1411_s19, 1 }
   0x5   : > { %p183_p2 = scmp.lt.s32.totalorder %s1411_s19, 9 }
   0x6   : > { %s1800_s20 = smov (%p24_p0, %s23_s20), 0  ;;  %s1802_s21 = smov (!%p24_p0, %s26_s21), %s1407_s18 }
   0x7   : > { %p184_p3 = pnand %p1178_p1, %p183_p2  ;;  %p28_p4 = scmp.ge.s32.totalorder %s1802_s21, 2 }
   0x8   : > { %s1179_s22 = sshll.u32 (!%p184_p3), %s1399_s16, 3  ;;  %p219_p5 = scmp.lt.s32.totalorder (!%p184_p3), %s1395_s15, 3 }
   0x9   : > { %s1804_s21 = smov (%p28_p4, %s1802_s21), 0  ;;  %187 = sbr.rel (%p184_p3) target bundleno = 356 (0x164), region = 36 }
   0xa   : > { %p221_p6 = scmp.lt.s32.totalorder (!%p184_p3), %s1179_s22, 15  ;;  %s1182_s23 = sshll.u32 (!%p184_p3), %s1399_s16, 1 }
   0xb   : > { %p231_p7 = scmp.lt.s32.totalorder (!%p184_p3), %s1182_s23, 3  ;;  %p1184_p8 = scmp.ne.s32.totalorder (!%p184_p3), %s1395_s15, 0 }
  0x10   : > { %s220_s24 = scalar_select %p219_p5, %s1395_s15, 3 }
  0x11   : > { %s1806_s22 = smov (!%p221_p6, %s1179_s22), 15  ;;  %s1808_s23 = smov (!%p231_p7, %s1182_s23), 3 }
  0x12   : > { %s1180_s25 = sshll.u32 %s220_s24, 4  ;;  %s1296_s5 = smul.u32 12, %s220_s24  ;;  %v1413_v0 = vmov (!%p1184_p8), 0.0  }
  0x13   : > { %s224_s26 = sadd.s32 %s1180_s25, %s1806_s22  ;;  %s1295_s6 = smul.u32 3, %s1808_s23  ;;  %244 = vst [vmem:[#allocation2] sm:$0xff] (!%p1184_p8), %v1413_v0  ;;  %245 = vst [vmem:[#allocation2 + $0x8] sm:$0xff] (!%p1184_p8), %v1413_v0 }
  0x14   : > { %s1181_s27 = sshll.u32 %s224_s26, 3  ;;  %243 = sbr.rel (%p1184_p8) target bundleno = 35 (0x23), region = 40  ;;  %246 = vst [vmem:[#allocation2 + $0x10] sm:$0xff] (!%p1184_p8), %v1413_v0  ;;  %247 = vst [vmem:[#allocation2 + $0x18] sm:$0xff] (!%p1184_p8), %v1413_v0 }
  0x15   : > { %s1479_s30 = scalar_lea.vmem %s1788_s0, %s1181_s27  ;;  %s235_s7 = sadd.s32 %s1296_s5, %s1295_s6  ;;  %248 = vst [vmem:[#allocation2 + $0x20] sm:$0xff] (!%p1184_p8), %v1413_v0  ;;  %249 = vst [vmem:[#allocation2 + $0x28] sm:$0xff] (!%p1184_p8), %v1413_v0 }
  0x16   : > { %s1183_s8 = sshll.u32 %s235_s7, 3  ;;  %250 = vst [vmem:[#allocation2 + $0x30] sm:$0xff] (!%p1184_p8), %v1413_v0  ;;  %251 = vst [vmem:[#allocation2 + $0x38] sm:$0xff] (!%p1184_p8), %v1413_v0 }
  0x17   : > { %s1484_s11 = scalar_lea.vmem %s1792_s4, %s1183_s8  ;;  %252 = vst [vmem:[#allocation3] sm:$0xff] (!%p1184_p8), %v1413_v0  ;;  %253 = vst [vmem:[#allocation3 + $0x8] sm:$0xff] (!%p1184_p8), %v1413_v0 }
  0x18   : > { %254 = vst [vmem:[#allocation3 + $0x10] sm:$0xff] (!%p1184_p8), %v1413_v0  ;;  %255 = vst [vmem:[#allocation3 + $0x18] sm:$0xff] (!%p1184_p8), %v1413_v0 }
  0x19   : > { %256 = vst [vmem:[#allocation3 + $0x20] sm:$0xff] (!%p1184_p8), %v1413_v0  ;;  %257 = vst [vmem:[#allocation3 + $0x28] sm:$0xff] (!%p1184_p8), %v1413_v0 }
  0x1a   : > { %258 = vst [vmem:[#allocation3 + $0x30] sm:$0xff] (!%p1184_p8), %v1413_v0  ;;  %259 = vst [vmem:[#allocation3 + $0x38] sm:$0xff] (!%p1184_p8), %v1413_v0 }
  0x1b   : > { %260 = vst [vmem:[#allocation3 + $0x40] sm:$0xff] %v1413_v0  ;;  %261 = vst [vmem:[#allocation3 + $0x48] sm:$0xff] %v1413_v0 }
  0x1c   : > { %262 = vst [vmem:[#allocation3 + $0x50] sm:$0xff] %v1413_v0  ;;  %263 = vst [vmem:[#allocation3 + $0x58] sm:$0xff] %v1413_v0 }
  0x1d   : > { %264 = vst [vmem:[#allocation3 + $0x60] sm:$0xff] %v1413_v0  ;;  %265 = vst [vmem:[#allocation3 + $0x68] sm:$0xff] %v1413_v0 }
  0x1e   : > { %266 = vst [vmem:[#allocation3 + $0x70] sm:$0xff] %v1413_v0  ;;  %267 = vst [vmem:[#allocation3 + $0x78] sm:$0xff] %v1413_v0 }
  0x1f   : > { %268 = vst [vmem:[#allocation3 + $0x80] sm:$0xff] %v1413_v0  ;;  %269 = vst [vmem:[#allocation3 + $0x88] sm:$0xff] %v1413_v0 }
  0x20   : > { %270 = vst [vmem:[#allocation3 + $0x90] sm:$0xff] %v1413_v0  ;;  %271 = vst [vmem:[#allocation3 + $0x98] sm:$0xff] %v1413_v0 }
  0x21   : > { %272 = vst [vmem:[#allocation3 + $0xa0] sm:$0xff] %v1413_v0  ;;  %273 = vst [vmem:[#allocation3 + $0xa8] sm:$0xff] %v1413_v0 }
  0x22   : > { %274 = vst [vmem:[#allocation3 + $0xb0] sm:$0xff] %v1413_v0  ;;  %275 = vst [vmem:[#allocation3 + $0xb8] sm:$0xff] %v1413_v0 }
  0x23 PF: > { %v1341_v1 = vld [vmem:[%s1789_s1 + $0x4] ss:$12 sps:$4 sm:$0xff]   ;;  %v1343_v2 = vld [vmem:[%s1789_s1] ss:$12 sps:$4 sm:$0xff]   ;;  %v1414_v3 = vmov 0   ;;  %v279_v30 = vld [vmem:[%s1479_s30 + $0x18] sm:$0xff] }
  0x24   : > { %560 = vmatprep.mubr.bf16.mxu0 %v1414_v3  ;;  %528 = vmatprep.subr.bf16.mxu0 %v1341_v1  ;;  %v1344_v4 = vld [vmem:[%s1789_s1 + $0x1c] ss:$12 sps:$4 sm:$0xff]   ;;  %v1346_v5 = vld [vmem:[%s1789_s1 + $0x18] ss:$12 sps:$4 sm:$0xff]   ;;  %v1347_v6 = vld [vmem:[%s1789_s1 + $0x34] ss:$12 sps:$4 sm:$0xff]  }
  0x25   : > { %529 = vmatpush1.bf16.msra.mxu0 %v1343_v2  ;;  %v1350_v7 = vld [vmem:[%s1789_s1 + $0x8] ss:$12 sps:$4 sm:$0xff]   ;;  %v1349_v8 = vld [vmem:[%s1789_s1 + $0x30] ss:$12 sps:$4 sm:$0xff]   ;;  %v1354_v9 = vld [vmem:[%s1789_s1 + $0x20] ss:$12 sps:$4 sm:$0xff]  }
  0x26   : > { %530 = vmatprep.subr.bf16.mxu0 %v1344_v4  ;;  %1271 = vmatprep.subr.bf16.mxu1 %v1350_v7  ;;  %v1351_v10 = vld [vmem:[%s1789_s1 + $0x4c] ss:$12 sps:$4 sm:$0xff]   ;;  %v1353_v12 = vld [vmem:[%s1789_s1 + $0x48] ss:$12 sps:$4 sm:$0xff]   ;;  %v1355_v13 = vld [vmem:[%s1789_s1 + $0x64] ss:$12 sps:$4 sm:$0xff]  }
  0x27   : > { %1272 = vmatpush3.bf16.msra.mxu1 %v1350_v7  ;;  %v1358_v11 = vld [vmem:[%s1789_s1 + $0x38] ss:$12 sps:$4 sm:$0xff]   ;;  %v1362_v14 = vld [vmem:[%s1789_s1 + $0x50] ss:$12 sps:$4 sm:$0xff]   ;;  %v1357_v15 = vld [vmem:[%s1789_s1 + $0x60] ss:$12 sps:$4 sm:$0xff]  }
  0x28   : > { %1273 = vmatprep.subr.bf16.mxu1 %v1354_v9  ;;  %v1359_v16 = vld [vmem:[%s1789_s1 + $0x7c] ss:$12 sps:$4 sm:$0xff]   ;;  %v276_v18 = vld [vmem:[%s1479_s30] sm:$0xff]  ;;  %v278_v29 = vld [vmem:[%s1479_s30 + $0x10] sm:$0xff]  ;;  %v1415_v53 = vmov 0.0  }
  0x29   : > { %531 = vmatpush1.bf16.msra.mxu0 %v1346_v5  ;;  %v1366_v17 = vld [vmem:[%s1789_s1 + $0x68] ss:$12 sps:$4 sm:$0xff]   ;;  %v1361_v19 = vld [vmem:[%s1789_s1 + $0x78] ss:$12 sps:$4 sm:$0xff]   ;;  %v1370_v26 = vld [vmem:[%s1789_s1 + $0x80] ss:$12 sps:$4 sm:$0xff]  }
  0x2a   : > { %532 = vmatprep.subr.bf16.mxu0 %v1347_v6  ;;  %v277_v20 = vld [vmem:[%s1479_s30 + $0x8] sm:$0xff]  ;;  %v284_v21 = vld [vmem:[#allocation2] sm:$0xff]  ;;  %v286_v31 = vld [vmem:[#allocation2 + $0x10] sm:$0xff]  ;;  %v1416_v62 = vmov 1.0|1.0  }
  0x2b   : > { %1274 = vmatpush3.bf16.msra.mxu1 %v1354_v9  ;;  %v285_v22 = vld [vmem:[#allocation2 + $0x8] sm:$0xff]  ;;  %v1363_v23 = vld [vmem:[%s1789_s1 + $0x94] ss:$12 sps:$4 sm:$0xff]   ;;  %v292_v24 = vsub.f32 %v276_v18, %v284_v21  ;;  %v1365_v32 = vld [vmem:[%s1789_s1 + $0x90] ss:$12 sps:$4 sm:$0xff]   ;;  %v294_v34 = vsub.f32 %v278_v29, %v286_v31 }
  0x2c   : > { %1275 = vmatprep.subr.bf16.mxu1 %v1358_v11  ;;  %v293_v25 = vsub.f32 %v277_v20, %v285_v22  ;;  %v287_v33 = vld [vmem:[#allocation2 + $0x18] sm:$0xff]  ;;  %v280_v35 = vld [vmem:[%s1479_s30 + $0x20] sm:$0xff]  ;;  %v281_v36 = vld [vmem:[%s1479_s30 + $0x28] sm:$0xff] }
  0x2d   : > { %533 = vmatpush1.bf16.msra.mxu0 %v1349_v8  ;;  %v300_v27 = vmul.f32 0.5, %v292_v24  ;;  %v295_v39 = vsub.f32 %v279_v30, %v287_v33  ;;  %v288_v40 = vld [vmem:[#allocation2 + $0x20] sm:$0xff]  ;;  %v289_v41 = vld [vmem:[#allocation2 + $0x28] sm:$0xff]  ;;  %v282_v42 = vld [vmem:[%s1479_s30 + $0x30] sm:$0xff]  ;;  %v302_v45 = vmul.f32 0.5, %v294_v34  ;;  %v668_v30 = vlaneseq }
  0x2e   : > { %534 = vmatprep.subr.bf16.mxu0 %v1351_v10  ;;  %v301_v28 = vmul.f32 0.5, %v293_v25  ;;  %v1367_v43 = vld [vmem:[%s1789_s1 + $0xac] ss:$12 sps:$4 sm:$0xff]   ;;  %v296_v46 = vsub.f32 %v280_v35, %v288_v40  ;;  %v297_v47 = vsub.f32 %v281_v36, %v289_v41  ;;  %v290_v48 = vld [vmem:[#allocation2 + $0x30] sm:$0xff]  ;;  %v707_v35 = vld [vmem:[%s1791_s3] sm:$0x7] }
  0x2f   : > { %1276 = vmatpush3.bf16.msra.mxu1 %v1358_v11  ;;  %v308_v37 = vadd.f32 %v300_v27, %v284_v21  ;;  %v1371_v44 = vld [vmem:[%s1789_s1 + $0x98] ss:$12 sps:$4 sm:$0xff]   ;;  %v303_v49 = vmul.f32 0.5, %v295_v39  ;;  %v298_v52 = vsub.f32 %v282_v42, %v290_v48  ;;  %v310_v57 = vadd.f32 %v302_v45, %v286_v31  ;;  %v1369_v0 = vld [vmem:[%s1789_s1 + $0xa8] ss:$12 sps:$4 sm:$0xff]  }
  0x30   : > { %1277 = vmatprep.subr.bf16.mxu1 %v1362_v14  ;;  %v309_v38 = vadd.f32 %v301_v28, %v285_v22  ;;  %v283_v50 = vld [vmem:[%s1479_s30 + $0x38] sm:$0xff]  ;;  %v304_v58 = vmul.f32 0.5, %v296_v46  ;;  %v305_v63 = vmul.f32 0.5, %v297_v47  ;;  %v669_v31 = vshrl.u32 %v668_v30, 7 }
  0x31   : > { %535 = vmatpush1.bf16.msra.mxu0 %v1353_v12  ;;  %vm316_vm0 = vcmp.ge.f32.partialorder %v308_v37, 1.0  ;;  %v291_v51 = vld [vmem:[#allocation2 + $0x38] sm:$0xff]  ;;  %v311_v61 = vadd.f32 %v303_v49, %v287_v33  ;;  %vm318_vm3 = vcmp.ge.f32.partialorder %v310_v57, 1.0  ;;  %v306_v4 = vmul.f32 0.5, %v298_v52  ;;  %v666_v33 = vld [vmem:[%s1790_s2] sm:$0x7] }
  0x32   : > { %536 = vmatprep.subr.bf16.mxu0 %v1355_v13  ;;  %vm317_vm1 = vcmp.ge.f32.partialorder %v309_v38, 1.0  ;;  %v1185_v54 = vsel %vm316_vm0, 1.0, %v1415_v53  ;;  %v312_v1 = vadd.f32 %v304_v58, %v288_v40  ;;  %v299_v2 = vsub.f32 %v283_v50, %v291_v51  ;;  %v1372_v7 = vld [vmem:[%s1789_s1 + $0xb0] ss:$12 sps:$4 sm:$0xff]  }
  0x33   : > { %1278 = vmatpush3.bf16.msra.mxu1 %v1362_v14  ;;  %v1186_v55 = vsel %vm317_vm1, 1.0, %v1415_v53  ;;  %vm1564_vm2 = vmpackc.low %vm317_vm1, %vm316_vm0  ;;  %v340_v59 = vsub.f32 1.0, %v1185_v54  ;;  %vm319_vm4 = vcmp.ge.f32.partialorder %v311_v61, 1.0  ;;  %v1187_v8 = vsel %vm318_vm3, 1.0, %v1415_v53  ;;  %v751_v54 = vld [vmem:[#allocation3 + $0x18] sm:$0xff] }
  0x34   : > { %1279 = vmatprep.subr.bf16.mxu1 %v1366_v17  ;;  %v341_v60 = vsub.f32 1.0, %v1186_v55  ;;  %1287 = vmatprep.mubr.msk.bf16.mxu1 %vm1564_vm2, %v1416_v62  ;;  %v1188_v9 = vsel %vm319_vm4, 1.0, %v1415_v53  ;;  %v342_v10 = vsub.f32 1.0, %v1187_v8  ;;  %v313_v11 = vadd.f32 %v305_v63, %v289_v41  ;;  %vm1219_vm9 = vmpackc.low %vm319_vm4, %vm318_vm3 }
  0x35   : > { %537 = vmatpush1.bf16.msra.mxu0 %v1357_v15  ;;  %v348_v5 = vmul.f32 %v340_v59, %v308_v37  ;;  %vm320_vm5 = vcmp.ge.f32.partialorder %v312_v1, 1.0  ;;  %v343_v12 = vsub.f32 1.0, %v1188_v9  ;;  %v307_v14 = vmul.f32 0.5, %v299_v2  ;;  %v752_v59 = vld [vmem:[#allocation3 + $0x20] sm:$0xff] }
  0x36   : > { %538 = vmatprep.subr.bf16.mxu0 %v1359_v16  ;;  %v349_v6 = vmul.f32 %v341_v60, %v309_v38  ;;  %v1189_v13 = vsel %vm320_vm5, 1.0, %v1415_v53  ;;  %v314_v15 = vadd.f32 %v306_v4, %v290_v48  ;;  %v350_v16 = vmul.f32 %v342_v10, %v310_v57  ;;  %v749_v48 = vld [vmem:[#allocation3 + $0x8] sm:$0xff] }
  0x37   : > { %1280 = vmatpush3.bf16.msra.mxu1 %v1366_v17  ;;  %356 = vst [vmem:[#allocation2] sm:$0xff] %v348_v5  ;;  %vm321_vm6 = vcmp.ge.f32.partialorder %v313_v11, 1.0  ;;  %v344_v17 = vsub.f32 1.0, %v1189_v13  ;;  %v351_v18 = vmul.f32 %v343_v12, %v311_v61  ;;  %v315_v20 = vadd.f32 %v307_v14, %v291_v51 }
  0x38   : > { %1281 = vmatprep.subr.bf16.mxu1 %v1370_v26  ;;  %357 = vst [vmem:[#allocation2 + $0x8] sm:$0xff] %v349_v6  ;;  %vm322_vm7 = vcmp.ge.f32.partialorder %v314_v15, 1.0  ;;  %358 = vst [vmem:[#allocation2 + $0x10] sm:$0xff] %v350_v16  ;;  %v674_v34 = vsub.s32 1, %v669_v31  ;;  %v678_v37 = vsub.s32 2, %v669_v31 }
  0x39   : > { %539 = vmatpush1.bf16.msra.mxu0 %v1361_v19  ;;  %v1190_v19 = vsel %vm321_vm6, 1.0, %v1415_v53  ;;  %v352_v22 = vmul.f32 %v344_v17, %v312_v1  ;;  %359 = vst [vmem:[#allocation2 + $0x18] sm:$0xff] %v351_v18  ;;  %vm323_vm8 = vcmp.ge.f32.partialorder %v315_v20, 1.0  ;;  %vm1221_vm10 = vmpackc.low %vm321_vm6, %vm320_vm5 }
  0x3a   : > { %540 = vmatprep.subr.bf16.mxu0 %v1363_v23  ;;  %v345_v21 = vsub.f32 1.0, %v1190_v19  ;;  %v1191_v23 = vsel %vm322_vm7, 1.0, %v1415_v53  ;;  %vm1223_vm11 = vmpackc.low %vm323_vm8, %vm322_vm7  ;;  %v1615_v38 = vrot.slane %v666_v33, %v674_v34  ;;  %v1619_v40 = vrot.slane %v707_v35, %v674_v34 }
  0x3b   : > { %1282 = vmatpush3.bf16.msra.mxu1 %v1370_v26  ;;  %v346_v24 = vsub.f32 1.0, %v1191_v23  ;;  %360 = vst [vmem:[#allocation2 + $0x20] sm:$0xff] %v352_v22  ;;  %v1192_v26 = vsel %vm323_vm8, 1.0, %v1415_v53  ;;  %v1627_v51 = vrot.slane %v707_v35, %v678_v37 }
  0x3c   : > { %1283 = vmatprep.subr.bf16.mxu1 %v1371_v44  ;;  %v353_v25 = vmul.f32 %v345_v21, %v313_v11  ;;  %v347_v27 = vsub.f32 1.0, %v1192_v26 }
  0x3d   : > { %541 = vmatpush1.bf16.msra.mxu0 %v1365_v32  ;;  %v354_v28 = vmul.f32 %v346_v24, %v314_v15  ;;  %v670_v32 = vsub.s32 0, %v669_v31 }
  0x3e   : > { %542 = vmatprep.subr.bf16.mxu0 %v1367_v43  ;;  %361 = vst [vmem:[#allocation2 + $0x28] sm:$0xff] %v353_v25  ;;  %v355_v29 = vmul.f32 %v347_v27, %v315_v20  ;;  %v1622_v43 = vrot.slane %v666_v33, %v678_v37  ;;  %v754_v37 = vld [vmem:[#allocation3 + $0x30] sm:$0xff] }
  0x3f   : > { %1284 = vmatpush3.bf16.msra.mxu1 %v1371_v44  ;;  %362 = vst [vmem:[#allocation2 + $0x30] sm:$0xff] %v354_v28  ;;  %v1613_v36 = vrot.slane %v666_v33, %v670_v32  ;;  %v748_v44 = vld [vmem:[#allocation3] sm:$0xff] }
  0x40   : > { %1285 = vmatprep.subr.bf16.mxu1 %v1372_v7  ;;  %363 = vst [vmem:[#allocation2 + $0x38] sm:$0xff] %v355_v29 }
  0x41   : > { %543 = vmatpush1.bf16.msra.mxu0 %v1369_v0  ;;  %v756_v0 = vld [vmem:[#allocation3 + $0x40] sm:$0xff] }
  0x43   : > { %1286 = vmatpush3.bf16.msra.mxu1 %v1372_v7  ;;  %v1636_v7 = vld [vmem:[#allocation3 + $0x10] sm:$0xff] }
  0x44   : > { %1218 = vmatmul.mubr.msk.bf16.vlgmr.msra.gmra.mrb[0].mxu0 %vm1564_vm2, %v1416_v62 }
  0x45   : > { %570 = vmatprep.mubr.bf16.mxu0 %v1414_v3 }
  0x46   : > { %1288 = vmatmul.mubr.msk.bf16.vlgmr.msra.gmra.mrb[0].mxu1 %vm1219_vm9, %v1416_v62 }
  0x47   : > { %1291 = vmatprep.mubr.msk.bf16.mxu1 %vm1221_vm10, %v1416_v62 }
  0x4c   : > { %1220 = vmatmul.mubr.msk.bf16.gmra.mrb[4].mxu0 %vm1219_vm9, %v1416_v62 }
  0x4d   : > { %580 = vmatprep.mubr.bf16.mxu0 %v1414_v3 }
  0x4e   : > { %1292 = vmatmul.mubr.msk.bf16.gmra.mrb[4].mxu1 %vm1223_vm11, %v1416_v62 }
  0x54   : > { %1222 = vmatmul.mubr.msk.bf16.gmra.mrb[8].mxu0 %vm1221_vm10, %v1416_v62 }
  0x55   : > { %590 = vmatprep.mubr.bf16.mxu0 %v1414_v3  ;;  %v1617_v3 = vrot.slane %v707_v35, %v670_v32 }
  0x5c   : > { %1224 = vmatmul.mubr.msk.bf16.gmra.mrb[12].mxu0 %vm1223_vm11, %v1416_v62 }
 0x117   : > { %v562_v39 = vpop.f32.mrb[0].mxu0 }
 0x118   : > { %v683_v41 = vmul.f32 %v1613_v36, %v562_v39  ;;  %v564_v42 = vpop.f32.mrb[1].mxu0 }
 0x119   : > { %v684_v45 = vmul.f32 %v1615_v38, %v564_v42  ;;  %v566_v46 = vpop.f32.mrb[2].mxu0  ;;  %v1289_v56 = vpop.f32.mrb[0].mxu1 }
 0x11a   : > { %v724_v47 = vadd.f32 %v1617_v3, %v683_v41  ;;  %v686_v49 = vmul.f32 %v1613_v36, %v566_v46  ;;  %v568_v50 = vpop.f32.mrb[3].mxu0  ;;  %v691_v60 = vmul.f32 %v1289_v56, %v1622_v43  ;;  %v635_v61 = vpop.f32.mrb[1].mxu1 }
 0x11b   : > { %v725_v52 = vadd.f32 %v1619_v40, %v684_v45  ;;  %v687_v55 = vmul.f32 %v1615_v38, %v568_v50  ;;  %v685_v1 = vmul.f32 %v1622_v43, %v635_v61  ;;  %v1290_v2 = vpop.f32.mrb[2].mxu1  ;;  %v755_v45 = vld [vmem:[#allocation3 + $0x38] sm:$0xff] }
 0x11c   : > { %v772_v57 = vsub.f32 %v724_v47, %v748_v44  ;;  %v727_v58 = vadd.f32 %v1617_v3, %v686_v49  ;;  %v732_v6 = vadd.f32 %v1627_v51, %v691_v60  ;;  %v1639_v8 = vmul.f32 %v1290_v2, %v1622_v43  ;;  %v638_v9 = vpop.f32.mrb[3].mxu1 }
 0x11d   : > { %v773_v62 = vsub.f32 %v725_v52, %v749_v48  ;;  %v728_v63 = vadd.f32 %v1619_v40, %v687_v55  ;;  %v726_v13 = vadd.f32 %v1627_v51, %v685_v1  ;;  %v1643_v14 = vmul.f32 %v1622_v43, %v638_v9 }
 0x11e   : > { %v796_v4 = vmul.f32 0.5, %v772_v57  ;;  %v775_v5 = vsub.f32 %v727_v58, %v751_v54  ;;  %v780_v19 = vsub.f32 %v732_v6, %v756_v0 }
 0x11f   : > { %v797_v10 = vmul.f32 0.5, %v773_v62  ;;  %v776_v11 = vsub.f32 %v728_v63, %v752_v59  ;;  %v572_v12 = vpop.f32.mrb[4].mxu0  ;;  %v774_v24 = vsub.f32 %v726_v13, %v1636_v7  ;;  %v759_v13 = vld [vmem:[#allocation3 + $0x58] sm:$0xff] }
 0x120   : > { %v820_v15 = vadd.f32 %v796_v4, %v748_v44  ;;  %v799_v16 = vmul.f32 0.5, %v775_v5  ;;  %v689_v17 = vmul.f32 %v1613_v36, %v572_v12  ;;  %v574_v18 = vpop.f32.mrb[5].mxu0  ;;  %v804_v27 = vmul.f32 0.5, %v780_v19 }
 0x121   : > { %v821_v20 = vadd.f32 %v797_v10, %v749_v48  ;;  %v800_v21 = vmul.f32 0.5, %v776_v11  ;;  %v690_v22 = vmul.f32 %v1615_v38, %v574_v18  ;;  %v576_v23 = vpop.f32.mrb[6].mxu0  ;;  %v1651_v32 = vpop.f32.mrb[4].mxu1  ;;  %v757_v10 = vld [vmem:[#allocation3 + $0x48] sm:$0xff]  ;;  %v798_v11 = vmul.f32 0.5, %v774_v24 }
 0x122   : > { %vm844_vm12 = vcmp.ge.f32.partialorder %v820_v15, 1.0  ;;  %v823_v25 = vadd.f32 %v799_v16, %v751_v54  ;;  %v730_v26 = vadd.f32 %v1617_v3, %v689_v17  ;;  %v578_v28 = vpop.f32.mrb[7].mxu0  ;;  %v1654_v39 = vpop.f32.mrb[5].mxu1  ;;  %v828_v62 = vadd.f32 %v804_v27, %v756_v0 }
 0x123   : > { %v1233_v29 = vsel %vm844_vm12, 1.0, %v1415_v53  ;;  %vm845_vm13 = vcmp.ge.f32.partialorder %v821_v20, 1.0  ;;  %v824_v30 = vadd.f32 %v800_v21, %v752_v59  ;;  %v731_v31 = vadd.f32 %v1619_v40, %v690_v22  ;;  %v1657_v46 = vpop.f32.mrb[6].mxu1 }
 0x124   : > { %v916_v33 = vsub.f32 1.0, %v1233_v29  ;;  %v988_v34 = vtrunc.f32 %v1233_v29  ;;  %v1234_v35 = vsel %vm845_vm13, 1.0, %v1415_v53  ;;  %vm847_vm14 = vcmp.ge.f32.partialorder %v823_v25, 1.0  ;;  %v1660_v52 = vpop.f32.mrb[7].mxu1 }
 0x125   : > { %v917_v41 = vsub.f32 1.0, %v1234_v35  ;;  %v989_v42 = vtrunc.f32 %v1234_v35  ;;  %v1236_v44 = vsel %vm847_vm14, 1.0, %v1415_v53  ;;  %vm848_vm15 = vcmp.ge.f32.partialorder %v824_v30, 1.0 }
 0x126   : > { %v940_v47 = vmul.f32 %v916_v33, %v820_v15  ;;  %v919_v48 = vsub.f32 1.0, %v1236_v44  ;;  %v991_v49 = vtrunc.f32 %v1236_v44  ;;  %v1237_v50 = vsel %vm848_vm15, 1.0, %v1415_v53 }
 0x127   : > { %v941_v54 = vmul.f32 %v917_v41, %v821_v20  ;;  %v920_v55 = vsub.f32 1.0, %v1237_v50  ;;  %v992_v56 = vtrunc.f32 %v1237_v50  ;;  %v778_v57 = vsub.f32 %v730_v26, %v754_v37  ;;  %v1662_v58 = vpop.f32.mrb[8].mxu0 }
 0x128   : > { %964 = vst [vmem:[#allocation3] sm:$0xff] %v940_v47  ;;  %v943_v59 = vmul.f32 %v919_v48, %v823_v25  ;;  %v1664_v60 = vpack.c.f32.eXmY %v988_v34, %v991_v49, 312  ;;  %v779_v61 = vsub.f32 %v731_v31, %v755_v45  ;;  %v584_v63 = vpop.f32.mrb[9].mxu0  ;;  %v692_v5 = vmul.f32 %v1613_v36, %v576_v23  ;;  %v758_v25 = vld [vmem:[#allocation3 + $0x50] sm:$0xff]  ;;  %v753_v48 = vld [vmem:[#allocation3 + $0x28] sm:$0xff] }
 0x129   : > { %965 = vst [vmem:[#allocation3 + $0x8] sm:$0xff] %v941_v54  ;;  %v944_v1 = vmul.f32 %v920_v55, %v824_v30  ;;  %v1666_v2 = vpack.c.f32.eXmY %v989_v42, %v992_v56, 312  ;;  %v802_v4 = vmul.f32 0.5, %v778_v57  ;;  %v1669_v6 = vpop.f32.mrb[10].mxu0  ;;  %vm852_vm0 = vcmp.ge.f32.partialorder %v828_v62, 1.0 }
 0x12a   : > { %967 = vst [vmem:[#allocation3 + $0x18] sm:$0xff] %v943_v59  ;;  %v803_v9 = vmul.f32 0.5, %v779_v61  ;;  %v693_v12 = vmul.f32 %v1615_v38, %v578_v28  ;;  %v1672_v15 = vpop.f32.mrb[11].mxu0  ;;  %v1675_v16 = vsel %vm852_vm0, 1.0, %v1415_v53  ;;  %v733_v17 = vadd.f32 %v1617_v3, %v692_v5 }
 0x12b   : > { %968 = vst [vmem:[#allocation3 + $0x20] sm:$0xff] %v944_v1  ;;  %v826_v0 = vadd.f32 %v802_v4, %v754_v37  ;;  %v735_v18 = vadd.f32 %v1627_v51, %v1639_v8  ;;  %v924_v20 = vsub.f32 1.0, %v1675_v16  ;;  %v996_v21 = vtrunc.f32 %v1675_v16 }
 0x12c   : > { %v827_v19 = vadd.f32 %v803_v9, %v755_v45  ;;  %v822_v22 = vadd.f32 %v798_v11, %v1636_v7  ;;  %v781_v23 = vsub.f32 %v733_v17, %v757_v10  ;;  %v734_v24 = vadd.f32 %v1619_v40, %v693_v12  ;;  %v760_v17 = vld [vmem:[#allocation3 + $0x60] sm:$0xff] }
 0x12d   : > { %vm850_vm1 = vcmp.ge.f32.partialorder %v826_v0, 1.0  ;;  %v783_v26 = vsub.f32 %v735_v18, %v759_v13  ;;  %v948_v28 = vmul.f32 %v924_v20, %v828_v62  ;;  %v729_v56 = vadd.f32 %v1627_v51, %v1643_v14 }
 0x12e   : > { %v1239_v27 = vsel %vm850_vm1, 1.0, %v1415_v53  ;;  %vm851_vm2 = vcmp.ge.f32.partialorder %v827_v19, 1.0  ;;  %vm846_vm3 = vcmp.ge.f32.partialorder %v822_v22, 1.0  ;;  %v805_v31 = vmul.f32 0.5, %v781_v23 }
 0x12f   : > { %v922_v29 = vsub.f32 1.0, %v1239_v27  ;;  %v994_v8 = vtrunc.f32 %v1239_v27  ;;  %v1240_v30 = vsel %vm851_vm2, 1.0, %v1415_v53  ;;  %v1686_v33 = vpop.f32.mrb[12].mxu0  ;;  %972 = vst [vmem:[#allocation3 + $0x40] sm:$0xff] %v948_v28  ;;  %v1689_v35 = vsel %vm846_vm3, 1.0, %v1415_v53 }
 0x130   : > { %v923_v34 = vsub.f32 1.0, %v1240_v30  ;;  %v995_v7 = vtrunc.f32 %v1240_v30  ;;  %v782_v37 = vsub.f32 %v734_v24, %v758_v25  ;;  %v1691_v41 = vpop.f32.mrb[13].mxu0  ;;  %v829_v44 = vadd.f32 %v805_v31, %v757_v10 }
 0x131   : > { %v946_v42 = vmul.f32 %v922_v29, %v826_v0  ;;  %v918_v45 = vsub.f32 1.0, %v1689_v35  ;;  %v990_v47 = vtrunc.f32 %v1689_v35  ;;  %v1695_v49 = vpop.f32.mrb[14].mxu0  ;;  %v807_v55 = vmul.f32 0.5, %v783_v26 }
 0x132   : > { %v947_v50 = vmul.f32 %v923_v34, %v827_v19  ;;  %v806_v54 = vmul.f32 0.5, %v782_v37  ;;  %v1699_v57 = vpop.f32.mrb[15].mxu0  ;;  %vm853_vm4 = vcmp.ge.f32.partialorder %v829_v44, 1.0  ;;  %v695_v61 = vmul.f32 %v1613_v36, %v1662_v58  ;;  %v761_v58 = vld [vmem:[#allocation3 + $0x68] sm:$0xff] }
 0x133   : > { %970 = vst [vmem:[#allocation3 + $0x30] sm:$0xff] %v946_v42  ;;  %v942_v59 = vmul.f32 %v918_v45, %v822_v22  ;;  %v696_v62 = vmul.f32 %v1615_v38, %v584_v63  ;;  %v1242_v1 = vsel %vm853_vm4, 1.0, %v1415_v53  ;;  %v831_v5 = vadd.f32 %v807_v55, %v759_v13  ;;  %v763_v55 = vld [vmem:[#allocation3 + $0x78] sm:$0xff] }
 0x134   : > { %971 = vst [vmem:[#allocation3 + $0x38] sm:$0xff] %v947_v50  ;;  %v830_v4 = vadd.f32 %v806_v54, %v758_v25  ;;  %v777_v9 = vsub.f32 %v729_v56, %v753_v48  ;;  %v925_v10 = vsub.f32 1.0, %v1242_v1  ;;  %v997_v11 = vtrunc.f32 %v1242_v1 }
 0x135   : > { %966 = vst [vmem:[#allocation3 + $0x10] sm:$0xff] %v942_v59  ;;  %v736_v14 = vadd.f32 %v1617_v3, %v695_v61  ;;  %v737_v12 = vadd.f32 %v1619_v40, %v696_v62  ;;  %vm855_vm6 = vcmp.ge.f32.partialorder %v831_v5, 1.0  ;;  %v703_v63 = vmul.f32 %v1651_v32, %v1622_v43 }
 0x136   : > { %vm854_vm5 = vcmp.ge.f32.partialorder %v830_v4, 1.0  ;;  %v801_v0 = vmul.f32 0.5, %v777_v9  ;;  %v949_v18 = vmul.f32 %v925_v10, %v829_v44  ;;  %v1016_v19 = vpack.c.f32.eXmY %v994_v8, %v997_v11, 312  ;;  %v768_v44 = vld [vmem:[#allocation3 + $0xa0] sm:$0xff] }
 0x137   : > { %v1243_v13 = vsel %vm854_vm5, 1.0, %v1415_v53  ;;  %v1244_v20 = vsel %vm855_vm6, 1.0, %v1415_v53  ;;  %v784_v28 = vsub.f32 %v736_v14, %v760_v17  ;;  %v785_v29 = vsub.f32 %v737_v12, %v761_v58 }
 0x138   : > { %v926_v22 = vsub.f32 1.0, %v1243_v13  ;;  %v998_v23 = vtrunc.f32 %v1243_v13  ;;  %v927_v24 = vsub.f32 1.0, %v1244_v20  ;;  %v999_v25 = vtrunc.f32 %v1244_v20  ;;  %973 = vst [vmem:[#allocation3 + $0x48] sm:$0xff] %v949_v18 }
 0x139   : > { %v1020_v26 = vpack.c.b8 %v1016_v19, %v1664_v60  ;;  %v825_v27 = vadd.f32 %v801_v0, %v753_v48  ;;  %v808_v34 = vmul.f32 0.5, %v784_v28  ;;  %v809_v37 = vmul.f32 0.5, %v785_v29 }
 0x13a   : > { %v950_v30 = vmul.f32 %v926_v22, %v830_v4  ;;  %v1026_v31 = vpack.c.f32.eXmY %v995_v7, %v998_v23, 312  ;;  %v951_v32 = vmul.f32 %v927_v24, %v831_v5  ;;  %v1036_v8 = vpack.c.f32.eXmY %v996_v21, %v999_v25, 312  ;;  %v771_v22 = vld [vmem:[#allocation3 + $0xb8] sm:$0xff] }
 0x13b   : > { %1072 = vst [vmem:[%s1484_s11] sm:$0xff] %v1020_v26  ;;  %vm849_vm7 = vcmp.ge.f32.partialorder %v825_v27, 1.0  ;;  %v744_v42 = vadd.f32 %v1627_v51, %v703_v63  ;;  %v698_v7 = vmul.f32 %v1613_v36, %v1669_v6  ;;  %v697_v16 = vmul.f32 %v1622_v43, %v1654_v39  ;;  %v762_v39 = vld [vmem:[#allocation3 + $0x70] sm:$0xff] }
 0x13c   : > { %974 = vst [vmem:[#allocation3 + $0x50] sm:$0xff] %v950_v30  ;;  %v1030_v60 = vpack.c.b8 %v1026_v31, %v1666_v2  ;;  %975 = vst [vmem:[#allocation3 + $0x58] sm:$0xff] %v951_v32  ;;  %v1238_v45 = vsel %vm849_vm7, 1.0, %v1415_v53  ;;  %v832_v50 = vadd.f32 %v808_v34, %v760_v17  ;;  %v833_v54 = vadd.f32 %v809_v37, %v761_v58  ;;  %v764_v17 = vld [vmem:[#allocation3 + $0x80] sm:$0xff]  ;;  %v765_v30 = vld [vmem:[#allocation3 + $0x88] sm:$0xff] }
 0x13d   : > { %v921_v21 = vsub.f32 1.0, %v1238_v45  ;;  %v993_v48 = vtrunc.f32 %v1238_v45  ;;  %v792_v56 = vsub.f32 %v744_v42, %v768_v44  ;;  %v739_v59 = vadd.f32 %v1617_v3, %v698_v7 }
 0x13e   : > { %1073 = vst [vmem:[%s1484_s11 + $0x8] sm:$0xff] %v1030_v60  ;;  %v738_v2 = vadd.f32 %v1627_v51, %v697_v16  ;;  %v699_v61 = vmul.f32 %v1615_v38, %v1672_v15  ;;  %vm856_vm8 = vcmp.ge.f32.partialorder %v832_v50, 1.0  ;;  %vm857_vm9 = vcmp.ge.f32.partialorder %v833_v54, 1.0 }
 0x13f   : > { %v945_v62 = vmul.f32 %v921_v21, %v825_v27  ;;  %v1032_v6 = vpack.c.f32.eXmY %v990_v47, %v993_v48, 312  ;;  %v1245_v1 = vsel %vm856_vm8, 1.0, %v1415_v53  ;;  %v1731_v4 = vsel %vm857_vm9, 1.0, %v1415_v53 }
 0x140   : > { %v816_v5 = vmul.f32 0.5, %v792_v56  ;;  %v787_v9 = vsub.f32 %v739_v59, %v763_v55  ;;  %v928_v11 = vsub.f32 1.0, %v1245_v1  ;;  %v1000_v14 = vtrunc.f32 %v1245_v1  ;;  %v769_v1 = vld [vmem:[#allocation3 + $0xa8] sm:$0xff] }
 0x141   : > { %969 = vst [vmem:[#allocation3 + $0x28] sm:$0xff] %v945_v62  ;;  %v1040_v10 = vpack.c.b8 %v1036_v8, %v1032_v6  ;;  %v929_v15 = vsub.f32 1.0, %v1731_v4  ;;  %v1001_v35 = vtrunc.f32 %v1731_v4  ;;  %v786_v0 = vsub.f32 %v738_v2, %v762_v39  ;;  %v770_v4 = vld [vmem:[#allocation3 + $0xb0] sm:$0xff] }
 0x142   : > { %v840_v47 = vadd.f32 %v816_v5, %v768_v44  ;;  %v811_v12 = vmul.f32 0.5, %v787_v9  ;;  %v952_v58 = vmul.f32 %v928_v11, %v832_v50  ;;  %v740_v18 = vadd.f32 %v1619_v40, %v699_v61 }
 0x143   : > { %1074 = vst [vmem:[%s1484_s11 + $0x10] sm:$0xff] %v1040_v10  ;;  %v953_v63 = vmul.f32 %v929_v15, %v833_v54  ;;  %v706_v19 = vmul.f32 %v1657_v46, %v1622_v43  ;;  %v810_v20 = vmul.f32 0.5, %v786_v0  ;;  %v700_v23 = vmul.f32 %v1622_v43, %v1660_v52  ;;  %v766_v54 = vld [vmem:[#allocation3 + $0x90] sm:$0xff] }
 0x144   : > { %vm864_vm10 = vcmp.ge.f32.partialorder %v840_v47, 1.0  ;;  %v835_v13 = vadd.f32 %v811_v12, %v763_v55  ;;  %976 = vst [vmem:[#allocation3 + $0x60] sm:$0xff] %v952_v58  ;;  %v788_v25 = vsub.f32 %v740_v18, %v764_v17  ;;  %v701_v27 = vmul.f32 %v1613_v36, %v1686_v33 }
 0x145   : > { %977 = vst [vmem:[#allocation3 + $0x68] sm:$0xff] %v953_v63  ;;  %v1253_v24 = vsel %vm864_vm10, 1.0, %v1415_v53  ;;  %v747_v26 = vadd.f32 %v1627_v51, %v706_v19  ;;  %v834_v46 = vadd.f32 %v810_v20, %v762_v39  ;;  %v741_v43 = vadd.f32 %v1627_v51, %v700_v23  ;;  %v767_v39 = vld [vmem:[#allocation3 + $0x98] sm:$0xff] }
 0x146   : > { %v936_v28 = vsub.f32 1.0, %v1253_v24  ;;  %v1008_v29 = vtrunc.f32 %v1253_v24  ;;  %vm859_vm11 = vcmp.ge.f32.partialorder %v835_v13, 1.0  ;;  %v812_v32 = vmul.f32 0.5, %v788_v25 }
 0x147   : > { %v1248_v31 = vsel %vm859_vm11, 1.0, %v1415_v53  ;;  %v795_v8 = vsub.f32 %v747_v26, %v771_v22  ;;  %vm858_vm12 = vcmp.ge.f32.partialorder %v834_v46, 1.0  ;;  %v789_v33 = vsub.f32 %v741_v43, %v765_v30 }
 0x148   : > { %v960_v52 = vmul.f32 %v936_v28, %v840_v47  ;;  %v931_v34 = vsub.f32 1.0, %v1248_v31  ;;  %v1003_v37 = vtrunc.f32 %v1248_v31  ;;  %v1247_v42 = vsel %vm858_vm12, 1.0, %v1415_v53 }
 0x149   : > { %v836_v44 = vadd.f32 %v812_v32, %v764_v17  ;;  %v819_v60 = vmul.f32 0.5, %v795_v8  ;;  %v930_v16 = vsub.f32 1.0, %v1247_v42  ;;  %v1002_v21 = vtrunc.f32 %v1247_v42 }
 0x14a   : > { %984 = vst [vmem:[#allocation3 + $0xa0] sm:$0xff] %v960_v52  ;;  %v955_v45 = vmul.f32 %v931_v34, %v835_v13  ;;  %v1748_v7 = vpack.c.f32.eXmY %v1000_v14, %v1003_v37, 312  ;;  %v813_v50 = vmul.f32 0.5, %v789_v33  ;;  %v742_v51 = vadd.f32 %v1617_v3, %v701_v27 }
 0x14b   : > { %vm860_vm13 = vcmp.ge.f32.partialorder %v836_v44, 1.0  ;;  %v843_v48 = vadd.f32 %v819_v60, %v771_v22  ;;  %v954_v55 = vmul.f32 %v930_v16, %v834_v46  ;;  %v702_v59 = vmul.f32 %v1615_v38, %v1691_v41 }
 0x14c   : > { %979 = vst [vmem:[#allocation3 + $0x78] sm:$0xff] %v955_v45  ;;  %v1249_v56 = vsel %vm860_vm13, 1.0, %v1415_v53  ;;  %v704_v2 = vmul.f32 %v1613_v36, %v1695_v49  ;;  %v837_v6 = vadd.f32 %v813_v50, %v765_v30  ;;  %v790_v9 = vsub.f32 %v742_v51, %v766_v54 }
 0x14d   : > { %v932_v61 = vsub.f32 1.0, %v1249_v56  ;;  %v1004_v62 = vtrunc.f32 %v1249_v56  ;;  %vm867_vm14 = vcmp.ge.f32.partialorder %v843_v48, 1.0  ;;  %978 = vst [vmem:[#allocation3 + $0x70] sm:$0xff] %v954_v55  ;;  %v743_v10 = vadd.f32 %v1619_v40, %v702_v59 }
 0x14e   : > { %v1256_v5 = vsel %vm867_vm14, 1.0, %v1415_v53  ;;  %v745_v11 = vadd.f32 %v1617_v3, %v704_v2  ;;  %vm861_vm15 = vcmp.ge.f32.partialorder %v837_v6, 1.0  ;;  %v814_v49 = vmul.f32 0.5, %v790_v9 }
 0x14f   : > { %v956_v14 = vmul.f32 %v932_v61, %v836_v44  ;;  %v1052_v41 = vpack.c.f32.eXmY %v1001_v35, %v1004_v62, 312  ;;  %v939_v15 = vsub.f32 1.0, %v1256_v5  ;;  %v1011_v36 = vtrunc.f32 %v1256_v5 }
 0x150   : > { %v791_v47 = vsub.f32 %v743_v10, %v767_v39  ;;  %v793_v12 = vsub.f32 %v745_v11, %v769_v1  ;;  %v1250_v58 = vsel %vm861_vm15, 1.0, %v1415_v53  ;;  %v705_v63 = vmul.f32 %v1615_v38, %v1699_v57 }
 0x151   : > { %980 = vst [vmem:[#allocation3 + $0x80] sm:$0xff] %v956_v14  ;;  %v963_v0 = vmul.f32 %v939_v15, %v843_v48  ;;  %v1066_v17 = vpack.c.f32.eXmY %v1008_v29, %v1011_v36, 312  ;;  %v933_v18 = vsub.f32 1.0, %v1250_v58  ;;  %v1005_v3 = vtrunc.f32 %v1250_v58 }
 0x152   : > { %v838_v19 = vadd.f32 %v814_v49, %v766_v54  ;;  %v815_v13 = vmul.f32 0.5, %v791_v47  ;;  %v817_v35 = vmul.f32 0.5, %v793_v12  ;;  %v746_v20 = vadd.f32 %v1619_v40, %v705_v63 }
 0x153   : > { %987 = vst [vmem:[#allocation3 + $0xb8] sm:$0xff] %v963_v0  ;;  %v957_v22 = vmul.f32 %v933_v18, %v837_v6  ;;  %v1062_v23 = vpack.c.f32.eXmY %v1002_v21, %v1005_v3, 312 }
 0x154   : > { %vm862_vm0 = vcmp.ge.f32.partialorder %v838_v19, 1.0  ;;  %v839_v24 = vadd.f32 %v815_v13, %v767_v39  ;;  %v841_v26 = vadd.f32 %v817_v35, %v769_v1  ;;  %v794_v27 = vsub.f32 %v746_v20, %v770_v4 }
 0x155   : > { %v1251_v25 = vsel %vm862_vm0, 1.0, %v1415_v53  ;;  %981 = vst [vmem:[#allocation3 + $0x88] sm:$0xff] %v957_v22  ;;  %v1070_v38 = vpack.c.b8 %v1066_v17, %v1062_v23 }
 0x156   : > { %v934_v57 = vsub.f32 1.0, %v1251_v25  ;;  %vm863_vm1 = vcmp.ge.f32.partialorder %v839_v24, 1.0  ;;  %vm865_vm2 = vcmp.ge.f32.partialorder %v841_v26, 1.0  ;;  %v818_v29 = vmul.f32 0.5, %v794_v27 }
 0x157   : > { %v1252_v28 = vsel %vm863_vm1, 1.0, %v1415_v53  ;;  %1077 = vst [vmem:[%s1484_s11 + $0x28] sm:$0xff] %v1070_v38  ;;  %v1254_v40 = vsel %vm865_vm2, 1.0, %v1415_v53  ;;  %v1006_v31 = vtrunc.f32 %v1251_v25 }
 0x158   : > { %v958_v46 = vmul.f32 %v934_v57, %v838_v19  ;;  %v935_v30 = vsub.f32 1.0, %v1252_v28  ;;  %v937_v32 = vsub.f32 1.0, %v1254_v40  ;;  %v1009_v8 = vtrunc.f32 %v1254_v40 }
 0x159   : > { %v842_v43 = vadd.f32 %v818_v29, %v770_v4  ;;  %v1007_v44 = vtrunc.f32 %v1252_v28 }
 0x15a   : > { %982 = vst [vmem:[#allocation3 + $0x90] sm:$0xff] %v958_v46  ;;  %v959_v52 = vmul.f32 %v935_v30, %v839_v24  ;;  %v961_v34 = vmul.f32 %v937_v32, %v841_v26  ;;  %v1046_v37 = vpack.c.f32.eXmY %v1006_v31, %v1009_v8, 312 }
 0x15b   : > { %vm866_vm3 = vcmp.ge.f32.partialorder %v842_v43, 1.0 }
 0x15c   : > { %983 = vst [vmem:[#allocation3 + $0x98] sm:$0xff] %v959_v52  ;;  %v1255_v42 = vsel %vm866_vm3, 1.0, %v1415_v53  ;;  %985 = vst [vmem:[#allocation3 + $0xa8] sm:$0xff] %v961_v34  ;;  %v1050_v60 = vpack.c.b8 %v1046_v37, %v1748_v7 }
 0x15d   : > { %v938_v33 = vsub.f32 1.0, %v1255_v42  ;;  %v1010_v45 = vtrunc.f32 %v1255_v42 }
 0x15e   : > { %1075 = vst [vmem:[%s1484_s11 + $0x18] sm:$0xff] %v1050_v60 }
 0x15f   : > { %v962_v16 = vmul.f32 %v938_v33, %v842_v43  ;;  %v1056_v21 = vpack.c.f32.eXmY %v1007_v44, %v1010_v45, 312 }
 0x161   : > { %986 = vst [vmem:[#allocation3 + $0xb0] sm:$0xff] %v962_v16  ;;  %v1060_v48 = vpack.c.b8 %v1056_v21, %v1052_v41 }
 0x163   : > { %1076 = vst [vmem:[%s1484_s11 + $0x20] sm:$0xff] %v1060_v48 }
 0x164 PF: > { %s14_s19 = sadd.s32 1, %s1411_s19   ;;  %s1795_s15 = smov %s1403_s17 }
 0x165   : > { %p11_p9 = scmp.ge.s32.totalorder %s14_s19, 10   ;;  %s1796_s16 = smov %s1407_s18 }
 0x166   : > { %s1797_s17 = smov %s1800_s20  ;;  %s1798_s18 = smov %s1804_s21 }
 0x167   :  { %13 = sbr.rel (!%p11_p9) target bundleno = 3 (0x3), region = 70 }

// kernel: ms_block_conv_forward.4
= control target key start
LH: loop header
LB: loop body
LE: loop exit
PB: predicated region body
PF: predicated region fallthrough
CT: control target
= control target key end

     0   :  { %s1809_s21 = smov 0   ;;  %s1811_s22 = smov 0   ;;  %s2200_s0 = inlined_call_operand.vmem [shape: s8[4,128,384], index: 0, kind: input, shape index: {}]   ;;  %s2201_s1 = inlined_call_operand.vmem [shape: f32[4,128,128], index: 1, kind: input, shape index: {}]   ;;  %s2202_s2 = inlined_call_operand.vmem [shape: f32[128,128], index: 2, kind: input, shape index: {}]   ;;  %s2203_s3 = inlined_call_operand.vmem [shape: bf16[128,128], index: 3, kind: input, shape index: {}]   ;;  %s2204_s4 = inlined_call_operand.vmem [shape: f32[1,128], index: 4, kind: input, shape index: {}]   ;;  %s2205_s5 = inlined_call_operand.vmem [shape: f32[1,128], index: 5, kind: input, shape index: {}]   ;;  %s2206_s6 = inlined_call_operand.vmem [shape: f32[4,128,128], index: 6, kind: output, shape index: {}]  }
   0x1   :  { %s1813_s23 = smov 0   ;;  %s1815_s24 = smov 0  }
   0x2   :  { %s1817_s25 = smov 0   ;;  %s1819_s26 = smov 0  }
   0x3   :  { %s1821_s27 = smov 0  }
   0x4 LB: > { %s25_s28 = sadd.s32 1, %s1761_s25  ;;  %s28_s29 = sadd.s32 1, %s1765_s26  ;;  %s1769_s27 = sphi %s1821_s27, %s16_s27   ;;  %s1765_s26 = sphi %s1819_s26, %s2218_s26   ;;  %s1761_s25 = sphi %s1817_s25, %s2217_s25   ;;  %s1757_s24 = sphi %s1815_s24, %s2216_s24   ;;  %s1753_s23 = sphi %s1813_s23, %s2215_s23   ;;  %s1749_s22 = sphi %s1811_s22, %s2214_s22   ;;  %s1745_s21 = sphi %s1809_s21, %s2213_s21  }
   0x5   : > { %p26_p0 = scmp.ge.s32.totalorder %s25_s28, 2  ;;  %s1391_s30 = sadd.s32 4294967295, %s1769_s27  }
   0x6   : > { %p44_p1 = scmp.ne.s32.totalorder %s1749_s22, %s1745_s21  ;;  %p45_p2 = scmp.eq.s32.totalorder %s1769_s27, 0 }
   0x7   : > { %s2220_s28 = smov (%p26_p0, %s25_s28), 0  ;;  %s2222_s29 = smov (!%p26_p0, %s28_s29), %s1765_s26 }
   0x8   : > { %p30_p3 = scmp.ge.s32.totalorder %s2222_s29, 2  ;;  %p188_p4 = scmp.eq.s32.totalorder %s1391_s30, 3 }
   0x9   : > { %s32_s7 = ssub.s32 %s1761_s25, %s2220_s28  ;;  %p1855_p5 = por %p45_p2, %p44_p1 }
   0xa   : > { %s2224_s29 = smov (%p30_p3, %s2222_s29), 0  ;;  %p1861_p6 = por %p188_p4, %p44_p1 }
   0xb   : > { %s33_s10 = ssub.s32 %s1765_s26, %s2224_s29  ;;  %s37_s12 = sadd.s32 1, %s1749_s22 }
   0xc   : > { %s34_s11 = sor.u32 %s33_s10, %s32_s7  ;;  %p1394_p8 = scmp.ge.s32.totalorder %s1769_s27, 4 }
   0xd   : > { %p35_p7 = scmp.eq.s32.totalorder %s34_s11, 0 }
   0xe   : > { %222 = sbr.rel (%p1394_p8) target bundleno = 51 (0x33), region = 32 }
   0xf   : > { %s1869_s13 = scalar_select %p35_p7, %s1749_s22, %s37_s12  }
  0x15   : > { %225 = sbr.rel (!%p1855_p5) target bundleno = 36 (0x24), region = 36  ;;  %s227_s14 = sand.u32 (%p1855_p5), 1, %s1749_s22  }
  0x16   : > { %s1645_s15 = smul.u32 (%p1855_p5), 6, %s1765_s26 }
  0x17   : > { %s1644_s16 = smul.u32 (%p1855_p5), 96, %s227_s14 }
  0x18   : > { %s1646_s17 = smul.u32 (%p1855_p5), 24, %s1761_s25 }
  0x19   : > { %s229_s10 = scalar_lea.vmem (%p1855_p5), [#allocation3], %s1644_s16 }
  0x1a   : > { %s234_s18 = sadd.s32 (%p1855_p5), %s1646_s17, %s1645_s15 }
  0x1b   : > { %s1399_s19 = sshll.u32 (%p1855_p5), %s234_s18, 3 }
  0x1c   : > { %s236_s7 = scalar_lea.vmem %s2200_s0, %s1399_s19 }
  0x1d   : > { %v249_v0 = vld [vmem:[%s236_s7] sm:$0xff]  ;;  %v251_v1 = vld [vmem:[%s236_s7 + $0x8] sm:$0xff]  ;;  %v253_v2 = vld [vmem:[%s236_s7 + $0x10] sm:$0xff] }
  0x1e   : > { %250 = vst [vmem:[%s229_s10] sm:$0xff] %v249_v0  ;;  %252 = vst [vmem:[%s229_s10 + $0x8] sm:$0xff] %v251_v1  ;;  %v255_v3 = vld [vmem:[%s236_s7 + $0x18] sm:$0xff]  ;;  %v257_v4 = vld [vmem:[%s236_s7 + $0x20] sm:$0xff] }
  0x1f   : > { %254 = vst [vmem:[%s229_s10 + $0x10] sm:$0xff] %v253_v2  ;;  %v259_v5 = vld [vmem:[%s236_s7 + $0x28] sm:$0xff]  ;;  %256 = vst [vmem:[%s229_s10 + $0x18] sm:$0xff] %v255_v3  ;;  %v261_v6 = vld [vmem:[%s236_s7 + $0x60] sm:$0xff] }
  0x20   : > { %258 = vst [vmem:[%s229_s10 + $0x20] sm:$0xff] %v257_v4  ;;  %260 = vst [vmem:[%s229_s10 + $0x28] sm:$0xff] %v259_v5  ;;  %v263_v7 = vld [vmem:[%s236_s7 + $0x68] sm:$0xff]  ;;  %v265_v8 = vld [vmem:[%s236_s7 + $0x70] sm:$0xff] }
  0x21   : > { %262 = vst [vmem:[%s229_s10 + $0x30] sm:$0xff] %v261_v6  ;;  %264 = vst [vmem:[%s229_s10 + $0x38] sm:$0xff] %v263_v7  ;;  %v267_v9 = vld [vmem:[%s236_s7 + $0x78] sm:$0xff]  ;;  %v269_v10 = vld [vmem:[%s236_s7 + $0x80] sm:$0xff] }
  0x22   : > { %266 = vst [vmem:[%s229_s10 + $0x40] sm:$0xff] %v265_v8  ;;  %v271_v11 = vld [vmem:[%s236_s7 + $0x88] sm:$0xff]  ;;  %268 = vst [vmem:[%s229_s10 + $0x48] sm:$0xff] %v267_v9 }
  0x23   : > { %270 = vst [vmem:[%s229_s10 + $0x50] sm:$0xff] %v269_v10  ;;  %272 = vst [vmem:[%s229_s10 + $0x58] sm:$0xff] %v271_v11 }
  0x24 PF: > { %278 = sbr.rel (!%p1855_p5) target bundleno = 51 (0x33), region = 59  ;;  %s280_s11 = sand.u32 (%p1855_p5), 1, %s1749_s22  }
  0x25   : > { %s1402_s12 = sshll.u32 (%p1855_p5), %s1765_s26, 3  ;;  %s1400_s14 = sshll.u32 (%p1855_p5), %s280_s11, 7 }
  0x26   : > { %s1474_s15 = sshll.u32 (%p1855_p5), %s1761_s25, 5  ;;  %s282_s8 = scalar_lea.vmem (%p1855_p5), [#allocation4], %s1400_s14 }
  0x27   : > { %s286_s16 = sadd.s32 (%p1855_p5), %s1474_s15, %s1402_s12 }
  0x28   : > { %s1404_s17 = sshll.u32 (%p1855_p5), %s286_s16, 3 }
  0x29   : > { %s1888_s20 = scalar_lea.vmem (%p1855_p5), %s2201_s1, %s1404_s17 }
  0x2a   : > { %v346_v12 = vld [vmem:[%s1888_s20] sm:$0xff] (%p1855_p5)  ;;  %v348_v13 = vld [vmem:[%s1888_s20 + $0x8] sm:$0xff] (%p1855_p5)  ;;  %v350_v14 = vld [vmem:[%s1888_s20 + $0x10] sm:$0xff] (%p1855_p5) }
  0x2b   : > { %347 = vst [vmem:[%s282_s8] sm:$0xff] %v346_v12  ;;  %349 = vst [vmem:[%s282_s8 + $0x8] sm:$0xff] %v348_v13  ;;  %v352_v15 = vld [vmem:[%s1888_s20 + $0x18] sm:$0xff]  ;;  %v354_v16 = vld [vmem:[%s1888_s20 + $0x20] sm:$0xff] }
  0x2c   : > { %351 = vst [vmem:[%s282_s8 + $0x10] sm:$0xff] %v350_v14  ;;  %v356_v17 = vld [vmem:[%s1888_s20 + $0x28] sm:$0xff]  ;;  %353 = vst [vmem:[%s282_s8 + $0x18] sm:$0xff] %v352_v15  ;;  %v358_v18 = vld [vmem:[%s1888_s20 + $0x30] sm:$0xff] }
  0x2d   : > { %355 = vst [vmem:[%s282_s8 + $0x20] sm:$0xff] %v354_v16  ;;  %357 = vst [vmem:[%s282_s8 + $0x28] sm:$0xff] %v356_v17  ;;  %v360_v19 = vld [vmem:[%s1888_s20 + $0x38] sm:$0xff]  ;;  %v362_v20 = vld [vmem:[%s1888_s20 + $0x80] sm:$0xff] }
  0x2e   : > { %359 = vst [vmem:[%s282_s8 + $0x30] sm:$0xff] %v358_v18  ;;  %361 = vst [vmem:[%s282_s8 + $0x38] sm:$0xff] %v360_v19  ;;  %v364_v21 = vld [vmem:[%s1888_s20 + $0x88] sm:$0xff]  ;;  %v366_v22 = vld [vmem:[%s1888_s20 + $0x90] sm:$0xff] }
  0x2f   : > { %363 = vst [vmem:[%s282_s8 + $0x40] sm:$0xff] %v362_v20  ;;  %v368_v23 = vld [vmem:[%s1888_s20 + $0x98] sm:$0xff]  ;;  %365 = vst [vmem:[%s282_s8 + $0x48] sm:$0xff] %v364_v21  ;;  %v370_v24 = vld [vmem:[%s1888_s20 + $0xa0] sm:$0xff] }
  0x30   : > { %367 = vst [vmem:[%s282_s8 + $0x50] sm:$0xff] %v366_v22  ;;  %369 = vst [vmem:[%s282_s8 + $0x58] sm:$0xff] %v368_v23  ;;  %v372_v25 = vld [vmem:[%s1888_s20 + $0xa8] sm:$0xff]  ;;  %v374_v26 = vld [vmem:[%s1888_s20 + $0xb0] sm:$0xff] }
  0x31   : > { %371 = vst [vmem:[%s282_s8 + $0x60] sm:$0xff] %v370_v24  ;;  %373 = vst [vmem:[%s282_s8 + $0x68] sm:$0xff] %v372_v25  ;;  %v376_v27 = vld [vmem:[%s1888_s20 + $0xb8] sm:$0xff] }
  0x32   : > { %375 = vst [vmem:[%s282_s8 + $0x70] sm:$0xff] %v374_v26  ;;  %377 = vst [vmem:[%s282_s8 + $0x78] sm:$0xff] %v376_v27 }
  0x33 PF: > { %p1405_p9 = scmp.ge.s32.totalorder %s1769_s27, 1  ;;  %p382_p10 = scmp.lt.s32.totalorder %s1769_s27, 5 }
  0x35   : > { %p383_p11 = pnand %p1405_p9, %p382_p10 }
  0x36   : > { %s389_s30 = sand.u32 (!%p383_p11), 1, %s1745_s21   ;;  %p1408_p12 = scmp.ne.s32.totalorder (!%p383_p11), %s1753_s23, 0 }
  0x37   : > { %386 = sbr.rel (%p383_p11) target bundleno = 908 (0x38c), region = 97  ;;  %s1406_s10 = sshll.u32 (!%p383_p11), %s389_s30, 7 }
  0x38   : > { %s1647_s7 = smul.u32 (!%p383_p11), 96, %s389_s30  ;;  %s1911_s12 = scalar_lea.vmem (!%p383_p11), [#allocation4], %s1406_s10 }
  0x39   : > { %s1913_s14 = scalar_lea.vmem (!%p383_p11), [#allocation5], %s1406_s10 }
  0x3a   : > { %s1909_s11 = scalar_lea.vmem (!%p383_p11), [#allocation3], %s1647_s7 }
  0x3e   : > { %438 = sbr.rel (%p1408_p12) target bundleno = 69 (0x45), region = 109  ;;  %v1771_v28 = vmov (!%p1408_p12), 0.0  }
  0x3f   : > { %439 = vst [vmem:[#allocation2] sm:$0xff] (!%p1408_p12), %v1771_v28  ;;  %440 = vst [vmem:[#allocation2 + $0x8] sm:$0xff] (!%p1408_p12), %v1771_v28 }
  0x40   : > { %441 = vst [vmem:[#allocation2 + $0x10] sm:$0xff] (!%p1408_p12), %v1771_v28  ;;  %442 = vst [vmem:[#allocation2 + $0x18] sm:$0xff] (!%p1408_p12), %v1771_v28 }
  0x41   : > { %443 = vst [vmem:[#allocation2 + $0x20] sm:$0xff] (!%p1408_p12), %v1771_v28  ;;  %444 = vst [vmem:[#allocation2 + $0x28] sm:$0xff] (!%p1408_p12), %v1771_v28 }
  0x42   : > { %445 = vst [vmem:[#allocation2 + $0x30] sm:$0xff] (!%p1408_p12), %v1771_v28  ;;  %446 = vst [vmem:[#allocation2 + $0x38] sm:$0xff] (!%p1408_p12), %v1771_v28 }
  0x45 PF: > { %v448_v29 = vld [vmem:[%s1909_s11 + $0x8] sm:$0xff]  ;;  %v449_v31 = vld [vmem:[%s1909_s11 + $0x10] sm:$0xff]  ;;  %v451_v32 = vld [vmem:[%s1909_s11 + $0x20] sm:$0xff]  ;;  %s1475_s8 = sshll.u32 (%p1861_p6), %s1753_s23, 5 }
  0x46   : > { %v460_v30 = vunpack.c.l.s8.bf16 %v448_v29  ;;  %v452_v33 = vld [vmem:[%s1909_s11 + $0x28] sm:$0xff]  ;;  %v463_v34 = vunpack.c.h.s8.bf16 %v448_v29  ;;  %v461_v35 = vunpack.c.l.s8.bf16 %v449_v31  ;;  %v464_v36 = vunpack.c.h.s8.bf16 %v449_v31  ;;  %v454_v41 = vld [vmem:[%s1909_s11 + $0x38] sm:$0xff]  ;;  %v455_v42 = vld [vmem:[%s1909_s11 + $0x40] sm:$0xff] }
  0x47   : > { %v466_v37 = vunpack.c.l.s8.bf16 %v451_v32  ;;  %v467_v38 = vunpack.c.l.s8.bf16 %v452_v33  ;;  %v469_v39 = vunpack.c.h.s8.bf16 %v451_v32  ;;  %v470_v40 = vunpack.c.h.s8.bf16 %v452_v33  ;;  %v457_v47 = vld [vmem:[%s1909_s11 + $0x50] sm:$0xff]  ;;  %v458_v48 = vld [vmem:[%s1909_s11 + $0x58] sm:$0xff]  ;;  %v1925_v61 = vld [vmem:[%s1909_s11] sm:$0xff] }
  0x48   : > { %483 = vxpose.xlu0.c.b16.start [1/8] %v460_v30, 128  ;;  %1532 = vmatprep.subr.bf16.mxu0 %v461_v35  ;;  %v472_v43 = vunpack.c.l.s8.bf16 %v454_v41  ;;  %v473_v44 = vunpack.c.l.s8.bf16 %v455_v42  ;;  %v475_v45 = vunpack.c.h.s8.bf16 %v454_v41  ;;  %v476_v46 = vunpack.c.h.s8.bf16 %v455_v42  ;;  %v1931_v63 = vld [vmem:[%s2203_s3] sm:$0xff]   ;;  %v1936_v0 = vld [vmem:[%s2203_s3 + $0x8] sm:$0xff]   ;;  %v1944_v1 = vld [vmem:[%s2203_s3 + $0x10] sm:$0xff]  }
  0x49   : > { %1533 = vmatpush3.bf16.msra.mxu0 %v461_v35  ;;  %v478_v49 = vunpack.c.l.s8.bf16 %v457_v47  ;;  %v479_v50 = vunpack.c.l.s8.bf16 %v458_v48  ;;  %v481_v51 = vunpack.c.h.s8.bf16 %v457_v47  ;;  %v482_v52 = vunpack.c.h.s8.bf16 %v458_v48  ;;  %v1951_v2 = vld [vmem:[%s2203_s3 + $0x18] sm:$0xff]   ;;  %v1958_v3 = vld [vmem:[%s2203_s3 + $0x20] sm:$0xff]   ;;  %v598_v5 = vld [vmem:[%s2202_s2 + $0x10] sm:$0xff] }
  0x4a   : > { %1534 = vmatprep.subr.bf16.mxu0 %v464_v36  ;;  %v459_v62 = vunpack.c.l.s8.bf16 %v1925_v61  ;;  %v599_v6 = vld [vmem:[%s2202_s2 + $0x18] sm:$0xff]  ;;  %v596_v8 = vld [vmem:[%s2202_s2] sm:$0xff]  ;;  %v597_v9 = vld [vmem:[%s2202_s2 + $0x8] sm:$0xff] }
  0x4b   : > { %v602_v19 = vld [vmem:[%s2202_s2 + $0x30] sm:$0xff]  ;;  %v603_v20 = vld [vmem:[%s2202_s2 + $0x38] sm:$0xff]  ;;  %v600_v22 = vld [vmem:[%s2202_s2 + $0x20] sm:$0xff] }
  0x4c   : > { %484 = vxpose.xlu0.c.b16.cont [2/8] %v463_v34, 128  ;;  %1580 = vmatprep.mubr.bf16.mxu1 %v459_v62  ;;  %v601_v23 = vld [vmem:[%s2202_s2 + $0x28] sm:$0xff]  ;;  %v606_v33 = vld [vmem:[%s2202_s2 + $0x50] sm:$0xff]  ;;  %v607_v34 = vld [vmem:[%s2202_s2 + $0x58] sm:$0xff]  ;;  %v462_v62 = vunpack.c.h.s8.bf16 %v1925_v61 }
  0x4d   : > { %1535 = vmatpush3.bf16.msra.mxu0 %v464_v36  ;;  %v604_v36 = vld [vmem:[%s2202_s2 + $0x40] sm:$0xff]  ;;  %v610_v47 = vld [vmem:[%s2202_s2 + $0x70] sm:$0xff]  ;;  %v611_v48 = vld [vmem:[%s2202_s2 + $0x78] sm:$0xff] }
  0x4e   : > { %1536 = vmatprep.subr.bf16.mxu0 %v467_v38  ;;  %v456_v61 = vld [vmem:[%s1909_s11 + $0x48] sm:$0xff] }
  0x50   : > { %485 = vxpose.xlu0.c.b16.cont [3/8] %v466_v37, 128  ;;  %v605_v37 = vld [vmem:[%s2202_s2 + $0x48] sm:$0xff] }
  0x51   : > { %1537 = vmatpush3.bf16.msra.mxu0 %v467_v38 }
  0x52   : > { %1538 = vmatprep.subr.bf16.mxu0 %v470_v40 }
  0x54   : > { %486 = vxpose.xlu0.c.b16.cont [4/8] %v469_v39, 128 }
  0x55   : > { %1539 = vmatpush3.bf16.msra.mxu0 %v470_v40 }
  0x56   : > { %1540 = vmatprep.subr.bf16.mxu0 %v473_v44 }
  0x58   : > { %487 = vxpose.xlu0.c.b16.cont [5/8] %v472_v43, 128 }
  0x59   : > { %1541 = vmatpush3.bf16.msra.mxu0 %v473_v44 }
  0x5a   : > { %1542 = vmatprep.subr.bf16.mxu0 %v476_v46 }
  0x5c   : > { %488 = vxpose.xlu0.c.b16.cont [6/8] %v475_v45, 128 }
  0x5d   : > { %1543 = vmatpush3.bf16.msra.mxu0 %v476_v46 }
  0x5e   : > { %1544 = vmatprep.subr.bf16.mxu0 %v479_v50 }
  0x60   : > { %489 = vxpose.xlu0.c.b16.cont [7/8] %v478_v49, 128 }
  0x61   : > { %1545 = vmatpush3.bf16.msra.mxu0 %v479_v50  ;;  %v608_v50 = vld [vmem:[%s2202_s2 + $0x60] sm:$0xff] }
  0x62   : > { %1546 = vmatprep.subr.bf16.mxu0 %v482_v52 }
  0x64   : > { %490 = vxpose.xlu0.c.b16.end [8/8] %v481_v51, 128  ;;  %v609_v51 = vld [vmem:[%s2202_s2 + $0x68] sm:$0xff] }
  0x65   : > { %1547 = vmatpush3.bf16.msra.mxu0 %v482_v52 }
  0x66   : > { %1596 = vmatprep.subr.bf16.mxu0 %v1931_v63 }
  0xae   : > { %v491_v53 = vpop.trf.xlu0 }
  0xaf   : > { %1548 = vmatprep.mubr.bf16.mxu0 %v491_v53 }
  0xb2   : > { %v492_v54 = vpop.trf.xlu0 }
  0xb3   : > { %1549 = vmatmul.mubr.bf16.vlgmr.msra.gmra.mrb[0].mxu0 %v492_v54 }
  0xb4   : > { %1597 = vmatpush3.bf16.msra.mxu0 %v1931_v63 }
  0xb5   : > { %1598 = vmatprep.subr.bf16.mxu0 %v1936_v0 }
  0xb6   : > { %v493_v55 = vpop.trf.xlu0 }
  0xb7   : > { %1552 = vmatprep.mubr.bf16.mxu0 %v493_v55 }
  0xb8   : > { %1599 = vmatpush3.bf16.msra.mxu0 %v1936_v0 }
  0xb9   : > { %1600 = vmatprep.subr.bf16.mxu0 %v1944_v1 }
  0xba   : > { %v494_v56 = vpop.trf.xlu0 }
  0xbb   : > { %1553 = vmatmul.mubr.bf16.gmra.mrb[4].mxu0 %v494_v56 }
  0xbc   : > { %1601 = vmatpush3.bf16.msra.mxu0 %v1944_v1 }
  0xbd   : > { %1602 = vmatprep.subr.bf16.mxu0 %v1951_v2 }
  0xbe   : > { %v495_v57 = vpop.trf.xlu0 }
  0xbf   : > { %1556 = vmatprep.mubr.bf16.mxu0 %v495_v57 }
  0xc0   : > { %1603 = vmatpush3.bf16.msra.mxu0 %v1951_v2 }
  0xc1   : > { %1604 = vmatprep.subr.bf16.mxu0 %v1958_v3 }
  0xc2   : > { %v496_v58 = vpop.trf.xlu0 }
  0xc3   : > { %1557 = vmatmul.mubr.bf16.gmra.mrb[8].mxu0 %v496_v58 }
  0xc4   : > { %1605 = vmatpush3.bf16.msra.mxu0 %v1958_v3 }
  0xc6   : > { %v497_v59 = vpop.trf.xlu0 }
  0xc7   : > { %1560 = vmatprep.mubr.bf16.mxu0 %v497_v59 }
  0xca   : > { %v498_v60 = vpop.trf.xlu0 }
  0xcb   : > { %1561 = vmatmul.mubr.bf16.gmra.mrb[12].mxu0 %v498_v60  ;;  %v450_v60 = vld [vmem:[%s1909_s11 + $0x18] sm:$0xff] }
 0x186   : > { %v1550_v4 = vpop.f32.mrb[0].mxu0 }
 0x187   : > { %v533_v7 = vpop.f32.mrb[1].mxu0  ;;  %v614_v11 = vmul.f32 %v1550_v4, %v598_v5  ;;  %v465_v4 = vunpack.c.l.s8.bf16 %v450_v60  ;;  %v453_v5 = vld [vmem:[%s1909_s11 + $0x30] sm:$0xff] }
 0x188   : > { %v1551_v10 = vpop.f32.mrb[2].mxu0  ;;  %v612_v14 = vmul.f32 %v596_v8, %v533_v7  ;;  %v471_v7 = vunpack.c.l.s8.bf16 %v453_v5  ;;  %v474_v8 = vunpack.c.h.s8.bf16 %v453_v5 }
 0x189   : > { %v615_v12 = vmul.f32 %v1551_v10, %v599_v6  ;;  %v536_v13 = vpop.f32.mrb[3].mxu0  ;;  %v468_v6 = vunpack.c.h.s8.bf16 %v450_v60  ;;  %v751_v10 = vld [vmem:[#allocation2] sm:$0xff] }
 0x18a   : > { %v613_v15 = vmul.f32 %v597_v9, %v536_v13  ;;  %v477_v9 = vunpack.c.l.s8.bf16 %v456_v61 }
 0x18b   : > { %v629_v16 = vpack.c.bf16 %v615_v12, %v614_v11  ;;  %v754_v12 = vld [vmem:[#allocation2 + $0x18] sm:$0xff] }
 0x18c   : > { %v628_v17 = vpack.c.bf16 %v613_v15, %v612_v14  ;;  %v752_v15 = vld [vmem:[#allocation2 + $0x8] sm:$0xff] }
 0x18e   : > { %v1554_v18 = vpop.f32.mrb[4].mxu0  ;;  %1564 = vmatprep.subr.bf16.mxu1 %v628_v17 }
 0x18f   : > { %v549_v21 = vpop.f32.mrb[5].mxu0  ;;  %1565 = vmatpush3.bf16.msra.mxu1 %v628_v17  ;;  %v618_v25 = vmul.f32 %v1554_v18, %v602_v19 }
 0x190   : > { %v1555_v24 = vpop.f32.mrb[6].mxu0  ;;  %1566 = vmatprep.subr.bf16.mxu1 %v629_v16  ;;  %v616_v28 = vmul.f32 %v600_v22, %v549_v21 }
 0x191   : > { %v619_v26 = vmul.f32 %v1555_v24, %v603_v20  ;;  %v552_v27 = vpop.f32.mrb[7].mxu0 }
 0x192   : > { %v617_v29 = vmul.f32 %v601_v23, %v552_v27  ;;  %v757_v27 = vld [vmem:[#allocation2 + $0x30] sm:$0xff] }
 0x193   : > { %v631_v30 = vpack.c.bf16 %v619_v26, %v618_v25  ;;  %1567 = vmatpush3.bf16.msra.mxu1 %v629_v16 }
 0x194   : > { %v630_v31 = vpack.c.bf16 %v617_v29, %v616_v28  ;;  %v755_v29 = vld [vmem:[#allocation2 + $0x20] sm:$0xff] }
 0x196   : > { %v1558_v32 = vpop.f32.mrb[8].mxu0  ;;  %1568 = vmatprep.subr.bf16.mxu1 %v630_v31 }
 0x197   : > { %v565_v35 = vpop.f32.mrb[9].mxu0  ;;  %1569 = vmatpush3.bf16.msra.mxu1 %v630_v31  ;;  %v622_v39 = vmul.f32 %v1558_v32, %v606_v33 }
 0x198   : > { %v1559_v38 = vpop.f32.mrb[10].mxu0  ;;  %1570 = vmatprep.subr.bf16.mxu1 %v631_v30  ;;  %v620_v42 = vmul.f32 %v604_v36, %v565_v35 }
 0x199   : > { %v623_v40 = vmul.f32 %v1559_v38, %v607_v34  ;;  %v568_v41 = vpop.f32.mrb[11].mxu0  ;;  %v758_v34 = vld [vmem:[#allocation2 + $0x38] sm:$0xff] }
 0x19a   : > { %v621_v43 = vmul.f32 %v605_v37, %v568_v41  ;;  %v756_v37 = vld [vmem:[#allocation2 + $0x28] sm:$0xff] }
 0x19b   : > { %v633_v44 = vpack.c.bf16 %v623_v40, %v622_v39  ;;  %1571 = vmatpush3.bf16.msra.mxu1 %v631_v30  ;;  %v1772_v30 = vmov 0.0  }
 0x19c   : > { %v632_v45 = vpack.c.bf16 %v621_v43, %v620_v42 }
 0x19e   : > { %v1562_v46 = vpop.f32.mrb[12].mxu0  ;;  %1572 = vmatprep.subr.bf16.mxu1 %v632_v45 }
 0x19f   : > { %v581_v49 = vpop.f32.mrb[13].mxu0  ;;  %1573 = vmatpush3.bf16.msra.mxu1 %v632_v45  ;;  %v626_v53 = vmul.f32 %v1562_v46, %v610_v47 }
 0x1a0   : > { %v1563_v52 = vpop.f32.mrb[14].mxu0  ;;  %1574 = vmatprep.subr.bf16.mxu1 %v633_v44  ;;  %v624_v56 = vmul.f32 %v608_v50, %v581_v49 }
 0x1a1   : > { %v627_v54 = vmul.f32 %v1563_v52, %v611_v48  ;;  %v584_v55 = vpop.f32.mrb[15].mxu0  ;;  %v1773_v52 = vmov 1.0|1.0  }
 0x1a2   : > { %v625_v57 = vmul.f32 %v609_v51, %v584_v55 }
 0x1a3   : > { %v635_v58 = vpack.c.bf16 %v627_v54, %v626_v53  ;;  %1575 = vmatpush3.bf16.msra.mxu1 %v633_v44 }
 0x1a4   : > { %v634_v59 = vpack.c.bf16 %v625_v57, %v624_v56 }
 0x1a6   : > { %1576 = vmatprep.subr.bf16.mxu1 %v634_v59 }
 0x1a7   : > { %1577 = vmatpush3.bf16.msra.mxu1 %v634_v59 }
 0x1a8   : > { %1578 = vmatprep.subr.bf16.mxu1 %v635_v58 }
 0x1ab   : > { %1579 = vmatpush3.bf16.msra.mxu1 %v635_v58 }
 0x1ac   : > { %1620 = vmatprep.subr.bf16.mxu1 %v1931_v63 }
 0x1ae   : > { %1581 = vmatmul.mubr.bf16.vlgmr.msra.gmra.mrb[0].mxu1 %v462_v62 }
 0x1af   : > { %1584 = vmatprep.mubr.bf16.mxu1 %v465_v4  ;;  %1621 = vmatpush3.bf16.msra.mxu1 %v1931_v63  ;;  %v480_v63 = vunpack.c.h.s8.bf16 %v456_v61 }
 0x1b0   : > { %1622 = vmatprep.subr.bf16.mxu1 %v1936_v0 }
 0x1b3   : > { %1623 = vmatpush3.bf16.msra.mxu1 %v1936_v0  ;;  %v1712_v0 = vld [vmem:[%s2203_s3 + $0x28] sm:$0xff]  }
 0x1b4   : > { %1624 = vmatprep.subr.bf16.mxu1 %v1944_v1  ;;  %1606 = vmatprep.subr.bf16.mxu0 %v1712_v0 }
 0x1b5   : > { %1607 = vmatpush3.bf16.msra.mxu0 %v1712_v0 }
 0x1b6   : > { %1585 = vmatmul.mubr.bf16.gmra.mrb[4].mxu1 %v468_v6 }
 0x1b7   : > { %1588 = vmatprep.mubr.bf16.mxu1 %v471_v7  ;;  %1625 = vmatpush3.bf16.msra.mxu1 %v1944_v1  ;;  %v1713_v1 = vld [vmem:[%s2203_s3 + $0x30] sm:$0xff]  }
 0x1b8   : > { %1626 = vmatprep.subr.bf16.mxu1 %v1951_v2  ;;  %1608 = vmatprep.subr.bf16.mxu0 %v1713_v1 }
 0x1b9   : > { %1609 = vmatpush3.bf16.msra.mxu0 %v1713_v1 }
 0x1bb   : > { %1627 = vmatpush3.bf16.msra.mxu1 %v1951_v2  ;;  %v1714_v2 = vld [vmem:[%s2203_s3 + $0x38] sm:$0xff]  }
 0x1bc   : > { %1628 = vmatprep.subr.bf16.mxu1 %v1958_v3  ;;  %1610 = vmatprep.subr.bf16.mxu0 %v1714_v2 }
 0x1bd   : > { %1611 = vmatpush3.bf16.msra.mxu0 %v1714_v2 }
 0x1be   : > { %1589 = vmatmul.mubr.bf16.gmra.mrb[8].mxu1 %v474_v8 }
 0x1bf   : > { %1592 = vmatprep.mubr.bf16.mxu1 %v477_v9  ;;  %1629 = vmatpush3.bf16.msra.mxu1 %v1958_v3  ;;  %v753_v3 = vld [vmem:[#allocation2 + $0x10] sm:$0xff] }
 0x1c0   : > { %1630 = vmatprep.subr.bf16.mxu1 %v1712_v0 }
 0x1c3   : > { %1631 = vmatpush3.bf16.msra.mxu1 %v1712_v0 }
 0x1c4   : > { %1632 = vmatprep.subr.bf16.mxu1 %v1713_v1 }
 0x1c6   : > { %1593 = vmatmul.mubr.bf16.gmra.mrb[12].mxu1 %v480_v63 }
 0x1c7   : > { %1633 = vmatpush3.bf16.msra.mxu1 %v1713_v1 }
 0x1c8   : > { %1634 = vmatprep.subr.bf16.mxu1 %v1714_v2 }
 0x1cb   : > { %1635 = vmatpush3.bf16.msra.mxu1 %v1714_v2 }
 0x281   : > { %v1582_v11 = vpop.f32.mrb[0].mxu1 }
 0x282   : > { %v761_v13 = vsub.f32 %v1582_v11, %v753_v3  ;;  %v670_v14 = vpop.f32.mrb[1].mxu1 }
 0x283   : > { %v759_v16 = vsub.f32 %v670_v14, %v751_v10  ;;  %v1583_v17 = vpop.f32.mrb[2].mxu1 }
 0x284   : > { %v769_v18 = vmul.f32 0.5, %v761_v13  ;;  %v762_v19 = vsub.f32 %v1583_v17, %v754_v12  ;;  %v673_v20 = vpop.f32.mrb[3].mxu1 }
 0x285   : > { %v767_v21 = vmul.f32 0.5, %v759_v16  ;;  %v760_v22 = vsub.f32 %v673_v20, %v752_v15 }
 0x286   : > { %v777_v23 = vadd.f32 %v769_v18, %v753_v3  ;;  %v770_v24 = vmul.f32 0.5, %v762_v19 }
 0x287   : > { %v775_v25 = vadd.f32 %v767_v21, %v751_v10  ;;  %v768_v26 = vmul.f32 0.5, %v760_v22 }
 0x288   : > { %vm785_vm0 = vcmp.ge.f32.partialorder %v777_v23, 0.5  ;;  %v778_v28 = vadd.f32 %v770_v24, %v754_v12 }
 0x289   : > { %v1411_v31 = vsel %vm785_vm0, 1.0, %v1772_v30  ;;  %v776_v32 = vadd.f32 %v768_v26, %v752_v15  ;;  %v1586_v33 = vpop.f32.mrb[4].mxu1  ;;  %vm783_vm1 = vcmp.ge.f32.partialorder %v775_v25, 0.5 }
 0x28a   : > { %vm786_vm2 = vcmp.ge.f32.partialorder %v778_v28, 0.5  ;;  %v765_v35 = vsub.f32 %v1586_v33, %v757_v27  ;;  %v686_v36 = vpop.f32.mrb[5].mxu1  ;;  %v1409_v38 = vsel %vm783_vm1, 1.0, %v1772_v30  ;;  %v809_v39 = vsub.f32 1.0, %v1411_v31 }
 0x28b   : > { %v1412_v40 = vsel %vm786_vm2, 1.0, %v1772_v30  ;;  %vm2040_vm3 = vmpackc.low %vm786_vm2, %vm785_vm0  ;;  %v763_v42 = vsub.f32 %v686_v36, %v755_v29  ;;  %v1587_v43 = vpop.f32.mrb[6].mxu1  ;;  %vm784_vm4 = vcmp.ge.f32.partialorder %v776_v32, 0.5  ;;  %v807_v48 = vsub.f32 1.0, %v1409_v38 }
 0x28c   : > { %v810_v44 = vsub.f32 1.0, %v1412_v40  ;;  %v773_v45 = vmul.f32 0.5, %v765_v35  ;;  %v766_v46 = vsub.f32 %v1587_v43, %v758_v34  ;;  %v689_v47 = vpop.f32.mrb[7].mxu1  ;;  %vm1425_vm5 = vmpackc.low %vm784_vm4, %vm783_vm1  ;;  %v1410_v51 = vsel %vm784_vm4, 1.0, %v1772_v30 }
 0x28d   : > { %v771_v49 = vmul.f32 0.5, %v763_v42  ;;  %v764_v50 = vsub.f32 %v689_v47, %v756_v37  ;;  %1612 = vmatprep.mubr.msk.bf16.mxu0 %vm1425_vm5, %v1773_v52  ;;  %v808_v55 = vsub.f32 1.0, %v1410_v51  ;;  %v817_v56 = vmul.f32 %v809_v39, %v777_v23 }
 0x28e   : > { %v781_v53 = vadd.f32 %v773_v45, %v757_v27  ;;  %v774_v54 = vmul.f32 0.5, %v766_v46  ;;  %1613 = vmatmul.mubr.msk.bf16.vlgmr.msra.gmra.mrb[16].mxu0 %vm2040_vm3, %v1773_v52  ;;  %v818_v59 = vmul.f32 %v810_v44, %v778_v28  ;;  %v815_v62 = vmul.f32 %v807_v48, %v775_v25 }
 0x28f   : > { %v779_v57 = vadd.f32 %v771_v49, %v755_v29  ;;  %v772_v58 = vmul.f32 0.5, %v764_v50  ;;  %v816_v5 = vmul.f32 %v808_v55, %v776_v32 }
 0x290   : > { %v782_v60 = vadd.f32 %v774_v54, %v758_v34  ;;  %vm789_vm6 = vcmp.ge.f32.partialorder %v781_v53, 0.5 }
 0x291   : > { %v780_v4 = vadd.f32 %v772_v58, %v756_v37  ;;  %v1590_v6 = vpop.f32.mrb[8].mxu1  ;;  %vm787_vm7 = vcmp.ge.f32.partialorder %v779_v57, 0.5  ;;  %v1415_v7 = vsel %vm789_vm6, 1.0, %v1772_v30 }
 0x292   : > { %v1010_v61 = vsub.f32 %v1590_v6, %v817_v56  ;;  %v702_v8 = vpop.f32.mrb[9].mxu1  ;;  %v1413_v9 = vsel %vm787_vm7, 1.0, %v1772_v30  ;;  %vm790_vm8 = vcmp.ge.f32.partialorder %v782_v60, 0.5  ;;  %v813_v63 = vsub.f32 1.0, %v1415_v7 }
 0x293   : > { %v1008_v0 = vsub.f32 %v702_v8, %v815_v62  ;;  %v1591_v1 = vpop.f32.mrb[10].mxu1  ;;  %vm788_vm9 = vcmp.ge.f32.partialorder %v780_v4, 0.5  ;;  %v811_v2 = vsub.f32 1.0, %v1413_v9  ;;  %v1416_v3 = vsel %vm790_vm8, 1.0, %v1772_v30  ;;  %vm1431_vm10 = vmpackc.low %vm790_vm8, %vm789_vm6 }
 0x294   : > { %v1018_v10 = vmul.f32 0.5, %v1010_v61  ;;  %v1011_v11 = vsub.f32 %v1591_v1, %v818_v59  ;;  %v705_v12 = vpop.f32.mrb[11].mxu1  ;;  %v1414_v13 = vsel %vm788_vm9, 1.0, %v1772_v30  ;;  %vm1429_vm11 = vmpackc.low %vm788_vm9, %vm787_vm7  ;;  %v814_v14 = vsub.f32 1.0, %v1416_v3  ;;  %v2090_v1 = vld [vmem:[%s2205_s5] ss:$0 sm:$0xff] }
 0x295   : > { %v1016_v15 = vmul.f32 0.5, %v1008_v0  ;;  %v1009_v16 = vsub.f32 %v705_v12, %v816_v5  ;;  %v812_v17 = vsub.f32 1.0, %v1414_v13  ;;  %1616 = vmatprep.mubr.msk.bf16.mxu0 %vm1429_vm11, %v1773_v52  ;;  %v819_v22 = vmul.f32 %v811_v2, %v779_v57 }
 0x296   : > { %v1026_v18 = vadd.f32 %v1018_v10, %v817_v56  ;;  %v1019_v19 = vmul.f32 0.5, %v1011_v11  ;;  %1617 = vmatmul.mubr.msk.bf16.gmra.mrb[20].mxu0 %vm1431_vm10, %v1773_v52  ;;  %v821_v24 = vmul.f32 %v813_v63, %v781_v53  ;;  %v822_v25 = vmul.f32 %v814_v14, %v782_v60  ;;  %v978_v10 = vld [vmem:[%s1911_s12 + $0x10] sm:$0xff]  ;;  %v976_v14 = vld [vmem:[%s1911_s12] sm:$0xff] }
 0x297   : > { %v1024_v20 = vadd.f32 %v1016_v15, %v815_v62  ;;  %v1017_v21 = vmul.f32 0.5, %v1009_v16  ;;  %v820_v28 = vmul.f32 %v812_v17, %v780_v4 }
 0x298   : > { %vm1034_vm12 = vcmp.ge.f32.partialorder %v1026_v18, 0.5  ;;  %v1027_v23 = vadd.f32 %v1019_v19, %v818_v59 }
 0x299   : > { %v1437_v26 = vsel %vm1034_vm12, 1.0, %v1772_v30  ;;  %v1025_v27 = vadd.f32 %v1017_v21, %v816_v5  ;;  %v1594_v29 = vpop.f32.mrb[12].mxu1  ;;  %vm1032_vm13 = vcmp.ge.f32.partialorder %v1024_v20, 0.5 }
 0x29a   : > { %v1058_v31 = vsub.f32 1.0, %v1437_v26  ;;  %vm1035_vm14 = vcmp.ge.f32.partialorder %v1027_v23, 0.5  ;;  %v1014_v32 = vsub.f32 %v1594_v29, %v821_v24  ;;  %v718_v33 = vpop.f32.mrb[13].mxu1  ;;  %v1435_v34 = vsel %vm1032_vm13, 1.0, %v1772_v30 }
 0x29b   : > { %v1438_v35 = vsel %vm1035_vm14, 1.0, %v1772_v30  ;;  %vm2066_vm15 = vmpackc.low %vm1035_vm14, %vm1034_vm12  ;;  %v1012_v37 = vsub.f32 %v718_v33, %v819_v22  ;;  %v1595_v38 = vpop.f32.mrb[14].mxu1  ;;  %vm1033_vm0 = vcmp.ge.f32.partialorder %v1025_v27, 0.5  ;;  %v1056_v39 = vsub.f32 1.0, %v1435_v34 }
 0x29c   : > { %v1066_v40 = vmul.f32 %v1058_v31, %v1026_v18  ;;  %v1059_v41 = vsub.f32 1.0, %v1438_v35  ;;  %v1022_v42 = vmul.f32 0.5, %v1014_v32  ;;  %v1015_v43 = vsub.f32 %v1595_v38, %v822_v25  ;;  %v721_v44 = vpop.f32.mrb[15].mxu1  ;;  %vm1443_vm1 = vmpackc.low %vm1033_vm0, %vm1032_vm13  ;;  %v979_v18 = vld [vmem:[%s1911_s12 + $0x18] sm:$0xff]  ;;  %v982_v31 = vld [vmem:[%s1911_s12 + $0x30] sm:$0xff] }
 0x29d   : > { %v1020_v45 = vmul.f32 0.5, %v1012_v37  ;;  %v1013_v46 = vsub.f32 %v721_v44, %v820_v28  ;;  %v1436_v47 = vsel %vm1033_vm0, 1.0, %v1772_v30  ;;  %v1064_v48 = vmul.f32 %v1056_v39, %v1024_v20  ;;  %1636 = vmatprep.mubr.msk.bf16.mxu1 %vm1443_vm1, %v1773_v52  ;;  %v980_v35 = vld [vmem:[%s1911_s12 + $0x20] sm:$0xff]  ;;  %v983_v39 = vld [vmem:[%s1911_s12 + $0x38] sm:$0xff] }
 0x29e   : > { %1074 = vst [vmem:[#allocation2 + $0x10] sm:$0xff] %v1066_v40  ;;  %v1067_v49 = vmul.f32 %v1059_v41, %v1027_v23  ;;  %v1030_v50 = vadd.f32 %v1022_v42, %v821_v24  ;;  %v1023_v51 = vmul.f32 0.5, %v1015_v43  ;;  %v1057_v53 = vsub.f32 1.0, %v1436_v47  ;;  %1637 = vmatmul.mubr.msk.bf16.vlgmr.msra.gmra.mrb[16].mxu1 %vm2066_vm15, %v1773_v52  ;;  %v981_v43 = vld [vmem:[%s1911_s12 + $0x28] sm:$0xff] }
 0x29f   : > { %v1028_v54 = vadd.f32 %v1020_v45, %v819_v22  ;;  %v1021_v55 = vmul.f32 0.5, %v1013_v46  ;;  %1072 = vst [vmem:[#allocation2] sm:$0xff] %v1064_v48  ;;  %v977_v22 = vld [vmem:[%s1911_s12 + $0x8] sm:$0xff] }
 0x2a0   : > { %1075 = vst [vmem:[#allocation2 + $0x18] sm:$0xff] %v1067_v49  ;;  %v1031_v56 = vadd.f32 %v1023_v51, %v822_v25  ;;  %v1065_v57 = vmul.f32 %v1057_v53, %v1025_v27  ;;  %vm1038_vm2 = vcmp.ge.f32.partialorder %v1030_v50, 0.5  ;;  %v1453_v51 = vld [vmem:[%s1911_s12 + $0x50] sm:$0xff] }
 0x2a1   : > { %v1029_v58 = vadd.f32 %v1021_v55, %v820_v28  ;;  %vm1036_vm3 = vcmp.ge.f32.partialorder %v1028_v54, 0.5  ;;  %v1441_v59 = vsel %vm1038_vm2, 1.0, %v1772_v30 }
 0x2a2   : > { %1073 = vst [vmem:[#allocation2 + $0x8] sm:$0xff] %v1065_v57  ;;  %v1439_v60 = vsel %vm1036_vm3, 1.0, %v1772_v30  ;;  %vm1039_vm4 = vcmp.ge.f32.partialorder %v1031_v56, 0.5  ;;  %v1062_v62 = vsub.f32 1.0, %v1441_v59 }
 0x2a3   : > { %vm1037_vm5 = vcmp.ge.f32.partialorder %v1029_v58, 0.5  ;;  %v1060_v4 = vsub.f32 1.0, %v1439_v60  ;;  %v1442_v5 = vsel %vm1039_vm4, 1.0, %v1772_v30  ;;  %vm1449_vm6 = vmpackc.low %vm1039_vm4, %vm1038_vm2  ;;  %v1454_v60 = vld [vmem:[%s1911_s12 + $0x58] sm:$0xff] }
 0x2a4   : > { %v1440_v6 = vsel %vm1037_vm5, 1.0, %v1772_v30  ;;  %vm1447_vm7 = vmpackc.low %vm1037_vm5, %vm1036_vm3  ;;  %v1063_v7 = vsub.f32 1.0, %v1442_v5  ;;  %v1070_v61 = vmul.f32 %v1062_v62, %v1030_v50  ;;  %v2085_v30 = vld [vmem:[%s2204_s4] ss:$0 sm:$0xff] }
 0x2a5   : > { %v1061_v8 = vsub.f32 1.0, %v1440_v6  ;;  %v1068_v9 = vmul.f32 %v1060_v4, %v1028_v54  ;;  %1640 = vmatprep.mubr.msk.bf16.mxu1 %vm1447_vm7, %v1773_v52  ;;  %v1452_v6 = vld [vmem:[%s1911_s12 + $0x48] sm:$0xff] }
 0x2a6   : > { %v1071_v63 = vmul.f32 %v1063_v7, %v1031_v56  ;;  %1078 = vst [vmem:[#allocation2 + $0x30] sm:$0xff] %v1070_v61  ;;  %1641 = vmatmul.mubr.msk.bf16.gmra.mrb[20].mxu1 %vm1449_vm6, %v1773_v52  ;;  %v1451_v56 = vld [vmem:[%s1911_s12 + $0x40] sm:$0xff] }
 0x2a7   : > { %v1069_v0 = vmul.f32 %v1061_v8, %v1029_v58  ;;  %1076 = vst [vmem:[#allocation2 + $0x20] sm:$0xff] %v1068_v9 }
 0x2a8   : > { %1079 = vst [vmem:[#allocation2 + $0x38] sm:$0xff] %v1071_v63 }
 0x2a9   : > { %1077 = vst [vmem:[#allocation2 + $0x28] sm:$0xff] %v1069_v0 }
 0x361   : > { %v1614_v2 = vpop.f32.mrb[16].mxu0 }
 0x362   : > { %v956_v3 = vmul.f32 %v1614_v2, %v2085_v30  ;;  %v917_v52 = vpop.f32.mrb[17].mxu0 }
 0x363   : > { %v954_v11 = vmul.f32 %v2085_v30, %v917_v52  ;;  %v1615_v12 = vpop.f32.mrb[18].mxu0 }
 0x364   : > { %v970_v13 = vadd.f32 %v2090_v1, %v956_v3  ;;  %v957_v15 = vmul.f32 %v1615_v12, %v2085_v30  ;;  %v920_v16 = vpop.f32.mrb[19].mxu0  ;;  %v1457_v3 = vld [vmem:[%s1911_s12 + $0x70] sm:$0xff]  ;;  %v1455_v12 = vld [vmem:[%s1911_s12 + $0x60] sm:$0xff] }
 0x365   : > { %v968_v17 = vadd.f32 %v2090_v1, %v954_v11  ;;  %v955_v19 = vmul.f32 %v2085_v30, %v920_v16  ;;  %v1458_v16 = vld [vmem:[%s1911_s12 + $0x78] sm:$0xff] }
 0x366   : > { %v986_v20 = vadd.f32 %v978_v10, %v970_v13  ;;  %v971_v21 = vadd.f32 %v2090_v1, %v957_v15 }
 0x367   : > { %v984_v23 = vadd.f32 %v976_v14, %v968_v17  ;;  %v969_v24 = vadd.f32 %v2090_v1, %v955_v19 }
 0x368   : > { %994 = vst [vmem:[%s1913_s14 + $0x10] sm:$0xff] %v986_v20  ;;  %v987_v25 = vadd.f32 %v979_v18, %v971_v21  ;;  %v1456_v20 = vld [vmem:[%s1911_s12 + $0x68] sm:$0xff]  ;;  %s1469_s12 = sshll.u32 (%p1861_p6), %s1757_s24, 3 }
 0x369   : > { %992 = vst [vmem:[%s1913_s14] sm:$0xff] %v984_v23  ;;  %v985_v26 = vadd.f32 %v977_v22, %v969_v24  ;;  %v1618_v27 = vpop.f32.mrb[20].mxu0  ;;  %s1201_s9 = sadd.s32 (%p1861_p6), %s1475_s8, %s1469_s12 }
 0x36a   : > { %995 = vst [vmem:[%s1913_s14 + $0x18] sm:$0xff] %v987_v25  ;;  %v960_v28 = vmul.f32 %v1618_v27, %v2085_v30  ;;  %v933_v29 = vpop.f32.mrb[21].mxu0  ;;  %s1471_s30 = sshll.u32 (%p1861_p6), %s1201_s9, 3 }
 0x36b   : > { %993 = vst [vmem:[%s1913_s14 + $0x8] sm:$0xff] %v985_v26  ;;  %v958_v32 = vmul.f32 %v2085_v30, %v933_v29  ;;  %v1619_v33 = vpop.f32.mrb[22].mxu0  ;;  %s1203_s11 = scalar_lea.vmem (%p1861_p6), %s2206_s6, %s1471_s30 }
 0x36c   : > { %v974_v34 = vadd.f32 %v2090_v1, %v960_v28  ;;  %v961_v36 = vmul.f32 %v1619_v33, %v2085_v30  ;;  %v936_v37 = vpop.f32.mrb[23].mxu0 }
 0x36d   : > { %v972_v38 = vadd.f32 %v2090_v1, %v958_v32  ;;  %v959_v40 = vmul.f32 %v2085_v30, %v936_v37 }
 0x36e   : > { %v990_v41 = vadd.f32 %v982_v31, %v974_v34  ;;  %v975_v42 = vadd.f32 %v2090_v1, %v961_v36 }
 0x36f   : > { %v988_v44 = vadd.f32 %v980_v35, %v972_v38  ;;  %v973_v45 = vadd.f32 %v2090_v1, %v959_v40  ;;  %v1265_v25 = vld [vmem:[%s1913_s14 + $0x10] sm:$0xff] (%p1861_p6) }
 0x370   : > { %998 = vst [vmem:[%s1913_s14 + $0x30] sm:$0xff] %v990_v41  ;;  %v991_v46 = vadd.f32 %v983_v39, %v975_v42  ;;  %1266 = vst [vmem:[%s1203_s11 + $0x10] sm:$0xff] (%p1861_p6), %v1265_v25 }
 0x371   : > { %996 = vst [vmem:[%s1913_s14 + $0x20] sm:$0xff] %v988_v44  ;;  %v989_v47 = vadd.f32 %v981_v43, %v973_v45  ;;  %v1638_v48 = vpop.f32.mrb[16].mxu1  ;;  %v1267_v26 = vld [vmem:[%s1913_s14 + $0x18] sm:$0xff] (%p1861_p6) }
 0x372   : > { %999 = vst [vmem:[%s1913_s14 + $0x38] sm:$0xff] %v991_v46  ;;  %v1151_v49 = vmul.f32 %v1638_v48, %v2085_v30  ;;  %v1118_v50 = vpop.f32.mrb[17].mxu1  ;;  %1268 = vst [vmem:[%s1203_s11 + $0x18] sm:$0xff] (%p1861_p6), %v1267_v26 }
 0x373   : > { %997 = vst [vmem:[%s1913_s14 + $0x28] sm:$0xff] %v989_v47  ;;  %v1149_v53 = vmul.f32 %v2085_v30, %v1118_v50  ;;  %v1639_v54 = vpop.f32.mrb[18].mxu1 }
 0x374   : > { %v1159_v55 = vadd.f32 %v2090_v1, %v1151_v49  ;;  %v1152_v57 = vmul.f32 %v1639_v54, %v2085_v30  ;;  %v1121_v58 = vpop.f32.mrb[19].mxu1 }
 0x375   : > { %v1157_v59 = vadd.f32 %v2090_v1, %v1149_v53  ;;  %v1150_v62 = vmul.f32 %v2085_v30, %v1121_v58 }
 0x376   : > { %v1176_v4 = vadd.f32 %v1453_v51, %v1159_v55  ;;  %v1160_v5 = vadd.f32 %v2090_v1, %v1152_v57 }
 0x377   : > { %v1174_v7 = vadd.f32 %v1451_v56, %v1157_v59  ;;  %v1158_v61 = vadd.f32 %v2090_v1, %v1150_v62  ;;  %v1273_v29 = vld [vmem:[%s1913_s14 + $0x30] sm:$0xff] (%p1861_p6) }
 0x378   : > { %1461 = vst [vmem:[%s1913_s14 + $0x50] sm:$0xff] %v1176_v4  ;;  %v1177_v8 = vadd.f32 %v1454_v60, %v1160_v5  ;;  %v1269_v27 = vld [vmem:[%s1913_s14 + $0x20] sm:$0xff] (%p1861_p6)  ;;  %1274 = vst [vmem:[%s1203_s11 + $0x30] sm:$0xff] (%p1861_p6), %v1273_v29 }
 0x379   : > { %1459 = vst [vmem:[%s1913_s14 + $0x40] sm:$0xff] %v1174_v7  ;;  %v1175_v9 = vadd.f32 %v1452_v6, %v1158_v61  ;;  %v1642_v63 = vpop.f32.mrb[20].mxu1  ;;  %v1275_v31 = vld [vmem:[%s1913_s14 + $0x38] sm:$0xff] (%p1861_p6)  ;;  %1270 = vst [vmem:[%s1203_s11 + $0x20] sm:$0xff] (%p1861_p6), %v1269_v27 }
 0x37a   : > { %1462 = vst [vmem:[%s1913_s14 + $0x58] sm:$0xff] %v1177_v8  ;;  %v1155_v0 = vmul.f32 %v1642_v63, %v2085_v30  ;;  %v1134_v2 = vpop.f32.mrb[21].mxu1  ;;  %v1271_v28 = vld [vmem:[%s1913_s14 + $0x28] sm:$0xff] (%p1861_p6)  ;;  %1276 = vst [vmem:[%s1203_s11 + $0x38] sm:$0xff] (%p1861_p6), %v1275_v31 }
 0x37b   : > { %1460 = vst [vmem:[%s1913_s14 + $0x48] sm:$0xff] %v1175_v9  ;;  %v1153_v52 = vmul.f32 %v2085_v30, %v1134_v2  ;;  %v1643_v10 = vpop.f32.mrb[22].mxu1  ;;  %1272 = vst [vmem:[%s1203_s11 + $0x28] sm:$0xff] (%p1861_p6), %v1271_v28 }
 0x37c   : > { %v1163_v11 = vadd.f32 %v2090_v1, %v1155_v0  ;;  %v1156_v13 = vmul.f32 %v1643_v10, %v2085_v30  ;;  %v1137_v14 = vpop.f32.mrb[23].mxu1 }
 0x37d   : > { %v1161_v15 = vadd.f32 %v2090_v1, %v1153_v52  ;;  %v1154_v17 = vmul.f32 %v2085_v30, %v1137_v14  ;;  %1197 = sbr.rel (!%p1861_p6) target bundleno = 908 (0x38c), region = 113  ;;  %v1261_v30 = vld [vmem:[%s1913_s14] sm:$0xff] (%p1861_p6) }
 0x37e   : > { %v1180_v18 = vadd.f32 %v1457_v3, %v1163_v11  ;;  %v1164_v19 = vadd.f32 %v2090_v1, %v1156_v13  ;;  %1262 = vst [vmem:[%s1203_s11] sm:$0xff] (%p1861_p6), %v1261_v30 }
 0x37f   : > { %v1178_v21 = vadd.f32 %v1455_v12, %v1161_v15  ;;  %v1162_v22 = vadd.f32 %v2090_v1, %v1154_v17  ;;  %v1263_v1 = vld [vmem:[%s1913_s14 + $0x8] sm:$0xff] (%p1861_p6)  ;;  %v1281_v34 = vld [vmem:[%s1913_s14 + $0x50] sm:$0xff] (%p1861_p6) }
 0x380   : > { %1465 = vst [vmem:[%s1913_s14 + $0x70] sm:$0xff] %v1180_v18  ;;  %v1181_v23 = vadd.f32 %v1458_v16, %v1164_v19  ;;  %v1277_v32 = vld [vmem:[%s1913_s14 + $0x40] sm:$0xff] (%p1861_p6)  ;;  %1264 = vst [vmem:[%s1203_s11 + $0x8] sm:$0xff] (%p1861_p6), %v1263_v1 }
 0x381   : > { %1463 = vst [vmem:[%s1913_s14 + $0x60] sm:$0xff] %v1178_v21  ;;  %v1179_v24 = vadd.f32 %v1456_v20, %v1162_v22  ;;  %v1283_v35 = vld [vmem:[%s1913_s14 + $0x58] sm:$0xff] (%p1861_p6)  ;;  %1278 = vst [vmem:[%s1203_s11 + $0x80] sm:$0xff] (%p1861_p6), %v1277_v32 }
 0x382   : > { %1466 = vst [vmem:[%s1913_s14 + $0x78] sm:$0xff] %v1181_v23  ;;  %v1279_v33 = vld [vmem:[%s1913_s14 + $0x48] sm:$0xff] (%p1861_p6)  ;;  %1282 = vst [vmem:[%s1203_s11 + $0x90] sm:$0xff] (%p1861_p6), %v1281_v34 }
 0x383   : > { %1464 = vst [vmem:[%s1913_s14 + $0x68] sm:$0xff] %v1179_v24  ;;  %1280 = vst [vmem:[%s1203_s11 + $0x88] sm:$0xff] (%p1861_p6), %v1279_v33 }
 0x384   : > { %1284 = vst [vmem:[%s1203_s11 + $0x98] sm:$0xff] %v1283_v35 }
 0x387   : > { %v1289_v38 = vld [vmem:[%s1913_s14 + $0x70] sm:$0xff] }
 0x388   : > { %v1285_v36 = vld [vmem:[%s1913_s14 + $0x60] sm:$0xff]  ;;  %1290 = vst [vmem:[%s1203_s11 + $0xb0] sm:$0xff] %v1289_v38 }
 0x389   : > { %1286 = vst [vmem:[%s1203_s11 + $0xa0] sm:$0xff] %v1285_v36  ;;  %v1291_v39 = vld [vmem:[%s1913_s14 + $0x78] sm:$0xff] }
 0x38a   : > { %v1287_v37 = vld [vmem:[%s1913_s14 + $0x68] sm:$0xff]  ;;  %1292 = vst [vmem:[%s1203_s11 + $0xb8] sm:$0xff] %v1291_v39 }
 0x38b   : > { %1288 = vst [vmem:[%s1203_s11 + $0xa8] sm:$0xff] %v1287_v37 }
 0x38c PF: > { %s16_s27 = sadd.s32 1, %s1769_s27   ;;  %s2213_s21 = smov %s1749_s22 }
 0x38d   : > { %p13_p13 = scmp.ge.s32.totalorder %s16_s27, 6   ;;  %s2214_s22 = smov %s1869_s13 }
 0x38e   : > { %s2215_s23 = smov %s1761_s25  ;;  %s2216_s24 = smov %s1765_s26 }
 0x38f   : > { %s2217_s25 = smov %s2220_s28  ;;  %s2218_s26 = smov %s2224_s29 }
 0x390   :  { %15 = sbr.rel (!%p13_p13) target bundleno = 4 (0x4), region = 192 }

// kernel: ms_block_conv_forward.5
= control target key start
LH: loop header
LB: loop body
LE: loop exit
PB: predicated region body
PF: predicated region fallthrough
CT: control target
= control target key end

     0   :  { %12 = vsyncpa [#allocation5], 0  ;;  %s3152_s0 = inlined_call_operand.vmem [shape: f32[4,128,128], index: 0, kind: input, shape index: {}]   ;;  %s3153_s1 = inlined_call_operand.vmem [shape: bf16[128,512], index: 1, kind: input, shape index: {}]   ;;  %s3154_s2 = inlined_call_operand.vmem [shape: f32[1,512], index: 2, kind: input, shape index: {}]   ;;  %s3155_s3 = inlined_call_operand.vmem [shape: f32[1,512], index: 3, kind: input, shape index: {}]   ;;  %s3156_s4 = inlined_call_operand.vmem [shape: bf16[512,128], index: 4, kind: input, shape index: {}]   ;;  %s3157_s5 = inlined_call_operand.vmem [shape: f32[1,128], index: 5, kind: input, shape index: {}]   ;;  %s3158_s6 = inlined_call_operand.vmem [shape: f32[1,128], index: 6, kind: input, shape index: {}]   ;;  %s3159_s7 = inlined_call_operand.hbm [shape: f32[4,128,128], index: 7, kind: output, shape index: {}]  }
   0x1   :  { %14 = vsyncpa [#allocation5 + $0x1], 0  ;;  %s2315_s24 = smov 0   ;;  %s2317_s25 = smov 0  }
   0x2   :  { %s2319_s26 = smov 0   ;;  %s2321_s27 = smov 0  }
   0x3   :  { %s2323_s28 = smov 0   ;;  %s2325_s29 = smov 0  }
   0x4   :  { %s2327_s30 = smov 0   ;;  %s2329_s8 = smov 0  }
   0x5 LB: > { %s1757_s9 = sadd.s32 4294967295, %s2266_s8   ;;  %s1758_s10 = sadd.s32 4294967294, %s2266_s8   ;;  %s2266_s8 = sphi %s2329_s8, %s20_s8   ;;  %s2262_s30 = sphi %s2327_s30, %s3186_s30   ;;  %s2258_s29 = sphi %s2325_s29, %s3185_s29   ;;  %s2254_s28 = sphi %s2323_s28, %s3184_s28   ;;  %s2250_s27 = sphi %s2321_s27, %s3183_s27   ;;  %s2246_s26 = sphi %s2319_s26, %s3182_s26   ;;  %s2242_s25 = sphi %s2317_s25, %s3181_s25   ;;  %s2238_s24 = sphi %s2315_s24, %s3180_s24  }
   0x6   : > { %s29_s11 = sadd.s32 1, %s2258_s29  ;;  %s32_s12 = sadd.s32 1, %s2262_s30 }
   0x7   : > { %p30_p0 = scmp.ge.s32.totalorder %s29_s11, 4  ;;  %p205_p1 = scmp.ne.s32.totalorder %s2246_s26, %s2242_s25 }
   0x8   : > { %p206_p2 = scmp.eq.s32.totalorder %s1757_s9, 7  ;;  %p211_p5 = scmp.ne.s32.totalorder %s2242_s25, %s2238_s24 }
   0x9   : > { %s3188_s11 = smov (%p30_p0, %s29_s11), 0  ;;  %s3190_s12 = smov (!%p30_p0, %s32_s12), %s2262_s30 }
   0xa   : > { %3163 = sst [smem:[#allocation7_spill]] %s3188_s11  ;;  %s190_s13 = ssub.s32 %s2258_s29, %s3188_s11 }
   0xb   : > { %p2366_p3 = por %p206_p2, %p205_p1  ;;  %p34_p4 = scmp.ge.s32.totalorder %s3190_s12, 2 }
   0xc   : > { %p212_p6 = scmp.eq.s32.totalorder %s1758_s10, 7  ;;  %p1761_p7 = scmp.ge.s32.totalorder %s2266_s8, 1 }
   0xd   : > { %s3192_s12 = smov (%p34_p4, %s3190_s12), 0  ;;  %p261_p9 = scmp.lt.s32.totalorder %s2266_s8, 9 }
   0xe   : > { %3165 = sst [smem:[#allocation8_spill]] %s3192_s12  ;;  %p2375_p8 = por %p212_p6, %p211_p5 }
   0xf   : > { %s191_s16 = ssub.s32 %s2262_s30, %s3192_s12  ;;  %s195_s17 = sadd.s32 1, %s2246_s26 }
  0x10   : > { %s192_s18 = sor.u32 %s191_s16, %s190_s13  ;;  %p262_p10 = pnand %p1761_p7, %p261_p9 }
  0x11   : > { %p193_p11 = scmp.eq.s32.totalorder %s192_s18, 0  ;;  %s3162_s20 = sand.u32 (!%p262_p10), 1, %s2242_s25  }
  0x12   : > { %265 = sbr.rel (%p262_p10) target bundleno = 608 (0x260), region = 48  ;;  %s2388_s21 = sshll.u32 (!%p262_p10), %s2254_s28, 3 }
  0x13   : > { %s2384_s19 = scalar_select %p193_p11, %s2246_s26, %s195_s17  }
  0x14   : > { %s1762_s22 = sshll.u32 (!%p262_p10), %s3162_s20, 6  ;;  %p298_p12 = scmp.lt.s32.totalorder (!%p262_p10), %s2250_s27, 3 }
  0x15   : > { %p300_p13 = scmp.lt.s32.totalorder (!%p262_p10), %s2388_s21, 15  ;;  %s2401_s11 = scalar_lea.vmem (!%p262_p10), [#allocation4], %s1762_s22 }
  0x16   : > { %p1766_p0 = scmp.ne.s32.totalorder (!%p262_p10), %s2250_s27, 0 }
  0x19   : > { %s299_s23 = scalar_select %p298_p12, %s2250_s27, 3 }
  0x1a   : > { %s301_s9 = scalar_select %p300_p13, %s2388_s21, 15 }
  0x1b   : > { %s1764_s10 = sshll.u32 %s299_s23, 4  ;;  %312 = sbr.rel (%p1766_p0) target bundleno = 48 (0x30), region = 52  ;;  %v2268_v0 = vmov (!%p1766_p0), 0.0  }
  0x1c   : > { %s303_s13 = sadd.s32 %s1764_s10, %s301_s9  ;;  %313 = vst [vmem:[#allocation2] sm:$0xff] (!%p1766_p0), %v2268_v0  ;;  %314 = vst [vmem:[#allocation2 + $0x8] sm:$0xff] (!%p1766_p0), %v2268_v0 }
  0x1d   : > { %s1765_s16 = sshll.u32 %s303_s13, 3  ;;  %315 = vst [vmem:[#allocation2 + $0x10] sm:$0xff] (!%p1766_p0), %v2268_v0  ;;  %316 = vst [vmem:[#allocation2 + $0x18] sm:$0xff] (!%p1766_p0), %v2268_v0 }
  0x1e   : > { %s2399_s12 = scalar_lea.vmem %s3152_s0, %s1765_s16  ;;  %317 = vst [vmem:[#allocation2 + $0x20] sm:$0xff] (!%p1766_p0), %v2268_v0  ;;  %318 = vst [vmem:[#allocation2 + $0x28] sm:$0xff] (!%p1766_p0), %v2268_v0 }
  0x1f   : > { %319 = vst [vmem:[#allocation2 + $0x30] sm:$0xff] (!%p1766_p0), %v2268_v0  ;;  %320 = vst [vmem:[#allocation2 + $0x38] sm:$0xff] (!%p1766_p0), %v2268_v0 }
  0x20   : > { %321 = vst [vmem:[#allocation3] sm:$0xff] (!%p1766_p0), %v2268_v0  ;;  %322 = vst [vmem:[#allocation3 + $0x8] sm:$0xff] (!%p1766_p0), %v2268_v0 }
  0x21   : > { %323 = vst [vmem:[#allocation3 + $0x10] sm:$0xff] (!%p1766_p0), %v2268_v0  ;;  %324 = vst [vmem:[#allocation3 + $0x18] sm:$0xff] (!%p1766_p0), %v2268_v0 }
  0x22   : > { %325 = vst [vmem:[#allocation3 + $0x20] sm:$0xff] %v2268_v0  ;;  %326 = vst [vmem:[#allocation3 + $0x28] sm:$0xff] %v2268_v0 }
  0x23   : > { %327 = vst [vmem:[#allocation3 + $0x30] sm:$0xff] %v2268_v0  ;;  %328 = vst [vmem:[#allocation3 + $0x38] sm:$0xff] %v2268_v0 }
  0x24   : > { %329 = vst [vmem:[#allocation3 + $0x40] sm:$0xff] %v2268_v0  ;;  %330 = vst [vmem:[#allocation3 + $0x48] sm:$0xff] %v2268_v0 }
  0x25   : > { %331 = vst [vmem:[#allocation3 + $0x50] sm:$0xff] %v2268_v0  ;;  %332 = vst [vmem:[#allocation3 + $0x58] sm:$0xff] %v2268_v0 }
  0x26   : > { %333 = vst [vmem:[#allocation3 + $0x60] sm:$0xff] %v2268_v0  ;;  %334 = vst [vmem:[#allocation3 + $0x68] sm:$0xff] %v2268_v0 }
  0x27   : > { %335 = vst [vmem:[#allocation3 + $0x70] sm:$0xff] %v2268_v0  ;;  %336 = vst [vmem:[#allocation3 + $0x78] sm:$0xff] %v2268_v0 }
  0x28   : > { %337 = vst [vmem:[#allocation3 + $0x80] sm:$0xff] %v2268_v0  ;;  %338 = vst [vmem:[#allocation3 + $0x88] sm:$0xff] %v2268_v0 }
  0x29   : > { %339 = vst [vmem:[#allocation3 + $0x90] sm:$0xff] %v2268_v0  ;;  %340 = vst [vmem:[#allocation3 + $0x98] sm:$0xff] %v2268_v0 }
  0x2a   : > { %341 = vst [vmem:[#allocation3 + $0xa0] sm:$0xff] %v2268_v0  ;;  %342 = vst [vmem:[#allocation3 + $0xa8] sm:$0xff] %v2268_v0 }
  0x2b   : > { %343 = vst [vmem:[#allocation3 + $0xb0] sm:$0xff] %v2268_v0  ;;  %344 = vst [vmem:[#allocation3 + $0xb8] sm:$0xff] %v2268_v0 }
  0x2c   : > { %345 = vst [vmem:[#allocation3 + $0xc0] sm:$0xff] %v2268_v0  ;;  %346 = vst [vmem:[#allocation3 + $0xc8] sm:$0xff] %v2268_v0 }
  0x2d   : > { %347 = vst [vmem:[#allocation3 + $0xd0] sm:$0xff] %v2268_v0  ;;  %348 = vst [vmem:[#allocation3 + $0xd8] sm:$0xff] %v2268_v0 }
  0x2e   : > { %349 = vst [vmem:[#allocation3 + $0xe0] sm:$0xff] %v2268_v0  ;;  %350 = vst [vmem:[#allocation3 + $0xe8] sm:$0xff] %v2268_v0 }
  0x2f   : > { %351 = vst [vmem:[#allocation3 + $0xf0] sm:$0xff] %v2268_v0  ;;  %352 = vst [vmem:[#allocation3 + $0xf8] sm:$0xff] %v2268_v0 }
  0x30 PF: > { %v2084_v1 = vld [vmem:[%s3153_s1 + $0x4] ss:$16 sps:$4 sm:$0xff]   ;;  %v2086_v2 = vld [vmem:[%s3153_s1 + $0xc] ss:$16 sps:$4 sm:$0xff]   ;;  %v2269_v3 = vmov 0   ;;  %s1923_s16 = sshll.u32 %s2250_s27, 4 }
  0x31   : > { %669 = vmatprep.mubr.bf16.mxu0 %v2269_v3  ;;  %742 = vmatprep.mubr.bf16.mxu1 %v2269_v3  ;;  %v2088_v4 = vld [vmem:[%s3153_s1] ss:$16 sps:$4 sm:$0xff]   ;;  %v2089_v5 = vld [vmem:[%s3153_s1 + $0x8] ss:$16 sps:$4 sm:$0xff]   ;;  %v2090_v6 = vld [vmem:[%s3153_s1 + $0x24] ss:$16 sps:$4 sm:$0xff]   ;;  %s1672_s17 = sadd.s32 %s1923_s16, %s2388_s21 }
  0x32   : > { %637 = vmatprep.subr.bf16.mxu0 %v2084_v1  ;;  %710 = vmatprep.subr.bf16.mxu1 %v2086_v2  ;;  %v2092_v7 = vld [vmem:[%s3153_s1 + $0x2c] ss:$16 sps:$4 sm:$0xff]   ;;  %v2094_v8 = vld [vmem:[%s3153_s1 + $0x20] ss:$16 sps:$4 sm:$0xff]   ;;  %v2095_v9 = vld [vmem:[%s3153_s1 + $0x28] ss:$16 sps:$4 sm:$0xff]  }
  0x33   : > { %638 = vmatpush1.bf16.msra.mxu0 %v2088_v4  ;;  %711 = vmatpush1.bf16.msra.mxu1 %v2089_v5  ;;  %v2096_v10 = vld [vmem:[%s3153_s1 + $0x44] ss:$16 sps:$4 sm:$0xff]   ;;  %v2098_v11 = vld [vmem:[%s3153_s1 + $0x4c] ss:$16 sps:$4 sm:$0xff]   ;;  %v2100_v12 = vld [vmem:[%s3153_s1 + $0x40] ss:$16 sps:$4 sm:$0xff]  }
  0x34   : > { %639 = vmatprep.subr.bf16.mxu0 %v2090_v6  ;;  %712 = vmatprep.subr.bf16.mxu1 %v2092_v7  ;;  %v2101_v13 = vld [vmem:[%s3153_s1 + $0x48] ss:$16 sps:$4 sm:$0xff]   ;;  %v2102_v14 = vld [vmem:[%s3153_s1 + $0x64] ss:$16 sps:$4 sm:$0xff]   ;;  %v2104_v15 = vld [vmem:[%s3153_s1 + $0x6c] ss:$16 sps:$4 sm:$0xff]  }
  0x35   : > { %v2106_v16 = vld [vmem:[%s3153_s1 + $0x60] ss:$16 sps:$4 sm:$0xff]   ;;  %v2107_v17 = vld [vmem:[%s3153_s1 + $0x68] ss:$16 sps:$4 sm:$0xff]   ;;  %v2108_v18 = vld [vmem:[%s3153_s1 + $0x84] ss:$16 sps:$4 sm:$0xff]  }
  0x36   : > { %v2110_v19 = vld [vmem:[%s3153_s1 + $0x8c] ss:$16 sps:$4 sm:$0xff]   ;;  %v2112_v20 = vld [vmem:[%s3153_s1 + $0x80] ss:$16 sps:$4 sm:$0xff]   ;;  %v2113_v21 = vld [vmem:[%s3153_s1 + $0x88] ss:$16 sps:$4 sm:$0xff]  }
  0x37   : > { %640 = vmatpush1.bf16.msra.mxu0 %v2094_v8  ;;  %713 = vmatpush1.bf16.msra.mxu1 %v2095_v9  ;;  %v2114_v22 = vld [vmem:[%s3153_s1 + $0xa4] ss:$16 sps:$4 sm:$0xff]   ;;  %v2116_v23 = vld [vmem:[%s3153_s1 + $0xac] ss:$16 sps:$4 sm:$0xff]   ;;  %v2118_v24 = vld [vmem:[%s3153_s1 + $0xa0] ss:$16 sps:$4 sm:$0xff]  }
  0x38   : > { %641 = vmatprep.subr.bf16.mxu0 %v2096_v10  ;;  %714 = vmatprep.subr.bf16.mxu1 %v2098_v11  ;;  %v2119_v25 = vld [vmem:[%s3153_s1 + $0xa8] ss:$16 sps:$4 sm:$0xff]   ;;  %v2120_v26 = vld [vmem:[%s3153_s1 + $0xc4] ss:$16 sps:$4 sm:$0xff]   ;;  %v2122_v27 = vld [vmem:[%s3153_s1 + $0xcc] ss:$16 sps:$4 sm:$0xff]  }
  0x39   : > { %v353_v28 = vld [vmem:[%s2399_s12] sm:$0xff]  ;;  %v354_v29 = vld [vmem:[%s2399_s12 + $0x8] sm:$0xff]  ;;  %v355_v34 = vld [vmem:[%s2399_s12 + $0x10] sm:$0xff]  ;;  %v2270_v9 = vmov 0.0   ;;  %s1924_s18 = sshll.u32 %s1672_s17, 7  ;;  %s1675_s28 = sshll.u32 %s2401_s11, 4  ;;  %s3093_s28 = int_to_ptr.vmem [resolvable:$true] %s1675_s28 }
  0x3a   : > { %v2124_v30 = vld [vmem:[%s3153_s1 + $0xc0] ss:$16 sps:$4 sm:$0xff]   ;;  %v2125_v31 = vld [vmem:[%s3153_s1 + $0xc8] ss:$16 sps:$4 sm:$0xff]   ;;  %v2126_v35 = vld [vmem:[%s3153_s1 + $0xe4] ss:$16 sps:$4 sm:$0xff]   ;;  %s3091_s23 = scalar_lea.hbm %s3159_s7, %s1924_s18 }
  0x3b   : > { %642 = vmatpush1.bf16.msra.mxu0 %v2100_v12  ;;  %715 = vmatpush1.bf16.msra.mxu1 %v2101_v13  ;;  %v361_v32 = vld [vmem:[#allocation2] sm:$0xff]  ;;  %v362_v33 = vld [vmem:[#allocation2 + $0x8] sm:$0xff]  ;;  %v356_v39 = vld [vmem:[%s2399_s12 + $0x18] sm:$0xff]  ;;  %s3177_s21 = sand.u32 1, %s2242_s25   ;;  %s2172_s9 = scalar_lea.vmem %s3093_s28, 1024 }
  0x3c   : > { %643 = vmatprep.subr.bf16.mxu0 %v2102_v14  ;;  %716 = vmatprep.subr.bf16.mxu1 %v2104_v15  ;;  %v2128_v36 = vld [vmem:[%s3153_s1 + $0xec] ss:$16 sps:$4 sm:$0xff]   ;;  %v369_v37 = vsub.f32 %v353_v28, %v361_v32  ;;  %v370_v38 = vsub.f32 %v354_v29, %v362_v33  ;;  %v363_v40 = vld [vmem:[#allocation2 + $0x10] sm:$0xff]  ;;  %v357_v44 = vld [vmem:[%s2399_s12 + $0x20] sm:$0xff]  ;;  %s3100_s20 = scalar_lea.sflag [#allocation5], %s3177_s21  ;;  %p2173_p1 = scmp.ne.s32.totalorder %s3093_s28, %s2172_s9 }
  0x3d   : > { %v364_v41 = vld [vmem:[#allocation2 + $0x18] sm:$0xff]  ;;  %v371_v42 = vsub.f32 %v355_v34, %v363_v40  ;;  %v358_v45 = vld [vmem:[%s2399_s12 + $0x28] sm:$0xff]  ;;  %v365_v46 = vld [vmem:[#allocation2 + $0x20] sm:$0xff]  ;;  %s2272_s10 = smov [#allocation4]  }
  0x3e   : > { %v372_v43 = vsub.f32 %v356_v39, %v364_v41  ;;  %v377_v47 = vmul.f32 0.5, %v369_v37  ;;  %v378_v48 = vmul.f32 0.5, %v370_v38  ;;  %v366_v49 = vld [vmem:[#allocation2 + $0x28] sm:$0xff]  ;;  %v373_v50 = vsub.f32 %v357_v44, %v365_v46  ;;  %v359_v51 = vld [vmem:[%s2399_s12 + $0x30] sm:$0xff]  ;;  %v360_v52 = vld [vmem:[%s2399_s12 + $0x38] sm:$0xff]  ;;  %p2174_p2 = pnand %p2173_p1, %p2366_p3  ;;  %s2176_s13 = sshll.u32 %s2272_s10, 4  ;;  %s2177_s13 = int_to_ptr.vmem [resolvable:$false] %s2176_s13 }
  0x3f   : > { %644 = vmatpush1.bf16.msra.mxu0 %v2106_v16  ;;  %717 = vmatpush1.bf16.msra.mxu1 %v2107_v17  ;;  %v2130_v53 = vld [vmem:[%s3153_s1 + $0xe0] ss:$16 sps:$4 sm:$0xff]   ;;  %v2131_v54 = vld [vmem:[%s3153_s1 + $0xe8] ss:$16 sps:$4 sm:$0xff]   ;;  %v379_v55 = vmul.f32 0.5, %v371_v42  ;;  %v374_v57 = vsub.f32 %v358_v45, %v366_v49  ;;  %s2178_s16 = scalar_lea.vmem %s2177_s13, 2048  ;;  %p2179_p5 = scmp.lt.s32.totalorder %s3093_s28, %s2177_s13 }
  0x40   : > { %645 = vmatprep.subr.bf16.mxu0 %v2108_v18  ;;  %718 = vmatprep.subr.bf16.mxu1 %v2110_v19  ;;  %v380_v56 = vmul.f32 0.5, %v372_v43  ;;  %v367_v58 = vld [vmem:[#allocation2 + $0x30] sm:$0xff]  ;;  %v368_v59 = vld [vmem:[#allocation2 + $0x38] sm:$0xff]  ;;  %v385_v60 = vadd.f32 %v377_v47, %v361_v32  ;;  %v386_v61 = vadd.f32 %v378_v48, %v362_v33  ;;  %v381_v62 = vmul.f32 0.5, %v373_v50  ;;  %v2132_v5 = vld [vmem:[%s3156_s4 + $0x40] sm:$0xff]   ;;  %p2175_p4 = pneg %p2174_p2  ;;  %p2180_p6 = scmp.lt.s32.totalorder %s2178_s16, %s2172_s9 }
  0x41   : > { %v375_v63 = vsub.f32 %v359_v51, %v367_v58  ;;  %v2510_v0 = vadd.f32 %v379_v55, %v363_v40  ;;  %v382_v2 = vmul.f32 0.5, %v374_v57  ;;  %v376_v4 = vsub.f32 %v360_v52, %v368_v59  ;;  %v2133_v8 = vld [vmem:[%s3156_s4 + $0xc0] sm:$0xff]   ;;  %v2138_v37 = vld [vmem:[%s3156_s4 + $0x8] sm:$0xff]   ;;  %v2140_v39 = vld [vmem:[%s3156_s4 + $0x50] sm:$0xff]  }
  0x42   : > { %v388_v1 = vadd.f32 %v380_v56, %v364_v41  ;;  %vm393_vm0 = vcmp.ge.f32.partialorder %v385_v60, 1.0  ;;  %vm394_vm1 = vcmp.ge.f32.partialorder %v386_v61, 1.0  ;;  %v2515_v6 = vadd.f32 %v381_v62, %v365_v46  ;;  %v2134_v16 = vld [vmem:[%s3156_s4] sm:$0xff]   ;;  %v2139_v38 = vld [vmem:[%s3156_s4 + $0x88] sm:$0xff]   ;;  %v2141_v46 = vld [vmem:[%s3156_s4 + $0xd0] sm:$0xff]   ;;  %p2181_p7 = por %p2180_p6, %p2179_p5 }
  0x43   : > { %646 = vmatpush1.bf16.msra.mxu0 %v2112_v20  ;;  %719 = vmatpush1.bf16.msra.mxu1 %v2113_v21  ;;  %v383_v7 = vmul.f32 0.5, %v375_v63  ;;  %v1767_v10 = vsel %vm393_vm0, 1.0, %v2270_v9  ;;  %v1768_v11 = vsel %vm394_vm1, 1.0, %v2270_v9  ;;  %vm395_vm2 = vcmp.ge.f32.partialorder %v2510_v0, 1.0  ;;  %vm2535_vm4 = vmpackc.low %vm394_vm1, %vm393_vm0  ;;  %v2135_v21 = vld [vmem:[%s3156_s4 + $0x80] sm:$0xff]   ;;  %v2142_v47 = vld [vmem:[%s3156_s4 + $0x10] sm:$0xff]  }
  0x44   : > { %647 = vmatprep.subr.bf16.mxu0 %v2114_v22  ;;  %720 = vmatprep.subr.bf16.mxu1 %v2116_v23  ;;  %vm396_vm3 = vcmp.ge.f32.partialorder %v388_v1, 1.0  ;;  %v417_v12 = vsub.f32 1.0, %v1767_v10  ;;  %v418_v13 = vsub.f32 1.0, %v1768_v11  ;;  %v1769_v14 = vsel %vm395_vm2, 1.0, %v2270_v9  ;;  %v2143_v51 = vld [vmem:[%s3156_s4 + $0x90] sm:$0xff]   ;;  %v2144_v52 = vld [vmem:[%s3156_s4 + $0x58] sm:$0xff]   ;;  %p2182_p9 = pnand %p2181_p7, %p2175_p4 }
  0x45   : > { %v1770_v15 = vsel %vm396_vm3, 1.0, %v2270_v9  ;;  %v419_v18 = vsub.f32 1.0, %v1769_v14  ;;  %v390_v20 = vadd.f32 %v382_v2, %v366_v49  ;;  %vm397_vm5 = vcmp.ge.f32.partialorder %v2515_v6, 1.0  ;;  %vm2576_vm9 = vmpackc.low %vm396_vm3, %vm395_vm2  ;;  %v2147_v55 = vld [vmem:[%s3156_s4 + $0x98] sm:$0xff]   ;;  %v2148_v56 = vld [vmem:[%s3156_s4 + $0x60] sm:$0xff]  }
  0x46   : > { %v420_v19 = vsub.f32 1.0, %v1770_v15  ;;  %v425_v22 = vmul.f32 %v417_v12, %v385_v60  ;;  %v426_v23 = vmul.f32 %v418_v13, %v386_v61  ;;  %v391_v33 = vadd.f32 %v383_v7, %v367_v58  ;;  %v2149_v57 = vld [vmem:[%s3156_s4 + $0xe0] sm:$0xff]   ;;  %v2153_v60 = vld [vmem:[%s3156_s4 + $0xe8] sm:$0xff]   ;;  %v2156_v63 = vld [vmem:[%s3156_s4 + $0x70] sm:$0xff]  }
  0x47   : > { %648 = vmatpush1.bf16.msra.mxu0 %v2118_v24  ;;  %721 = vmatpush1.bf16.msra.mxu1 %v2119_v25  ;;  %v1771_v24 = vsel %vm397_vm5, 1.0, %v2270_v9  ;;  %v384_v25 = vmul.f32 0.5, %v376_v4  ;;  %v427_v28 = vmul.f32 %v419_v18, %v2510_v0  ;;  %vm398_vm6 = vcmp.ge.f32.partialorder %v390_v20, 1.0  ;;  %v2150_v58 = vld [vmem:[%s3156_s4 + $0x20] sm:$0xff]   ;;  %v2154_v61 = vld [vmem:[%s3156_s4 + $0x28] sm:$0xff]   ;;  %v2157_v0 = vld [vmem:[%s3156_s4 + $0xf0] sm:$0xff]  }
  0x48   : > { %649 = vmatprep.subr.bf16.mxu0 %v2120_v26  ;;  %722 = vmatprep.subr.bf16.mxu1 %v2122_v27  ;;  %v2136_v26 = vld [vmem:[%s3156_s4 + $0x48] sm:$0xff]   ;;  %v428_v29 = vmul.f32 %v420_v19, %v388_v1  ;;  %433 = vst [vmem:[#allocation2] sm:$0xff] %v425_v22  ;;  %434 = vst [vmem:[#allocation2 + $0x8] sm:$0xff] %v426_v23  ;;  %v1772_v32 = vsel %vm398_vm6, 1.0, %v2270_v9  ;;  %vm399_vm7 = vcmp.ge.f32.partialorder %v391_v33, 1.0  ;;  %v2158_v1 = vld [vmem:[%s3156_s4 + $0x30] sm:$0xff]  }
  0x49   : > { %v2137_v27 = vld [vmem:[%s3156_s4 + $0xc8] sm:$0xff]   ;;  %v392_v34 = vadd.f32 %v384_v25, %v368_v59  ;;  %435 = vst [vmem:[#allocation2 + $0x10] sm:$0xff] %v427_v28  ;;  %v1773_v42 = vsel %vm399_vm7, 1.0, %v2270_v9  ;;  %vm2593_vm10 = vmpackc.low %vm398_vm6, %vm397_vm5  ;;  %v2159_v2 = vld [vmem:[%s3156_s4 + $0xb0] sm:$0xff]  }
  0x4a   : > { %436 = vst [vmem:[#allocation2 + $0x18] sm:$0xff] %v428_v29  ;;  %v423_v44 = vsub.f32 1.0, %v1773_v42  ;;  %v2152_v59 = vld [vmem:[%s3156_s4 + $0x68] sm:$0xff]   ;;  %v2160_v4 = vld [vmem:[%s3156_s4 + $0x78] sm:$0xff]   ;;  %v783_v13 = vld [vmem:[%s3154_s2] sm:$0xf] }
  0x4b   : > { %650 = vmatpush1.bf16.msra.mxu0 %v2124_v30  ;;  %723 = vmatpush1.bf16.msra.mxu1 %v2125_v31  ;;  %v421_v30 = vsub.f32 1.0, %v1771_v24  ;;  %v2271_v31 = vmov 1.0|1.0   ;;  %vm400_vm8 = vcmp.ge.f32.partialorder %v392_v34, 1.0  ;;  %v2155_v62 = vld [vmem:[%s3156_s4 + $0xa8] sm:$0xff]   ;;  %v2163_v7 = vld [vmem:[%s3156_s4 + $0xb8] sm:$0xff]  }
  0x4c   : > { %651 = vmatprep.subr.bf16.mxu0 %v2126_v35  ;;  %724 = vmatprep.subr.bf16.mxu1 %v2128_v36  ;;  %v422_v35 = vsub.f32 1.0, %v1772_v32  ;;  %v1774_v43 = vsel %vm400_vm8, 1.0, %v2270_v9  ;;  %v431_v49 = vmul.f32 %v423_v44, %v391_v33  ;;  %vm1813_vm11 = vmpackc.low %vm400_vm8, %vm399_vm7  ;;  %v891_v32 = vld [vmem:[#allocation3] sm:$0xff]  ;;  %v893_v33 = vld [vmem:[#allocation3 + $0x10] sm:$0xff] }
  0x4d   : > { %v429_v36 = vmul.f32 %v421_v30, %v2515_v6  ;;  %v424_v45 = vsub.f32 1.0, %v1774_v43  ;;  %v2162_v6 = vld [vmem:[%s3156_s4 + $0x38] sm:$0xff]   ;;  %v2708_v40 = vld [vmem:[#allocation3 + $0x8] sm:$0xff]  ;;  %v895_v48 = vld [vmem:[#allocation3 + $0x20] sm:$0xff] }
  0x4e   : > { %v430_v41 = vmul.f32 %v422_v35, %v390_v20  ;;  %439 = vst [vmem:[#allocation2 + $0x30] sm:$0xff] %v431_v49  ;;  %v897_v49 = vld [vmem:[#allocation3 + $0x30] sm:$0xff] }
  0x4f   : > { %652 = vmatpush1.bf16.msra.mxu0 %v2130_v53  ;;  %725 = vmatpush1.bf16.msra.mxu1 %v2131_v54  ;;  %437 = vst [vmem:[#allocation2 + $0x20] sm:$0xff] %v429_v36  ;;  %v432_v50 = vmul.f32 %v424_v45, %v392_v34  ;;  %v2145_v53 = vld [vmem:[%s3156_s4 + $0xd8] sm:$0xff]  }
  0x50   : > { %1927 = vmatprep.subr.bf16.mxu0 %v2132_v5  ;;  %1967 = vmatprep.subr.bf16.mxu1 %v2133_v8  ;;  %438 = vst [vmem:[#allocation2 + $0x28] sm:$0xff] %v430_v41  ;;  %v2146_v54 = vld [vmem:[%s3156_s4 + $0x18] sm:$0xff]   ;;  %v785_v8 = vlaneseq }
  0x51   : > { %440 = vst [vmem:[#allocation2 + $0x38] sm:$0xff] %v432_v50  ;;  %v2161_v5 = vld [vmem:[%s3156_s4 + $0xf8] sm:$0xff]  }
  0x52   : > { %1808 = vmatmul.mubr.msk.bf16.vlgmr.msra.gmra.mrb[0].mxu0 %vm2535_vm4, %v2271_v31  ;;  %1816 = vmatmul.mubr.msk.bf16.vlgmr.msra.gmra.mrb[0].mxu1 %vm2535_vm4, %v2271_v31  ;;  %v786_v10 = vshrl.u32 %v785_v8, 7  ;;  %v2710_v41 = vld [vmem:[#allocation3 + $0x18] sm:$0xff] }
  0x53   : > { %679 = vmatprep.mubr.bf16.mxu0 %v2269_v3  ;;  %752 = vmatprep.mubr.bf16.mxu1 %v2269_v3 }
  0x54   : > { %1928 = vmatpush3.bf16.msra.mxu0 %v2134_v16  ;;  %1968 = vmatpush3.bf16.msra.mxu1 %v2135_v21  ;;  %v787_v11 = vsub.s32 0, %v786_v10  ;;  %v795_v12 = vsub.s32 2, %v786_v10  ;;  %v791_v14 = vsub.s32 1, %v786_v10  ;;  %v799_v15 = vsub.s32 3, %v786_v10  ;;  %v837_v16 = vld [vmem:[%s3155_s3] sm:$0xf] }
  0x55   : > { %1929 = vmatprep.subr.bf16.mxu0 %v2136_v26  ;;  %1969 = vmatprep.subr.bf16.mxu1 %v2137_v27 }
  0x56   : > { %v2686_v17 = vrot.slane %v783_v13, %v787_v11  ;;  %v2688_v18 = vrot.slane %v783_v13, %v795_v12  ;;  %v2690_v19 = vrot.slane %v783_v13, %v791_v14  ;;  %v2692_v20 = vrot.slane %v783_v13, %v799_v15 }
  0x57   : > { %v2694_v21 = vrot.slane %v837_v16, %v787_v11  ;;  %v2696_v22 = vrot.slane %v837_v16, %v795_v12  ;;  %v2698_v25 = vrot.slane %v837_v16, %v791_v14  ;;  %v2700_v26 = vrot.slane %v837_v16, %v799_v15 }
  0x58   : > { %1930 = vmatpush3.bf16.msra.mxu0 %v2138_v37  ;;  %1970 = vmatpush3.bf16.msra.mxu1 %v2139_v38 }
  0x59   : > { %1931 = vmatprep.subr.bf16.mxu0 %v2140_v39  ;;  %1971 = vmatprep.subr.bf16.mxu1 %v2141_v46 }
  0x5a   : > { %1810 = vmatmul.mubr.msk.bf16.gmra.mrb[4].mxu0 %vm2576_vm9, %v2271_v31  ;;  %1818 = vmatmul.mubr.msk.bf16.gmra.mrb[4].mxu1 %vm2576_vm9, %v2271_v31 }
  0x5b   : > { %689 = vmatprep.mubr.bf16.mxu0 %v2269_v3  ;;  %762 = vmatprep.mubr.bf16.mxu1 %v2269_v3 }
  0x5c   : > { %1932 = vmatpush3.bf16.msra.mxu0 %v2142_v47  ;;  %1972 = vmatpush3.bf16.msra.mxu1 %v2143_v51 }
  0x5d   : > { %1933 = vmatprep.subr.bf16.mxu0 %v2144_v52  ;;  %1973 = vmatprep.subr.bf16.mxu1 %v2145_v53 }
  0x60   : > { %1934 = vmatpush3.bf16.msra.mxu0 %v2146_v54  ;;  %1974 = vmatpush3.bf16.msra.mxu1 %v2147_v55 }
  0x61   : > { %1935 = vmatprep.subr.bf16.mxu0 %v2148_v56  ;;  %1975 = vmatprep.subr.bf16.mxu1 %v2149_v57  ;;  %v2720_v56 = vld [vmem:[#allocation3 + $0x28] sm:$0xff]  ;;  %v2722_v57 = vld [vmem:[#allocation3 + $0x38] sm:$0xff] }
  0x62   : > { %1812 = vmatmul.mubr.msk.bf16.gmra.mrb[8].mxu0 %vm2593_vm10, %v2271_v31  ;;  %1820 = vmatmul.mubr.msk.bf16.gmra.mrb[8].mxu1 %vm2593_vm10, %v2271_v31 }
  0x63   : > { %699 = vmatprep.mubr.bf16.mxu0 %v2269_v3  ;;  %772 = vmatprep.mubr.bf16.mxu1 %v2269_v3  ;;  %v2151_v3 = vld [vmem:[%s3156_s4 + $0xa0] sm:$0xff]  }
  0x64   : > { %1936 = vmatpush3.bf16.msra.mxu0 %v2150_v58  ;;  %1976 = vmatpush3.bf16.msra.mxu1 %v2151_v3 }
  0x65   : > { %1937 = vmatprep.subr.bf16.mxu0 %v2152_v59  ;;  %1977 = vmatprep.subr.bf16.mxu1 %v2153_v60 }
  0x68   : > { %1938 = vmatpush3.bf16.msra.mxu0 %v2154_v61  ;;  %1978 = vmatpush3.bf16.msra.mxu1 %v2155_v62 }
  0x69   : > { %1939 = vmatprep.subr.bf16.mxu0 %v2156_v63  ;;  %1979 = vmatprep.subr.bf16.mxu1 %v2157_v0 }
  0x6a   : > { %1814 = vmatmul.mubr.msk.bf16.gmra.mrb[12].mxu0 %vm1813_vm11, %v2271_v31  ;;  %1822 = vmatmul.mubr.msk.bf16.gmra.mrb[12].mxu1 %vm1813_vm11, %v2271_v31 }
  0x6c   : > { %1940 = vmatpush3.bf16.msra.mxu0 %v2158_v1  ;;  %1980 = vmatpush3.bf16.msra.mxu1 %v2159_v2 }
  0x6d   : > { %1941 = vmatprep.subr.bf16.mxu0 %v2160_v4  ;;  %1981 = vmatprep.subr.bf16.mxu1 %v2161_v5 }
  0x70   : > { %1942 = vmatpush3.bf16.msra.mxu0 %v2162_v6  ;;  %1982 = vmatpush3.bf16.msra.mxu1 %v2163_v7 }
 0x125   : > { %v671_v23 = vpop.f32.mrb[0].mxu0  ;;  %v744_v24 = vpop.f32.mrb[0].mxu1 }
 0x126   : > { %v805_v27 = vmul.f32 %v2686_v17, %v671_v23  ;;  %v807_v28 = vmul.f32 %v2688_v18, %v744_v24  ;;  %v673_v29 = vpop.f32.mrb[1].mxu0  ;;  %v746_v30 = vpop.f32.mrb[1].mxu1 }
 0x127   : > { %v806_v34 = vmul.f32 %v2690_v19, %v673_v29  ;;  %v808_v35 = vmul.f32 %v2692_v20, %v746_v30  ;;  %v675_v36 = vpop.f32.mrb[2].mxu0  ;;  %v748_v37 = vpop.f32.mrb[2].mxu1 }
 0x128   : > { %v859_v38 = vadd.f32 %v2694_v21, %v805_v27  ;;  %v861_v39 = vadd.f32 %v2696_v22, %v807_v28  ;;  %v809_v42 = vmul.f32 %v2686_v17, %v675_v36  ;;  %v811_v43 = vmul.f32 %v2688_v18, %v748_v37  ;;  %v677_v44 = vpop.f32.mrb[3].mxu0  ;;  %v750_v45 = vpop.f32.mrb[3].mxu1 }
 0x129   : > { %v860_v46 = vadd.f32 %v2698_v25, %v806_v34  ;;  %v862_v47 = vadd.f32 %v2700_v26, %v808_v35  ;;  %v810_v50 = vmul.f32 %v2690_v19, %v677_v44  ;;  %v812_v51 = vmul.f32 %v2692_v20, %v750_v45 }
 0x12a   : > { %v923_v52 = vsub.f32 %v859_v38, %v891_v32  ;;  %v925_v53 = vsub.f32 %v861_v39, %v893_v33  ;;  %v863_v54 = vadd.f32 %v2694_v21, %v809_v42  ;;  %v865_v55 = vadd.f32 %v2696_v22, %v811_v43 }
 0x12b   : > { %v924_v58 = vsub.f32 %v860_v46, %v2708_v40  ;;  %v926_v3 = vsub.f32 %v862_v47, %v2710_v41  ;;  %v864_v59 = vadd.f32 %v2698_v25, %v810_v50  ;;  %v866_v60 = vadd.f32 %v2700_v26, %v812_v51 }
 0x12c   : > { %v955_v61 = vmul.f32 0.5, %v923_v52  ;;  %v957_v62 = vmul.f32 0.5, %v925_v53  ;;  %v927_v63 = vsub.f32 %v863_v54, %v895_v48  ;;  %v929_v0 = vsub.f32 %v865_v55, %v897_v49 }
 0x12d   : > { %v2728_v1 = vmul.f32 0.5, %v924_v58  ;;  %v2730_v2 = vmul.f32 0.5, %v926_v3  ;;  %v928_v4 = vsub.f32 %v864_v59, %v2720_v56  ;;  %v930_v5 = vsub.f32 %v866_v60, %v2722_v57  ;;  %v681_v6 = vpop.f32.mrb[4].mxu0  ;;  %v754_v7 = vpop.f32.mrb[4].mxu1 }
 0x12e   : > { %v987_v8 = vadd.f32 %v955_v61, %v891_v32  ;;  %v989_v10 = vadd.f32 %v957_v62, %v893_v33  ;;  %v959_v11 = vmul.f32 0.5, %v927_v63  ;;  %v961_v12 = vmul.f32 0.5, %v929_v0  ;;  %v683_v13 = vpop.f32.mrb[5].mxu0  ;;  %v756_v14 = vpop.f32.mrb[5].mxu1  ;;  %v2740_v32 = vld [vmem:[#allocation3 + $0x40] sm:$0xff]  ;;  %v2742_v33 = vld [vmem:[#allocation3 + $0x50] sm:$0xff] }
 0x12f   : > { %v2734_v15 = vmul.f32 0.5, %v928_v4  ;;  %v2736_v16 = vmul.f32 0.5, %v930_v5  ;;  %v813_v23 = vmul.f32 %v2686_v17, %v681_v6  ;;  %v815_v24 = vmul.f32 %v2688_v18, %v754_v7  ;;  %v685_v27 = vpop.f32.mrb[6].mxu0  ;;  %v758_v28 = vpop.f32.mrb[6].mxu1  ;;  %v2770_v63 = vld [vmem:[#allocation3 + $0x48] sm:$0xff]  ;;  %v2772_v0 = vld [vmem:[#allocation3 + $0x58] sm:$0xff] }
 0x130   : > { %vm1019_vm12 = vcmp.ge.f32.partialorder %v987_v8, 1.0  ;;  %vm1021_vm13 = vcmp.ge.f32.partialorder %v989_v10, 1.0  ;;  %v991_v29 = vadd.f32 %v959_v11, %v895_v48  ;;  %v993_v30 = vadd.f32 %v961_v12, %v897_v49  ;;  %v687_v34 = vpop.f32.mrb[7].mxu0  ;;  %v760_v35 = vpop.f32.mrb[7].mxu1  ;;  %v2778_v11 = vld [vmem:[#allocation3 + $0x60] sm:$0xff]  ;;  %v2780_v12 = vld [vmem:[#allocation3 + $0x70] sm:$0xff] }
 0x131   : > { %v1823_v36 = vsel %vm1019_vm12, 1.0, %v2270_v9  ;;  %v1825_v37 = vsel %vm1021_vm13, 1.0, %v2270_v9  ;;  %v867_v38 = vadd.f32 %v2694_v21, %v813_v23  ;;  %v869_v39 = vadd.f32 %v2696_v22, %v815_v24  ;;  %v2878_v48 = vld [vmem:[#allocation3 + $0xa0] sm:$0xff] }
 0x132   : > { %v1115_v42 = vsub.f32 1.0, %v1823_v36  ;;  %v1117_v43 = vsub.f32 1.0, %v1825_v37  ;;  %vm1023_vm14 = vcmp.ge.f32.partialorder %v991_v29, 1.0  ;;  %vm1025_vm15 = vcmp.ge.f32.partialorder %v993_v30, 1.0 }
 0x133   : > { %v1827_v44 = vsel %vm1023_vm14, 1.0, %v2270_v9  ;;  %v1829_v45 = vsel %vm1025_vm15, 1.0, %v2270_v9  ;;  %v931_v46 = vsub.f32 %v867_v38, %v2740_v32  ;;  %v933_v47 = vsub.f32 %v869_v39, %v2742_v33  ;;  %vm2755_vm0 = vmpackc.low %vm1023_vm14, %vm1019_vm12 }
 0x134   : > { %v1147_v49 = vmul.f32 %v1115_v42, %v987_v8  ;;  %v1149_v50 = vmul.f32 %v1117_v43, %v989_v10  ;;  %v1119_v51 = vsub.f32 1.0, %v1827_v44  ;;  %v1121_v52 = vsub.f32 1.0, %v1829_v45  ;;  %vm2760_vm1 = vmpackc.low %vm1025_vm15, %vm1021_vm13  ;;  %v2804_v44 = vld [vmem:[#allocation3 + $0x80] sm:$0xff]  ;;  %v2806_v45 = vld [vmem:[#allocation3 + $0x90] sm:$0xff] }
 0x135   : > { %v2764_v54 = vmul.f32 0.5, %v931_v46  ;;  %v2766_v55 = vmul.f32 0.5, %v933_v47  ;;  %v814_v58 = vmul.f32 %v2690_v19, %v683_v13  ;;  %v816_v3 = vmul.f32 %v2692_v20, %v756_v14  ;;  %v691_v59 = vpop.f32.mrb[8].mxu0  ;;  %v764_v60 = vpop.f32.mrb[8].mxu1 }
 0x136   : > { %1179 = vst [vmem:[#allocation3] sm:$0xff] %v1147_v49  ;;  %1181 = vst [vmem:[#allocation3 + $0x10] sm:$0xff] %v1149_v50  ;;  %v1151_v61 = vmul.f32 %v1119_v51, %v991_v29  ;;  %v1153_v62 = vmul.f32 %v1121_v52, %v993_v30  ;;  %v817_v4 = vmul.f32 %v2686_v17, %v685_v27  ;;  %v693_v6 = vpop.f32.mrb[9].mxu0  ;;  %v766_v7 = vpop.f32.mrb[9].mxu1  ;;  %v2790_v29 = vld [vmem:[#allocation3 + $0x68] sm:$0xff]  ;;  %v2792_v30 = vld [vmem:[#allocation3 + $0x78] sm:$0xff] }
 0x137   : > { %v819_v5 = vmul.f32 %v2688_v18, %v758_v28  ;;  %v868_v8 = vadd.f32 %v2698_v25, %v814_v58  ;;  %v870_v10 = vadd.f32 %v2700_v26, %v816_v3  ;;  %v818_v13 = vmul.f32 %v2690_v19, %v687_v34  ;;  %v2784_v23 = vpop.f32.mrb[10].mxu0  ;;  %v2786_v24 = vpop.f32.mrb[10].mxu1 }
 0x138   : > { %v820_v14 = vmul.f32 %v2692_v20, %v760_v35  ;;  %1183 = vst [vmem:[#allocation3 + $0x20] sm:$0xff] %v1151_v61  ;;  %1185 = vst [vmem:[#allocation3 + $0x30] sm:$0xff] %v1153_v62  ;;  %v871_v27 = vadd.f32 %v2694_v21, %v817_v4  ;;  %v821_v36 = vmul.f32 %v2686_v17, %v691_v59  ;;  %v2796_v37 = vpop.f32.mrb[11].mxu0  ;;  %v2798_v35 = vpop.f32.mrb[11].mxu1 }
 0x139   : > { %v873_v28 = vadd.f32 %v2696_v22, %v819_v5  ;;  %v823_v34 = vmul.f32 %v2688_v18, %v764_v60  ;;  %v932_v38 = vsub.f32 %v868_v8, %v2770_v63  ;;  %v934_v39 = vsub.f32 %v870_v10, %v2772_v0 }
 0x13a   : > { %v872_v42 = vadd.f32 %v2698_v25, %v818_v13  ;;  %v874_v43 = vadd.f32 %v2700_v26, %v820_v14  ;;  %v935_v46 = vsub.f32 %v871_v27, %v2778_v11  ;;  %v875_v49 = vadd.f32 %v2694_v21, %v821_v36 }
 0x13b   : > { %v937_v47 = vsub.f32 %v873_v28, %v2780_v12  ;;  %v877_v50 = vadd.f32 %v2696_v22, %v823_v34  ;;  %v2812_v51 = vmul.f32 0.5, %v932_v38  ;;  %v2814_v52 = vmul.f32 0.5, %v934_v39 }
 0x13c   : > { %v936_v58 = vsub.f32 %v872_v42, %v2790_v29  ;;  %v938_v3 = vsub.f32 %v874_v43, %v2792_v30  ;;  %v2818_v59 = vmul.f32 0.5, %v935_v46  ;;  %v939_v61 = vsub.f32 %v875_v49, %v2804_v44  ;;  %v2859_v46 = vld [vmem:[#allocation3 + $0x88] sm:$0xff] }
 0x13d   : > { %v2820_v60 = vmul.f32 0.5, %v937_v47  ;;  %v941_v62 = vsub.f32 %v877_v50, %v2806_v45  ;;  %v988_v8 = vadd.f32 %v2728_v1, %v2708_v40  ;;  %v992_v10 = vadd.f32 %v2734_v15, %v2720_v56  ;;  %v701_v13 = vpop.f32.mrb[12].mxu0  ;;  %v774_v14 = vpop.f32.mrb[12].mxu1  ;;  %v2861_v47 = vld [vmem:[#allocation3 + $0x98] sm:$0xff] }
 0x13e   : > { %v2824_v4 = vmul.f32 0.5, %v936_v58  ;;  %v2826_v5 = vmul.f32 0.5, %v938_v3  ;;  %v2832_v27 = vmul.f32 0.5, %v939_v61  ;;  %v990_v36 = vadd.f32 %v2730_v2, %v2710_v41  ;;  %v2840_v38 = vpop.f32.mrb[13].mxu0  ;;  %v2842_v39 = vpop.f32.mrb[13].mxu1 }
 0x13f   : > { %v2834_v28 = vmul.f32 0.5, %v941_v62  ;;  %v994_v34 = vadd.f32 %v2736_v16, %v2722_v57  ;;  %vm1020_vm2 = vcmp.ge.f32.partialorder %v988_v8, 1.0  ;;  %vm1024_vm3 = vcmp.ge.f32.partialorder %v992_v10, 1.0  ;;  %v2846_v1 = vpop.f32.mrb[14].mxu0  ;;  %v2848_v15 = vpop.f32.mrb[14].mxu1 }
 0x140   : > { %v822_v40 = vmul.f32 %v2690_v19, %v693_v6  ;;  %v824_v56 = vmul.f32 %v2692_v20, %v766_v7  ;;  %v1824_v42 = vsel %vm1020_vm2, 1.0, %v2270_v9  ;;  %v1828_v41 = vsel %vm1024_vm3, 1.0, %v2270_v9  ;;  %vm1887_vm4 = vmpackc.low %vm1024_vm3, %vm1020_vm2  ;;  %v2852_v57 = vpop.f32.mrb[15].mxu0  ;;  %v2854_v2 = vpop.f32.mrb[15].mxu1 }
 0x141   : > { %vm1022_vm5 = vcmp.ge.f32.partialorder %v990_v36, 1.0  ;;  %vm1026_vm6 = vcmp.ge.f32.partialorder %v994_v34, 1.0  ;;  %v1116_v16 = vsub.f32 1.0, %v1824_v42  ;;  %v1120_v43 = vsub.f32 1.0, %v1828_v41  ;;  %1888 = vmatprep.mubr.msk.bf16.mxu0 %vm1887_vm4, %v2271_v31 }
 0x142   : > { %v1826_v6 = vsel %vm1022_vm5, 1.0, %v2270_v9  ;;  %v1830_v7 = vsel %vm1026_vm6, 1.0, %v2270_v9  ;;  %vm1903_vm7 = vmpackc.low %vm1026_vm6, %vm1022_vm5  ;;  %v876_v58 = vadd.f32 %v2698_v25, %v822_v40  ;;  %v878_v3 = vadd.f32 %v2700_v26, %v824_v56  ;;  %1890 = vmatmul.mubr.msk.bf16.vlgmr.msra.gmra.mrb[16].mxu0 %vm2755_vm0, %v2271_v31 }
 0x143   : > { %v1118_v49 = vsub.f32 1.0, %v1826_v6  ;;  %v1122_v50 = vsub.f32 1.0, %v1830_v7  ;;  %1904 = vmatprep.mubr.msk.bf16.mxu1 %vm1903_vm7, %v2271_v31  ;;  %v1148_v61 = vmul.f32 %v1116_v16, %v988_v8  ;;  %v1152_v62 = vmul.f32 %v1120_v43, %v992_v10  ;;  %v2880_v8 = vld [vmem:[#allocation3 + $0xb0] sm:$0xff]  ;;  %v2892_v16 = vld [vmem:[#allocation3 + $0xa8] sm:$0xff]  ;;  %v2894_v43 = vld [vmem:[#allocation3 + $0xb8] sm:$0xff] }
 0x144   : > { %1906 = vmatmul.mubr.msk.bf16.vlgmr.msra.gmra.mrb[16].mxu1 %vm2760_vm1, %v2271_v31  ;;  %v825_v42 = vmul.f32 %v2686_v17, %v2784_v23  ;;  %v827_v41 = vmul.f32 %v2688_v18, %v2786_v24  ;;  %v940_v56 = vsub.f32 %v876_v58, %v2859_v46  ;;  %v942_v7 = vsub.f32 %v878_v3, %v2861_v47 }
 0x145   : > { %v1150_v6 = vmul.f32 %v1118_v49, %v990_v36  ;;  %v1154_v40 = vmul.f32 %v1122_v50, %v994_v34  ;;  %1180 = vst [vmem:[#allocation3 + $0x8] sm:$0xff] %v1148_v61  ;;  %1184 = vst [vmem:[#allocation3 + $0x28] sm:$0xff] %v1152_v62  ;;  %v826_v23 = vmul.f32 %v2690_v19, %v2796_v37  ;;  %v2902_v61 = vld [vmem:[#allocation3 + $0xc0] sm:$0xff]  ;;  %v2904_v62 = vld [vmem:[#allocation3 + $0xd0] sm:$0xff] }
 0x146   : > { %v879_v53 = vadd.f32 %v2694_v21, %v825_v42  ;;  %v881_v10 = vadd.f32 %v2696_v22, %v827_v41  ;;  %v828_v24 = vmul.f32 %v2692_v20, %v2798_v35  ;;  %v2888_v36 = vmul.f32 0.5, %v940_v56 }
 0x147   : > { %1182 = vst [vmem:[#allocation3 + $0x18] sm:$0xff] %v1150_v6  ;;  %1186 = vst [vmem:[#allocation3 + $0x38] sm:$0xff] %v1154_v40  ;;  %v2890_v34 = vmul.f32 0.5, %v942_v7  ;;  %v829_v49 = vmul.f32 %v2686_v17, %v701_v13  ;;  %v831_v50 = vmul.f32 %v2688_v18, %v774_v14  ;;  %v880_v35 = vadd.f32 %v2698_v25, %v826_v23 }
 0x148   : > { %v943_v58 = vsub.f32 %v879_v53, %v2878_v48  ;;  %v945_v37 = vsub.f32 %v881_v10, %v2880_v8  ;;  %v882_v3 = vadd.f32 %v2700_v26, %v828_v24  ;;  %v996_v13 = vadd.f32 %v2812_v51, %v2770_v63 }
 0x149   : > { %v883_v42 = vadd.f32 %v2694_v21, %v829_v49  ;;  %v885_v41 = vadd.f32 %v2696_v22, %v831_v50  ;;  %v1000_v14 = vadd.f32 %v2824_v4, %v2790_v29  ;;  %v944_v56 = vsub.f32 %v880_v35, %v2892_v16 }
 0x14a   : > { %v2912_v6 = vmul.f32 0.5, %v943_v58  ;;  %v2914_v40 = vmul.f32 0.5, %v945_v37  ;;  %v946_v7 = vsub.f32 %v882_v3, %v2894_v43  ;;  %vm1028_vm8 = vcmp.ge.f32.partialorder %v996_v13, 1.0 }
 0x14b   : > { %v947_v53 = vsub.f32 %v883_v42, %v2902_v61  ;;  %v949_v10 = vsub.f32 %v885_v41, %v2904_v62  ;;  %vm1032_vm9 = vcmp.ge.f32.partialorder %v1000_v14, 1.0  ;;  %v2920_v23 = vmul.f32 0.5, %v944_v56  ;;  %v2939_v56 = vld [vmem:[#allocation3 + $0xc8] sm:$0xff] }
 0x14c   : > { %v2922_v63 = vmul.f32 0.5, %v946_v7  ;;  %v1832_v29 = vsel %vm1028_vm8, 1.0, %v2270_v9  ;;  %v1836_v51 = vsel %vm1032_vm9, 1.0, %v2270_v9  ;;  %vm1891_vm10 = vmpackc.low %vm1032_vm9, %vm1028_vm8  ;;  %v998_v58 = vadd.f32 %v2814_v52, %v2772_v0  ;;  %v2941_v7 = vld [vmem:[#allocation3 + $0xd8] sm:$0xff] }
 0x14d   : > { %v2926_v4 = vmul.f32 0.5, %v947_v53  ;;  %v2928_v24 = vmul.f32 0.5, %v949_v10  ;;  %v1124_v49 = vsub.f32 1.0, %v1832_v29  ;;  %v1128_v50 = vsub.f32 1.0, %v1836_v51  ;;  %1892 = vmatprep.mubr.msk.bf16.mxu0 %vm1891_vm10, %v2271_v31 }
 0x14e   : > { %v1002_v37 = vadd.f32 %v2826_v5, %v2792_v30  ;;  %v830_v35 = vmul.f32 %v2690_v19, %v2840_v38  ;;  %v832_v3 = vmul.f32 %v2692_v20, %v2842_v39  ;;  %v995_v53 = vadd.f32 %v2764_v54, %v2740_v32 }
 0x14f   : > { %v1156_v42 = vmul.f32 %v1124_v49, %v996_v13  ;;  %v1160_v41 = vmul.f32 %v1128_v50, %v1000_v14  ;;  %v999_v0 = vadd.f32 %v2818_v59, %v2778_v11  ;;  %vm1030_vm11 = vcmp.ge.f32.partialorder %v998_v58, 1.0 }
 0x150   : > { %vm1034_vm12 = vcmp.ge.f32.partialorder %v1002_v37, 1.0  ;;  %v884_v30 = vadd.f32 %v2698_v25, %v830_v35  ;;  %v886_v52 = vadd.f32 %v2700_v26, %v832_v3  ;;  %v1834_v5 = vsel %vm1030_vm11, 1.0, %v2270_v9 }
 0x151   : > { %1188 = vst [vmem:[#allocation3 + $0x48] sm:$0xff] %v1156_v42  ;;  %1192 = vst [vmem:[#allocation3 + $0x68] sm:$0xff] %v1160_v41  ;;  %v1838_v38 = vsel %vm1034_vm12, 1.0, %v2270_v9  ;;  %vm1027_vm14 = vcmp.ge.f32.partialorder %v995_v53, 1.0  ;;  %vm1031_vm15 = vcmp.ge.f32.partialorder %v999_v0, 1.0  ;;  %v1126_v39 = vsub.f32 1.0, %v1834_v5 }
 0x152   : > { %vm1907_vm13 = vmpackc.low %vm1034_vm12, %vm1030_vm11  ;;  %v1130_v32 = vsub.f32 1.0, %v1838_v38  ;;  %v948_v54 = vsub.f32 %v884_v30, %v2939_v56  ;;  %v950_v11 = vsub.f32 %v886_v52, %v2941_v7  ;;  %v1831_v59 = vsel %vm1027_vm14, 1.0, %v2270_v9  ;;  %v2972_v30 = vld [vmem:[#allocation3 + $0xe0] sm:$0xff]  ;;  %v2974_v52 = vld [vmem:[#allocation3 + $0xf0] sm:$0xff] }
 0x153   : > { %1908 = vmatprep.mubr.msk.bf16.mxu1 %vm1907_vm13, %v2271_v31  ;;  %vm1893_vm0 = vmpackc.low %vm1031_vm15, %vm1027_vm14  ;;  %v1835_v13 = vsel %vm1031_vm15, 1.0, %v2270_v9  ;;  %v997_v14 = vadd.f32 %v2766_v55, %v2742_v33  ;;  %v1001_v10 = vadd.f32 %v2820_v60, %v2780_v12  ;;  %v1158_v29 = vmul.f32 %v1126_v39, %v998_v58 }
 0x154   : > { %1894 = vmatmul.mubr.msk.bf16.gmra.mrb[20].mxu0 %vm1893_vm0, %v2271_v31  ;;  %v1162_v51 = vmul.f32 %v1130_v32, %v1002_v37  ;;  %v2961_v49 = vmul.f32 0.5, %v948_v54  ;;  %v2963_v50 = vmul.f32 0.5, %v950_v11  ;;  %v1123_v35 = vsub.f32 1.0, %v1831_v59 }
 0x155   : > { %v1127_v3 = vsub.f32 1.0, %v1835_v13  ;;  %vm1029_vm1 = vcmp.ge.f32.partialorder %v997_v14, 1.0  ;;  %vm1033_vm2 = vcmp.ge.f32.partialorder %v1001_v10, 1.0  ;;  %1190 = vst [vmem:[#allocation3 + $0x58] sm:$0xff] %v1158_v29  ;;  %v833_v33 = vmul.f32 %v2686_v17, %v2846_v1 }
 0x156   : > { %1194 = vst [vmem:[#allocation3 + $0x78] sm:$0xff] %v1162_v51  ;;  %v1833_v42 = vsel %vm1029_vm1, 1.0, %v2270_v9  ;;  %v1837_v41 = vsel %vm1033_vm2, 1.0, %v2270_v9  ;;  %vm1909_vm3 = vmpackc.low %vm1033_vm2, %vm1029_vm1  ;;  %v835_v55 = vmul.f32 %v2688_v18, %v2848_v15  ;;  %v1155_v12 = vmul.f32 %v1123_v35, %v995_v53  ;;  %v920_v53 = vld [vmem:[#allocation3 + $0xe8] sm:$0xff] }
 0x157   : > { %v1159_v60 = vmul.f32 %v1127_v3, %v999_v0  ;;  %v1125_v58 = vsub.f32 1.0, %v1833_v42  ;;  %v1129_v37 = vsub.f32 1.0, %v1837_v41  ;;  %1910 = vmatmul.mubr.msk.bf16.gmra.mrb[20].mxu1 %vm1909_vm3, %v2271_v31  ;;  %v887_v5 = vadd.f32 %v2694_v21, %v833_v33  ;;  %v2982_v0 = vld [vmem:[#allocation3 + $0xf8] sm:$0xff] }
 0x158   : > { %v889_v38 = vadd.f32 %v2696_v22, %v835_v55  ;;  %v834_v17 = vmul.f32 %v2690_v19, %v2852_v57  ;;  %v836_v18 = vmul.f32 %v2692_v20, %v2854_v2  ;;  %1187 = vst [vmem:[#allocation3 + $0x40] sm:$0xff] %v1155_v12  ;;  %v1004_v39 = vadd.f32 %v2888_v36, %v2859_v46 }
 0x159   : > { %1191 = vst [vmem:[#allocation3 + $0x60] sm:$0xff] %v1159_v60  ;;  %v1157_v1 = vmul.f32 %v1125_v58, %v997_v14  ;;  %v1161_v15 = vmul.f32 %v1129_v37, %v1001_v10  ;;  %v1008_v21 = vadd.f32 %v2920_v23, %v2892_v16  ;;  %v951_v22 = vsub.f32 %v887_v5, %v2972_v30 }
 0x15a   : > { %v953_v19 = vsub.f32 %v889_v38, %v2974_v52  ;;  %v888_v57 = vadd.f32 %v2698_v25, %v834_v17  ;;  %v890_v20 = vadd.f32 %v2700_v26, %v836_v18  ;;  %vm1036_vm4 = vcmp.ge.f32.partialorder %v1004_v39, 1.0 }
 0x15b   : > { %1189 = vst [vmem:[#allocation3 + $0x50] sm:$0xff] %v1157_v1  ;;  %1193 = vst [vmem:[#allocation3 + $0x70] sm:$0xff] %v1161_v15  ;;  %vm1040_vm5 = vcmp.ge.f32.partialorder %v1008_v21, 1.0  ;;  %v1006_v2 = vadd.f32 %v2890_v34, %v2861_v47  ;;  %v1010_v46 = vadd.f32 %v2922_v63, %v2894_v43  ;;  %v2996_v36 = vmul.f32 0.5, %v951_v22 }
 0x15c   : > { %v2998_v16 = vmul.f32 0.5, %v953_v19  ;;  %v952_v23 = vsub.f32 %v888_v57, %v920_v53  ;;  %v954_v32 = vsub.f32 %v890_v20, %v2982_v0  ;;  %vm1895_vm6 = vmpackc.low %vm1040_vm5, %vm1036_vm4  ;;  %v1840_v25 = vsel %vm1036_vm4, 1.0, %v2270_v9 }
 0x15d   : > { %v1844_v26 = vsel %vm1040_vm5, 1.0, %v2270_v9  ;;  %1896 = vmatprep.mubr.msk.bf16.mxu0 %vm1895_vm6, %v2271_v31  ;;  %vm1038_vm7 = vcmp.ge.f32.partialorder %v1006_v2, 1.0  ;;  %vm1042_vm8 = vcmp.ge.f32.partialorder %v1010_v46, 1.0  ;;  %v1132_v54 = vsub.f32 1.0, %v1840_v25 }
 0x15e   : > { %v984_v47 = vmul.f32 0.5, %v952_v23  ;;  %v986_v34 = vmul.f32 0.5, %v954_v32  ;;  %v1136_v43 = vsub.f32 1.0, %v1844_v26  ;;  %vm1911_vm9 = vmpackc.low %vm1042_vm8, %vm1038_vm7  ;;  %v1842_v63 = vsel %vm1038_vm7, 1.0, %v2270_v9 }
 0x15f   : > { %v1846_v11 = vsel %vm1042_vm8, 1.0, %v2270_v9  ;;  %1912 = vmatprep.mubr.msk.bf16.mxu1 %vm1911_vm9, %v2271_v31  ;;  %v1003_v59 = vadd.f32 %v2832_v27, %v2804_v44  ;;  %v1007_v13 = vadd.f32 %v2912_v6, %v2878_v48  ;;  %v1164_v14 = vmul.f32 %v1132_v54, %v1004_v39 }
 0x160   : > { %v1168_v10 = vmul.f32 %v1136_v43, %v1008_v21  ;;  %v1134_v29 = vsub.f32 1.0, %v1842_v63  ;;  %v1138_v51 = vsub.f32 1.0, %v1846_v11  ;;  %v1005_v35 = vadd.f32 %v2834_v28, %v2806_v45 }
 0x161   : > { %vm1035_vm10 = vcmp.ge.f32.partialorder %v1003_v59, 1.0  ;;  %vm1039_vm11 = vcmp.ge.f32.partialorder %v1007_v13, 1.0  ;;  %v1009_v3 = vadd.f32 %v2914_v40, %v2880_v8  ;;  %1196 = vst [vmem:[#allocation3 + $0x88] sm:$0xff] %v1164_v14  ;;  %v1012_v8 = vadd.f32 %v2961_v49, %v2939_v56 }
 0x162   : > { %1200 = vst [vmem:[#allocation3 + $0xa8] sm:$0xff] %v1168_v10  ;;  %v1166_v42 = vmul.f32 %v1134_v29, %v1006_v2  ;;  %v1170_v41 = vmul.f32 %v1138_v51, %v1010_v46  ;;  %v1839_v44 = vsel %vm1035_vm10, 1.0, %v2270_v9  ;;  %v1843_v27 = vsel %vm1039_vm11, 1.0, %v2270_v9  ;;  %vm1897_vm12 = vmpackc.low %vm1039_vm11, %vm1035_vm10  ;;  %v3054_v29 = vld [vmem:[%s3158_s6] ss:$0 sm:$0xff] }
 0x163   : > { %v1131_v48 = vsub.f32 1.0, %v1839_v44  ;;  %v1135_v6 = vsub.f32 1.0, %v1843_v27  ;;  %1898 = vmatmul.mubr.msk.bf16.gmra.mrb[24].mxu0 %vm1897_vm12, %v2271_v31  ;;  %vm1037_vm13 = vcmp.ge.f32.partialorder %v1005_v35, 1.0  ;;  %vm1041_vm14 = vcmp.ge.f32.partialorder %v1009_v3, 1.0 }
 0x164   : > { %1198 = vst [vmem:[#allocation3 + $0x98] sm:$0xff] %v1166_v42  ;;  %1202 = vst [vmem:[#allocation3 + $0xb8] sm:$0xff] %v1170_v41  ;;  %v1841_v45 = vsel %vm1037_vm13, 1.0, %v2270_v9  ;;  %v1845_v28 = vsel %vm1041_vm14, 1.0, %v2270_v9  ;;  %v1016_v40 = vadd.f32 %v984_v47, %v920_v53  ;;  %vm1044_vm0 = vcmp.ge.f32.partialorder %v1012_v8, 1.0  ;;  %v2164_v41 = vld [vmem:[%s2399_s12] sm:$0xff] }
 0x165   : > { %vm1913_vm15 = vmpackc.low %vm1041_vm14, %vm1037_vm13  ;;  %v1163_v33 = vmul.f32 %v1131_v48, %v1003_v59  ;;  %v1167_v55 = vmul.f32 %v1135_v6, %v1007_v13  ;;  %v1133_v12 = vsub.f32 1.0, %v1841_v45  ;;  %v1137_v60 = vsub.f32 1.0, %v1845_v28  ;;  %v2165_v48 = vld [vmem:[%s2399_s12 + $0x8] sm:$0xff] }
 0x166   : > { %1914 = vmatmul.mubr.msk.bf16.gmra.mrb[24].mxu1 %vm1913_vm15, %v2271_v31  ;;  %vm1048_vm1 = vcmp.ge.f32.partialorder %v1016_v40, 1.0  ;;  %v1014_v58 = vadd.f32 %v2963_v50, %v2941_v7  ;;  %v1018_v37 = vadd.f32 %v986_v34, %v2982_v0  ;;  %v1848_v56 = vsel %vm1044_vm0, 1.0, %v2270_v9 }
 0x167   : > { %1195 = vst [vmem:[#allocation3 + $0x80] sm:$0xff] %v1163_v33  ;;  %1199 = vst [vmem:[#allocation3 + $0xa0] sm:$0xff] %v1167_v55  ;;  %v1165_v5 = vmul.f32 %v1133_v12, %v1005_v35  ;;  %v1169_v38 = vmul.f32 %v1137_v60, %v1009_v3  ;;  %v1852_v49 = vsel %vm1048_vm1, 1.0, %v2270_v9  ;;  %v1140_v17 = vsub.f32 1.0, %v1848_v56 }
 0x168   : > { %vm1899_vm2 = vmpackc.low %vm1048_vm1, %vm1044_vm0  ;;  %v1144_v18 = vsub.f32 1.0, %v1852_v49  ;;  %vm1046_vm3 = vcmp.ge.f32.partialorder %v1014_v58, 1.0  ;;  %vm1050_vm4 = vcmp.ge.f32.partialorder %v1018_v37, 1.0  ;;  %v1011_v1 = vadd.f32 %v2926_v4, %v2902_v61 }
 0x169   : > { %1900 = vmatprep.mubr.msk.bf16.mxu0 %vm1899_vm2, %v2271_v31  ;;  %1197 = vst [vmem:[#allocation3 + $0x90] sm:$0xff] %v1165_v5  ;;  %1201 = vst [vmem:[#allocation3 + $0xb0] sm:$0xff] %v1169_v38  ;;  %v1850_v7 = vsel %vm1046_vm3, 1.0, %v2270_v9  ;;  %v1854_v50 = vsel %vm1050_vm4, 1.0, %v2270_v9  ;;  %v1015_v15 = vadd.f32 %v2996_v36, %v2972_v30  ;;  %v1172_v53 = vmul.f32 %v1140_v17, %v1012_v8 }
 0x16a   : > { %vm1915_vm5 = vmpackc.low %vm1050_vm4, %vm1046_vm3  ;;  %v1176_v0 = vmul.f32 %v1144_v18, %v1016_v40  ;;  %v1142_v39 = vsub.f32 1.0, %v1850_v7  ;;  %v1146_v21 = vsub.f32 1.0, %v1854_v50  ;;  %vm1043_vm6 = vcmp.ge.f32.partialorder %v1011_v1, 1.0  ;;  %v2166_v50 = vld [vmem:[%s2399_s12 + $0x10] sm:$0xff] }
 0x16b   : > { %1916 = vmatprep.mubr.msk.bf16.mxu1 %vm1915_vm5, %v2271_v31  ;;  %vm1047_vm7 = vcmp.ge.f32.partialorder %v1015_v15, 1.0  ;;  %v1013_v22 = vadd.f32 %v2928_v24, %v2904_v62  ;;  %v1017_v19 = vadd.f32 %v2998_v16, %v2974_v52  ;;  %1204 = vst [vmem:[#allocation3 + $0xc8] sm:$0xff] %v1172_v53  ;;  %v1847_v30 = vsel %vm1043_vm6, 1.0, %v2270_v9  ;;  %v2167_v53 = vld [vmem:[%s2399_s12 + $0x18] sm:$0xff] }
 0x16c   : > { %1208 = vst [vmem:[#allocation3 + $0xe8] sm:$0xff] %v1176_v0  ;;  %v1174_v61 = vmul.f32 %v1142_v39, %v1014_v58  ;;  %v1178_v4 = vmul.f32 %v1146_v21, %v1018_v37  ;;  %v1851_v57 = vsel %vm1047_vm7, 1.0, %v2270_v9  ;;  %vm1901_vm8 = vmpackc.low %vm1047_vm7, %vm1043_vm6  ;;  %v1139_v20 = vsub.f32 1.0, %v1847_v30 }
 0x16d   : > { %v1143_v2 = vsub.f32 1.0, %v1851_v57  ;;  %1902 = vmatmul.mubr.msk.bf16.gmra.mrb[28].mxu0 %vm1901_vm8, %v2271_v31  ;;  %vm1045_vm9 = vcmp.ge.f32.partialorder %v1013_v22, 1.0  ;;  %vm1049_vm10 = vcmp.ge.f32.partialorder %v1017_v19, 1.0 }
 0x16e   : > { %1206 = vst [vmem:[#allocation3 + $0xd8] sm:$0xff] %v1174_v61  ;;  %1210 = vst [vmem:[#allocation3 + $0xf8] sm:$0xff] %v1178_v4  ;;  %v1849_v62 = vsel %vm1045_vm9, 1.0, %v2270_v9  ;;  %v1853_v24 = vsel %vm1049_vm10, 1.0, %v2270_v9  ;;  %v1171_v52 = vmul.f32 %v1139_v20, %v1011_v1 }
 0x16f   : > { %vm1917_vm11 = vmpackc.low %vm1049_vm10, %vm1045_vm9  ;;  %v1175_v46 = vmul.f32 %v1143_v2, %v1015_v15  ;;  %v1141_v36 = vsub.f32 1.0, %v1849_v62  ;;  %v1145_v16 = vsub.f32 1.0, %v1853_v24 }
 0x170   : > { %1918 = vmatmul.mubr.msk.bf16.gmra.mrb[28].mxu1 %vm1917_vm11, %v2271_v31  ;;  %1203 = vst [vmem:[#allocation3 + $0xc0] sm:$0xff] %v1171_v52  ;;  %v3049_v31 = vld [vmem:[%s3157_s5] ss:$0 sm:$0xff] }
 0x171   : > { %1207 = vst [vmem:[#allocation3 + $0xe0] sm:$0xff] %v1175_v46  ;;  %v1173_v23 = vmul.f32 %v1141_v36, %v1013_v22  ;;  %v1177_v32 = vmul.f32 %v1145_v16, %v1017_v19 }
 0x173   : > { %1205 = vst [vmem:[#allocation3 + $0xd0] sm:$0xff] %v1173_v23  ;;  %1209 = vst [vmem:[#allocation3 + $0xf0] sm:$0xff] %v1177_v32 }
 0x215   : > { %v1943_v25 = vpop.f32.mrb[16].mxu0 }
 0x216   : > { %v1944_v47 = vpop.f32.mrb[17].mxu0 }
 0x217   : > { %v1983_v26 = vpop.f32.mrb[16].mxu1  ;;  %v1945_v34 = vadd.f32 %v1944_v47, %v1943_v25  ;;  %v1946_v9 = vpop.f32.mrb[18].mxu0 }
 0x218   : > { %v1984_v54 = vpop.f32.mrb[17].mxu1  ;;  %v1947_v11 = vpop.f32.mrb[19].mxu0 }
 0x219   : > { %v1985_v43 = vadd.f32 %v1984_v54, %v1983_v26  ;;  %v1986_v63 = vpop.f32.mrb[18].mxu1  ;;  %v1948_v59 = vadd.f32 %v1947_v11, %v1946_v9  ;;  %v2168_v26 = vld [vmem:[%s2399_s12 + $0x20] sm:$0xff] }
 0x21a   : > { %v1987_v13 = vpop.f32.mrb[19].mxu1 }
 0x21b   : > { %v1583_v14 = vadd.f32 %v1985_v43, %v1945_v34  ;;  %v1988_v10 = vadd.f32 %v1987_v13, %v1986_v63 }
 0x21d   : > { %v1620_v51 = vmul.f32 %v3049_v31, %v1583_v14  ;;  %v1586_v35 = vadd.f32 %v1988_v10, %v1948_v59  ;;  %v2169_v59 = vld [vmem:[%s2399_s12 + $0x28] sm:$0xff] }
 0x21f   : > { %v1635_v3 = vadd.f32 %v3054_v29, %v1620_v51  ;;  %v1621_v42 = vmul.f32 %v3049_v31, %v1586_v35 }
 0x221   : > { %v1643_v44 = vadd.f32 %v2164_v41, %v1635_v3  ;;  %v1636_v27 = vadd.f32 %v3054_v29, %v1621_v42 }
 0x223   : > { %1651 = vst [vmem:[%s2401_s11] sm:$0xff] %v1643_v44  ;;  %v1644_v6 = vadd.f32 %v2165_v48, %v1636_v27 }
 0x225   : > { %1652 = vst [vmem:[%s2401_s11 + $0x8] sm:$0xff] %v1644_v6  ;;  %v2170_v6 = vld [vmem:[%s2399_s12 + $0x30] sm:$0xff] }
 0x227   : > { %v1949_v45 = vpop.f32.mrb[20].mxu0 }
 0x228   : > { %v1950_v28 = vpop.f32.mrb[21].mxu0 }
 0x229   : > { %v1951_v8 = vadd.f32 %v1950_v28, %v1949_v45  ;;  %v1952_v40 = vpop.f32.mrb[22].mxu0 }
 0x22a   : > { %v1953_v33 = vpop.f32.mrb[23].mxu0  ;;  %v1989_v55 = vpop.f32.mrb[20].mxu1 }
 0x22b   : > { %v1954_v12 = vadd.f32 %v1953_v33, %v1952_v40  ;;  %v1990_v60 = vpop.f32.mrb[21].mxu1 }
 0x22c   : > { %v1991_v58 = vadd.f32 %v1990_v60, %v1989_v55  ;;  %v1992_v37 = vpop.f32.mrb[22].mxu1 }
 0x22d   : > { %v1993_v5 = vpop.f32.mrb[23].mxu1 }
 0x22e   : > { %v1591_v38 = vadd.f32 %v1991_v58, %v1951_v8  ;;  %v1994_v56 = vadd.f32 %v1993_v5, %v1992_v37  ;;  %v2171_v8 = vld [vmem:[%s2399_s12 + $0x38] sm:$0xff] }
 0x230   : > { %v1622_v49 = vmul.f32 %v3049_v31, %v1591_v38  ;;  %v1594_v17 = vadd.f32 %v1994_v56, %v1954_v12 }
 0x232   : > { %v1637_v18 = vadd.f32 %v3054_v29, %v1622_v49  ;;  %v1623_v7 = vmul.f32 %v3049_v31, %v1594_v17 }
 0x234   : > { %v1645_v1 = vadd.f32 %v2166_v50, %v1637_v18  ;;  %v1638_v15 = vadd.f32 %v3054_v29, %v1623_v7 }
 0x236   : > { %1653 = vst [vmem:[%s2401_s11 + $0x10] sm:$0xff] %v1645_v1  ;;  %v1646_v0 = vadd.f32 %v2167_v53, %v1638_v15  ;;  %v1955_v39 = vpop.f32.mrb[24].mxu0 }
 0x237   : > { %v1956_v21 = vpop.f32.mrb[25].mxu0 }
 0x238   : > { %1654 = vst [vmem:[%s2401_s11 + $0x18] sm:$0xff] %v1646_v0  ;;  %v1957_v19 = vadd.f32 %v1956_v21, %v1955_v39  ;;  %v1958_v61 = vpop.f32.mrb[26].mxu0 }
 0x239   : > { %v1995_v22 = vpop.f32.mrb[24].mxu1  ;;  %v1959_v30 = vpop.f32.mrb[27].mxu0 }
 0x23a   : > { %v1996_v4 = vpop.f32.mrb[25].mxu1  ;;  %v1960_v2 = vadd.f32 %v1959_v30, %v1958_v61 }
 0x23b   : > { %v1997_v57 = vadd.f32 %v1996_v4, %v1995_v22  ;;  %v1998_v20 = vpop.f32.mrb[26].mxu1 }
 0x23c   : > { %v1999_v62 = vpop.f32.mrb[27].mxu1 }
 0x23d   : > { %v1599_v24 = vadd.f32 %v1997_v57, %v1957_v19  ;;  %v2000_v52 = vadd.f32 %v1999_v62, %v1998_v20 }
 0x23f   : > { %v1624_v46 = vmul.f32 %v3049_v31, %v1599_v24  ;;  %v1602_v36 = vadd.f32 %v2000_v52, %v1960_v2 }
 0x240   : > { %v1961_v32 = vpop.f32.mrb[28].mxu0 }
 0x241   : > { %v1639_v16 = vadd.f32 %v3054_v29, %v1624_v46  ;;  %v1625_v23 = vmul.f32 %v3049_v31, %v1602_v36  ;;  %v1962_v25 = vpop.f32.mrb[29].mxu0 }
 0x242   : > { %v1963_v9 = vadd.f32 %v1962_v25, %v1961_v32  ;;  %v1964_v43 = vpop.f32.mrb[30].mxu0 }
 0x243   : > { %v1647_v47 = vadd.f32 %v2168_v26, %v1639_v16  ;;  %v1640_v34 = vadd.f32 %v3054_v29, %v1625_v23  ;;  %v2001_v54 = vpop.f32.mrb[28].mxu1  ;;  %v1965_v11 = vpop.f32.mrb[31].mxu0 }
 0x244   : > { %v2002_v63 = vpop.f32.mrb[29].mxu1  ;;  %v1966_v51 = vadd.f32 %v1965_v11, %v1964_v43 }
 0x245   : > { %1655 = vst [vmem:[%s2401_s11 + $0x20] sm:$0xff] %v1647_v47  ;;  %v1648_v13 = vadd.f32 %v2169_v59, %v1640_v34  ;;  %v2003_v14 = vadd.f32 %v2002_v63, %v2001_v54  ;;  %v2004_v10 = vpop.f32.mrb[30].mxu1 }
 0x246   : > { %v2005_v35 = vpop.f32.mrb[31].mxu1 }
 0x247   : > { %1656 = vst [vmem:[%s2401_s11 + $0x28] sm:$0xff] %v1648_v13  ;;  %v1607_v3 = vadd.f32 %v2003_v14, %v1963_v9  ;;  %v2006_v42 = vadd.f32 %v2005_v35, %v2004_v10 }
 0x249   : > { %v1626_v41 = vmul.f32 %v3049_v31, %v1607_v3  ;;  %v1610_v44 = vadd.f32 %v2006_v42, %v1966_v51 }
 0x24b   : > { %v1641_v27 = vadd.f32 %v3054_v29, %v1626_v41  ;;  %v1627_v48 = vmul.f32 %v3049_v31, %v1610_v44 }
 0x24d   : > { %v1649_v45 = vadd.f32 %v2170_v6, %v1641_v27  ;;  %v1642_v28 = vadd.f32 %v3054_v29, %v1627_v48 }
 0x24f   : > { %1657 = vst [vmem:[%s2401_s11 + $0x30] sm:$0xff] %v1649_v45  ;;  %v1650_v40 = vadd.f32 %v2171_v8, %v1642_v28 }
 0x251   : > { %1658 = vst [vmem:[%s2401_s11 + $0x38] sm:$0xff] %v1650_v40 }
 0x252   : > { %2185 = shalt.err (!%p2182_p9)
}
 0x253   : > { %s2186_s11 = scalar_lea.hbm %s3091_s23, 1024  ;;  %s2190_s18 = scalar_lea.hbm %s3159_s7, 8192 }
 0x254   : > { %p2187_p10 = scmp.ne.s32.totalorder %s3091_s23, %s2186_s11  ;;  %p2191_p13 = scmp.lt.u32.totalorder %s3091_s23, %s3159_s7 }
 0x255   : > { %p2192_p0 = scmp.lt.u32.totalorder %s2190_s18, %s2186_s11  ;;  %p2194_p2 = scmp.lt.u32.totalorder %s2186_s11, %s3091_s23 }
 0x256   : > { %p2188_p11 = pnand %p2187_p10, %p2366_p3 }
 0x257   : > { %p2193_p1 = por %p2192_p0, %p2191_p13 }
 0x258   : > { %p2189_p12 = pneg %p2188_p11 }
 0x259   : > { %p2195_p4 = por %p2194_p2, %p2193_p1 }
 0x25b   : > { %p2196_p5 = pnand %p2195_p4, %p2189_p12 }
 0x25d   : > { %2199 = shalt.err (!%p2196_p5)
}
 0x25e   : > { %s2273_s21 = smov 128   ;;  %s2274_s9 = smov 8  }
 0x25f   : > { %2007 = dma.vmem_to_hbm [thread:$0]  (%p2366_p3), %s3093_s28, 1024, %s3091_s23, %s3100_s20, %s2273_s21, %s2273_s21, %s2274_s9  }
 0x260 PF: > { %p2013_p6 = scmp.ge.s32.totalorder %s2266_s8, 2  ;;  %s1690_s10 = sand.u32 1, %s2238_s24  }
 0x261   : > { %s1691_s13 = scalar_lea.sflag [#allocation5], %s1690_s10 }
 0x262   : > { %p2010_p7 = pnand %p2013_p6, %p2375_p8 }
 0x264   : > { %2233 = dma.done.wait (!%p2010_p7), %s1691_s13, 1024  }
 0x265   : > { %2235 = vsyncadd (!%p2010_p7), %s1691_s13, 4294966272  ;;  %s20_s8 = sadd.s32 1, %s2266_s8   ;;  %s3178_s14 = sld [smem:[#allocation7_spill]] }
 0x266   : > { %p17_p9 = scmp.ge.s32.totalorder %s20_s8, 10   ;;  %s3179_s23 = sld [smem:[#allocation8_spill]] }
 0x267   : > { %s3180_s24 = smov %s2242_s25  ;;  %s3181_s25 = smov %s2246_s26 }
 0x268   : > { %s3182_s26 = smov %s2384_s19  ;;  %s3183_s27 = smov %s2258_s29 }
 0x269   : > { %s3184_s28 = smov %s2262_s30  ;;  %19 = sbr.rel (!%p17_p9) target bundleno = 5 (0x5), region = 87 }
 0x26b   : > { %s3185_s29 = smov %s3178_s14 }
 0x26c   : > { %s3186_s30 = smov %s3179_s23 }
 0x270   :  { %1696 = vsyncpa [#allocation5], 1 }
 0x271   :  { %1698 = vsyncpa [#allocation5 + $0x1], 1 }

</bundles_post_ra>
